<compile_context>
chip_gen: v7x
topology: tpu7x:2x2x1
jax: 0.10.0
libtpu: 0.0.40
codegen_flags: <defaults>
</compile_context>

<pallas_src>
import numpy as np
import jax
import jax.numpy as jnp
from jax.experimental import pallas as pl
from jax.experimental.pallas import tpu as pltpu

NEG_SLOPE = 0.01  # F.leaky_relu default negative_slope


def _leaky(v):
    return jnp.where(v >= 0, v, NEG_SLOPE * v)


def graph_learning_encoder_kernel(
    xp_ref,      # (1, C, (T-1)+2, Ns)  causally padded x[..., :-1, :]
    ylast_ref,   # (1, C, Nd)           y[..., -1, :]
    p_ref,       # (C, K)               all grouped-conv weights/biases packed
    o_ref,       # (1, C, Ns, Nd)
):
    xp = xp_ref[0]                      # (C, Tp, Ns)
    y_last = ylast_ref[0]               # (C, Nd)
    p = p_ref[...]                      # (C, K)

    _, Tp, _ = xp.shape
    Tm1 = Tp - 2                        # = time_lags - 1

    # ---- static slices of the packed parameter slab ----
    o = 0
    w_tcm = p[:, o:o + 3]; o += 3       # TCM stand-in conv (k=3)
    b_tcm = p[:, o:o + 1]; o += 1
    w_t   = p[:, o:o + Tm1]; o += Tm1   # Conv2d(C,C,(T-1,1),groups=C)
    b_t   = p[:, o:o + 1]; o += 1
    w_ne  = p[:, o:o + 2]; o += 2       # node2edge_conv (1,2)
    b_ne  = p[:, o:o + 1]; o += 1
    w_es  = p[:, o:o + 1]; o += 1       # edge2src_node_conv (1,1)
    b_es  = p[:, o:o + 1]; o += 1
    w_ed  = p[:, o:o + 1]; o += 1       # edge2dst_node_conv (1,1)
    b_ed  = p[:, o:o + 1]; o += 1
    w_ne2 = p[:, o:o + 3]; o += 3       # node2edge_conv_2 (1,3)
    b_ne2 = p[:, o:o + 1]; o += 1

    # ---- hoisted broadcasts (JAX does not CSE broadcast_in_dim) ----
    w_tcm0 = w_tcm[:, 0:1, None]        # (C,1,1)
    w_tcm1 = w_tcm[:, 1:2, None]
    w_tcm2 = w_tcm[:, 2:3, None]
    b_tcm3 = b_tcm[:, :, None]
    w_t3   = w_t[:, :, None]            # (C,Tm1,1)
    w_ne0  = w_ne[:, 0:1, None]
    w_ne1  = w_ne[:, 1:2, None]
    b_ne3  = b_ne[:, :, None]
    w_a    = w_ne2[:, 0:1, None]
    w_b    = w_ne2[:, 1:2, None]
    w_c    = w_ne2[:, 2:3, None]
    b_ne23 = b_ne2[:, :, None]

    # ---- TCM stand-in: grouped causal conv (k=3) + leaky relu + residual ----
    h = (w_tcm0 * xp[:, 0:Tm1, :]
         + w_tcm1 * xp[:, 1:Tm1 + 1, :]
         + w_tcm2 * xp[:, 2:Tm1 + 2, :]
         + b_tcm3)
    h = _leaky(h) + xp[:, 2:, :]                         # (C, T-1, Ns)

    # ---- grouped Conv2d(C, C, (T-1, 1), groups=C): reduce over time ----
    x_cause = jnp.sum(w_t3 * h, axis=1) + b_t            # (C, Ns)

    # ---- full-bipartite edge set (edge e = s*Nd + d) ----
    # gather x_cause[..., src, :]  == broadcast over dst axis
    # gather y_last[...,  dst, :]  == broadcast over src axis
    xg = x_cause[:, :, None]                             # (C, Ns, 1)
    yg = y_last[:, None, :]                              # (C, 1, Nd)

    # node2edge_conv: grouped (1,2) conv
    h_e = w_ne0 * xg + w_ne1 * yg + b_ne3                # (C, Ns, Nd)

    # scatter_mean over edges -> nodes == axis mean on the bipartite grid
    sm_src = jnp.mean(h_e, axis=2)                       # (C, Ns)
    sm_dst = jnp.mean(h_e, axis=1)                       # (C, Nd)
    xc2 = _leaky(w_es * sm_src + b_es)                   # (C, Ns)
    yr2 = _leaky(w_ed * sm_dst + b_ed)                   # (C, Nd)

    # node2edge_conv_2: grouped (1,3) conv over [gather(xc2), gather(yr2), h_skip]
    out = _leaky(w_a * xc2[:, :, None]
                 + w_b * yr2[:, None, :]
                 + w_c * h_e
                 + b_ne23)                               # (C, Ns, Nd)

    o_ref[0] = out


def graph_learning_encoder(x, y, src, dst, params):
    """x: (B, C, T, Ns), y: (B, C, T, Nd), src/dst: (E,) int32 edge endpoints."""
    B, C, T, Ns = x.shape
    _, _, _, Nd = y.shape
    E = src.shape[0]

    # The module's final reshape requires the full bipartite edge set; the
    # broadcast/mean rewrite additionally requires the canonical ordering
    # e = s*Nd + d (src = repeat(arange(Ns), Nd), dst = tile(arange(Nd), Ns)).
    # TODO(synk): general edge lists would need a gather / segment-mean path.
    assert E == Ns * Nd, "final reshape requires a full bipartite edge set"
    src_np = np.asarray(src)
    dst_np = np.asarray(dst)
    assert np.array_equal(src_np, np.repeat(np.arange(Ns), Nd)), "non-canonical src ordering"
    assert np.array_equal(dst_np, np.tile(np.arange(Nd), Ns)), "non-canonical dst ordering"

    # Glue (plain JAX): causal pad of x[..., :-1, :], last-time slice of y,
    # and one packed parameter slab (single DMA instead of 12).
    xp = jnp.pad(x[:, :, :-1, :], ((0, 0), (0, 0), (2, 0), (0, 0)))   # (B,C,T-1+2,Ns)
    y_last = y[:, :, -1, :]                                           # (B,C,Nd)
    p_all = jnp.concatenate([jnp.asarray(w, jnp.float32) for w in params], axis=1)  # (C,K)

    Tp = T + 1
    Kp = p_all.shape[1]

    grid_spec = pltpu.PrefetchScalarGridSpec(
        num_scalar_prefetch=0,
        grid=(B,),
        in_specs=[
            pl.BlockSpec((1, C, Tp, Ns), lambda b: (b, 0, 0, 0)),
            pl.BlockSpec((1, C, Nd), lambda b: (b, 0, 0)),
            pl.BlockSpec((C, Kp), lambda b: (0, 0)),   # constant block: fetched once
        ],
        out_specs=pl.BlockSpec((1, C, Ns, Nd), lambda b: (b, 0, 0, 0)),
    )

    out = pl.pallas_call(
        graph_learning_encoder_kernel,
        out_shape=jax.ShapeDtypeStruct((B, C, Ns, Nd), jnp.float32),
        grid_spec=grid_spec,
        compiler_params=pltpu.CompilerParams(
            dimension_semantics=("parallel",)),        # batch axis shards across v7x TCs
    )(xp, y_last, p_all)

    # already (bs, c, num_src, num_dst) == h_e.squeeze().reshape(...)
    return out


def _reference(x, y, src, dst, params):
    """Pure-JAX reference with the general gather / scatter_mean formulation."""
    (w_tcm, b_tcm, w_t, b_t, w_ne, b_ne,
     w_es, b_es, w_ed, b_ed, w_ne2, b_ne2) = params
    B, C, T, Ns = x.shape
    Nd = y.shape[-1]
    Tm1 = T - 1

    def lk(v):
        return jnp.where(v >= 0, v, NEG_SLOPE * v)

    xp = jnp.pad(x[:, :, :-1, :], ((0, 0), (0, 0), (2, 0), (0, 0)))
    h = (w_tcm[None, :, 0:1, None] * xp[:, :, 0:Tm1]
         + w_tcm[None, :, 1:2, None] * xp[:, :, 1:Tm1 + 1]
         + w_tcm[None, :, 2:3, None] * xp[:, :, 2:Tm1 + 2]
         + b_tcm[None, :, :, None])
    h = lk(h) + xp[:, :, 2:]
    x_cause = jnp.sum(w_t[None, :, :, None] * h, axis=2) + b_t[None]     # (B,C,Ns)
    y_resp = y[:, :, -1, :]                                              # (B,C,Nd)

    xg = x_cause[:, :, src]                                              # (B,C,E)
    yg = y_resp[:, :, dst]
    h_e = w_ne[None, :, 0:1] * xg + w_ne[None, :, 1:2] * yg + b_ne[None]

    oh_s = (src[None, :] == jnp.arange(Ns)[:, None]).astype(jnp.float32)  # (Ns,E)
    oh_d = (dst[None, :] == jnp.arange(Nd)[:, None]).astype(jnp.float32)  # (Nd,E)
    cnt_s = jnp.maximum(oh_s.sum(1), 1.0)
    cnt_d = jnp.maximum(oh_d.sum(1), 1.0)
    sm_src = jnp.einsum('bce,ne->bcn', h_e, oh_s) / cnt_s[None, None, :]
    sm_dst = jnp.einsum('bce,ne->bcn', h_e, oh_d) / cnt_d[None, None, :]
    xc2 = lk(w_es[None] * sm_src + b_es[None])
    yr2 = lk(w_ed[None] * sm_dst + b_ed[None])

    xg2 = xc2[:, :, src]
    yg2 = yr2[:, :, dst]
    out = lk(w_ne2[None, :, 0:1] * xg2 + w_ne2[None, :, 1:2] * yg2
             + w_ne2[None, :, 2:3] * h_e + b_ne2[None])
    return out.reshape(B, C, Ns, Nd)


if __name__ == "__main__":
    key = jax.random.PRNGKey(0)
    B, C, T, Ns, Nd = 2, 4, 8, 128, 128   # num_heteros=C, time_lags=T
    keys = jax.random.split(key, 14)
    kx, ky, pkeys = keys[0], keys[1], keys[2:]

    x = jax.random.normal(kx, (B, C, T, Ns), jnp.float32)
    y = jax.random.normal(ky, (B, C, T, Nd), jnp.float32)
    # full bipartite edge set: E = Ns * Nd, edge e = s*Nd + d
    src = jnp.repeat(jnp.arange(Ns, dtype=jnp.int32), Nd)
    dst = jnp.tile(jnp.arange(Nd, dtype=jnp.int32), Ns)

    def p(k, shape):
        return 0.1 * jax.random.normal(k, shape, jnp.float32)

    params = [
        p(pkeys[0], (C, 3)),      p(pkeys[1], (C, 1)),    # TCM stand-in
        p(pkeys[2], (C, T - 1)),  p(pkeys[3], (C, 1)),    # tcm final conv (T-1,1)
        p(pkeys[4], (C, 2)),      p(pkeys[5], (C, 1)),    # node2edge_conv (1,2)
        p(pkeys[6], (C, 1)),      p(pkeys[7], (C, 1)),    # edge2src_node_conv (1,1)
        p(pkeys[8], (C, 1)),      p(pkeys[9], (C, 1)),    # edge2dst_node_conv (1,1)
        p(pkeys[10], (C, 3)),     p(pkeys[11], (C, 1)),   # node2edge_conv_2 (1,3)
    ]

    out = graph_learning_encoder(x, y, src, dst, params)
    jax.block_until_ready(out)
    assert out.shape == (B, C, Ns, Nd)

    ref = _reference(x, y, src, dst, params)
    np.testing.assert_allclose(np.asarray(out), np.asarray(ref), rtol=1e-3, atol=1e-3)

    print("KERNEL_OK")
</pallas_src>

<mosaic_0001>
module attributes {stable_mosaic.version = 11 : i64} {
  func.func @graph_learning_encoder_kernel(%arg0: i32, %arg1: memref<1x4x9x128xf32, #tpu.memory_space<vmem>>, %arg2: memref<1x4x128xf32, #tpu.memory_space<vmem>>, %arg3: memref<4x23xf32, #tpu.memory_space<vmem>>, %arg4: memref<1x4x128x128xf32, #tpu.memory_space<vmem>>) attributes {dimension_semantics = [#tpu.dimension_semantics<parallel>], iteration_bounds = array<i64: 2>, scalar_prefetch = 0 : i64, scratch_operands = 0 : i64, tpu.core_type = #tpu.core_type<tc>, window_params = [{transform_indices = @transform_0, window_bounds = array<i64: 1, 4, 9, 128>}, {transform_indices = @transform_1, window_bounds = array<i64: 1, 4, 128>}, {pipeline_mode = #tpu.pipeline_mode<synchronous>, transform_indices = @transform_2, window_bounds = array<i64: 4, 23>}, {transform_indices = @transform_3, window_bounds = array<i64: 1, 4, 128, 128>}]} {
    %c0 = arith.constant 0 : index
    %c0_0 = arith.constant 0 : index
    %c0_1 = arith.constant 0 : index
    %c0_2 = arith.constant 0 : index
    %0 = vector.load %arg1[%c0, %c0_0, %c0_1, %c0_2] : memref<1x4x9x128xf32, #tpu.memory_space<vmem>>, vector<1x4x9x128xf32>
    %1 = vector.shape_cast %0 : vector<1x4x9x128xf32> to vector<4x9x128xf32>
    %c0_3 = arith.constant 0 : index
    %c0_4 = arith.constant 0 : index
    %c0_5 = arith.constant 0 : index
    %2 = vector.load %arg2[%c0_3, %c0_4, %c0_5] : memref<1x4x128xf32, #tpu.memory_space<vmem>>, vector<1x4x128xf32>
    %3 = vector.shape_cast %2 : vector<1x4x128xf32> to vector<4x128xf32>
    %c0_6 = arith.constant 0 : index
    %c0_7 = arith.constant 0 : index
    %4 = vector.load %arg3[%c0_6, %c0_7] : memref<4x23xf32, #tpu.memory_space<vmem>>, vector<4x23xf32>
    %5 = vector.extract_strided_slice %4 {offsets = [0, 0], sizes = [4, 3], strides = [1, 1]} : vector<4x23xf32> to vector<4x3xf32>
    %6 = vector.extract_strided_slice %4 {offsets = [0, 3], sizes = [4, 1], strides = [1, 1]} : vector<4x23xf32> to vector<4x1xf32>
    %7 = vector.extract_strided_slice %4 {offsets = [0, 4], sizes = [4, 7], strides = [1, 1]} : vector<4x23xf32> to vector<4x7xf32>
    %8 = vector.extract_strided_slice %4 {offsets = [0, 11], sizes = [4, 1], strides = [1, 1]} : vector<4x23xf32> to vector<4x1xf32>
    %9 = vector.extract_strided_slice %4 {offsets = [0, 12], sizes = [4, 2], strides = [1, 1]} : vector<4x23xf32> to vector<4x2xf32>
    %10 = vector.extract_strided_slice %4 {offsets = [0, 14], sizes = [4, 1], strides = [1, 1]} : vector<4x23xf32> to vector<4x1xf32>
    %11 = vector.extract_strided_slice %4 {offsets = [0, 15], sizes = [4, 1], strides = [1, 1]} : vector<4x23xf32> to vector<4x1xf32>
    %12 = vector.extract_strided_slice %4 {offsets = [0, 16], sizes = [4, 1], strides = [1, 1]} : vector<4x23xf32> to vector<4x1xf32>
    %13 = vector.extract_strided_slice %4 {offsets = [0, 17], sizes = [4, 1], strides = [1, 1]} : vector<4x23xf32> to vector<4x1xf32>
    %14 = vector.extract_strided_slice %4 {offsets = [0, 18], sizes = [4, 1], strides = [1, 1]} : vector<4x23xf32> to vector<4x1xf32>
    %15 = vector.extract_strided_slice %4 {offsets = [0, 19], sizes = [4, 3], strides = [1, 1]} : vector<4x23xf32> to vector<4x3xf32>
    %16 = vector.extract_strided_slice %4 {offsets = [0, 22], sizes = [4, 1], strides = [1, 1]} : vector<4x23xf32> to vector<4x1xf32>
    %17 = vector.extract_strided_slice %5 {offsets = [0, 0], sizes = [4, 1], strides = [1, 1]} : vector<4x3xf32> to vector<4x1xf32>
    %18 = vector.shape_cast %17 : vector<4x1xf32> to vector<4x1x1xf32>
    %19 = vector.extract_strided_slice %5 {offsets = [0, 1], sizes = [4, 1], strides = [1, 1]} : vector<4x3xf32> to vector<4x1xf32>
    %20 = vector.shape_cast %19 : vector<4x1xf32> to vector<4x1x1xf32>
    %21 = vector.extract_strided_slice %5 {offsets = [0, 2], sizes = [4, 1], strides = [1, 1]} : vector<4x3xf32> to vector<4x1xf32>
    %22 = vector.shape_cast %21 : vector<4x1xf32> to vector<4x1x1xf32>
    %23 = vector.shape_cast %6 : vector<4x1xf32> to vector<4x1x1xf32>
    %24 = vector.shape_cast %7 : vector<4x7xf32> to vector<4x7x1xf32>
    %25 = vector.extract_strided_slice %9 {offsets = [0, 0], sizes = [4, 1], strides = [1, 1]} : vector<4x2xf32> to vector<4x1xf32>
    %26 = vector.shape_cast %25 : vector<4x1xf32> to vector<4x1x1xf32>
    %27 = vector.extract_strided_slice %9 {offsets = [0, 1], sizes = [4, 1], strides = [1, 1]} : vector<4x2xf32> to vector<4x1xf32>
    %28 = vector.shape_cast %27 : vector<4x1xf32> to vector<4x1x1xf32>
    %29 = vector.shape_cast %10 : vector<4x1xf32> to vector<4x1x1xf32>
    %30 = vector.extract_strided_slice %15 {offsets = [0, 0], sizes = [4, 1], strides = [1, 1]} : vector<4x3xf32> to vector<4x1xf32>
    %31 = vector.shape_cast %30 : vector<4x1xf32> to vector<4x1x1xf32>
    %32 = vector.extract_strided_slice %15 {offsets = [0, 1], sizes = [4, 1], strides = [1, 1]} : vector<4x3xf32> to vector<4x1xf32>
    %33 = vector.shape_cast %32 : vector<4x1xf32> to vector<4x1x1xf32>
    %34 = vector.extract_strided_slice %15 {offsets = [0, 2], sizes = [4, 1], strides = [1, 1]} : vector<4x3xf32> to vector<4x1xf32>
    %35 = vector.shape_cast %34 : vector<4x1xf32> to vector<4x1x1xf32>
    %36 = vector.shape_cast %16 : vector<4x1xf32> to vector<4x1x1xf32>
    %37 = vector.extract_strided_slice %1 {offsets = [0, 0, 0], sizes = [4, 7, 128], strides = [1, 1, 1]} : vector<4x9x128xf32> to vector<4x7x128xf32>
    %38 = vector.broadcast %18 : vector<4x1x1xf32> to vector<4x7x128xf32>
    %39 = arith.mulf %38, %37 : vector<4x7x128xf32>
    %40 = vector.extract_strided_slice %1 {offsets = [0, 1, 0], sizes = [4, 7, 128], strides = [1, 1, 1]} : vector<4x9x128xf32> to vector<4x7x128xf32>
    %41 = vector.broadcast %20 : vector<4x1x1xf32> to vector<4x7x128xf32>
    %42 = arith.mulf %41, %40 : vector<4x7x128xf32>
    %43 = arith.addf %39, %42 : vector<4x7x128xf32>
    %44 = vector.extract_strided_slice %1 {offsets = [0, 2, 0], sizes = [4, 7, 128], strides = [1, 1, 1]} : vector<4x9x128xf32> to vector<4x7x128xf32>
    %45 = vector.broadcast %22 : vector<4x1x1xf32> to vector<4x7x128xf32>
    %46 = arith.mulf %45, %44 : vector<4x7x128xf32>
    %47 = arith.addf %43, %46 : vector<4x7x128xf32>
    %48 = vector.broadcast %23 : vector<4x1x1xf32> to vector<4x7x128xf32>
    %49 = arith.addf %47, %48 : vector<4x7x128xf32>
    %cst = arith.constant 0.000000e+00 : f32
    %50 = vector.broadcast %cst : f32 to vector<4x7x128xf32>
    %51 = arith.cmpf oge, %49, %50 : vector<4x7x128xf32>
    %cst_8 = arith.constant 0.00999999977 : f32
    %52 = vector.broadcast %cst_8 : f32 to vector<4x7x128xf32>
    %53 = arith.mulf %52, %49 : vector<4x7x128xf32>
    %54 = arith.select %51, %49, %53 : vector<4x7x128xi1>, vector<4x7x128xf32>
    %55 = vector.extract_strided_slice %1 {offsets = [0, 2, 0], sizes = [4, 7, 128], strides = [1, 1, 1]} : vector<4x9x128xf32> to vector<4x7x128xf32>
    %56 = arith.addf %54, %55 : vector<4x7x128xf32>
    %57 = vector.broadcast %24 : vector<4x7x1xf32> to vector<4x7x128xf32>
    %58 = arith.mulf %57, %56 : vector<4x7x128xf32>
    %cst_9 = arith.constant dense<0.000000e+00> : vector<4x128xf32>
    %59 = vector.multi_reduction <add>, %58, %cst_9 [1] : vector<4x7x128xf32> to vector<4x128xf32>
    %60 = vector.broadcast %8 : vector<4x1xf32> to vector<4x128xf32>
    %61 = arith.addf %59, %60 : vector<4x128xf32>
    %62 = vector.shape_cast %61 : vector<4x128xf32> to vector<4x128x1xf32>
    %63 = vector.shape_cast %3 : vector<4x128xf32> to vector<4x1x128xf32>
    %64 = vector.broadcast %26 : vector<4x1x1xf32> to vector<4x128x1xf32>
    %65 = arith.mulf %64, %62 : vector<4x128x1xf32>
    %66 = vector.broadcast %28 : vector<4x1x1xf32> to vector<4x1x128xf32>
    %67 = arith.mulf %66, %63 : vector<4x1x128xf32>
    %68 = vector.broadcast %65 : vector<4x128x1xf32> to vector<4x128x128xf32>
    %69 = vector.broadcast %67 : vector<4x1x128xf32> to vector<4x128x128xf32>
    %70 = arith.addf %68, %69 : vector<4x128x128xf32>
    %71 = vector.broadcast %29 : vector<4x1x1xf32> to vector<4x128x128xf32>
    %72 = arith.addf %70, %71 : vector<4x128x128xf32>
    %cst_10 = arith.constant dense<0.000000e+00> : vector<4x128xf32>
    %73 = vector.multi_reduction <add>, %72, %cst_10 [2] : vector<4x128x128xf32> to vector<4x128xf32>
    %cst_11 = arith.constant 1.280000e+02 : f32
    %74 = vector.broadcast %cst_11 : f32 to vector<4x128xf32>
    %75 = arith.divf %73, %74 : vector<4x128xf32>
    %cst_12 = arith.constant dense<0.000000e+00> : vector<4x128xf32>
    %76 = vector.multi_reduction <add>, %72, %cst_12 [1] : vector<4x128x128xf32> to vector<4x128xf32>
    %cst_13 = arith.constant 1.280000e+02 : f32
    %77 = vector.broadcast %cst_13 : f32 to vector<4x128xf32>
    %78 = arith.divf %76, %77 : vector<4x128xf32>
    %79 = vector.broadcast %11 : vector<4x1xf32> to vector<4x128xf32>
    %80 = arith.mulf %79, %75 : vector<4x128xf32>
    %81 = vector.broadcast %12 : vector<4x1xf32> to vector<4x128xf32>
    %82 = arith.addf %80, %81 : vector<4x128xf32>
    %cst_14 = arith.constant 0.000000e+00 : f32
    %83 = vector.broadcast %cst_14 : f32 to vector<4x128xf32>
    %84 = arith.cmpf oge, %82, %83 : vector<4x128xf32>
    %cst_15 = arith.constant 0.00999999977 : f32
    %85 = vector.broadcast %cst_15 : f32 to vector<4x128xf32>
    %86 = arith.mulf %85, %82 : vector<4x128xf32>
    %87 = arith.select %84, %82, %86 : vector<4x128xi1>, vector<4x128xf32>
    %88 = vector.broadcast %13 : vector<4x1xf32> to vector<4x128xf32>
    %89 = arith.mulf %88, %78 : vector<4x128xf32>
    %90 = vector.broadcast %14 : vector<4x1xf32> to vector<4x128xf32>
    %91 = arith.addf %89, %90 : vector<4x128xf32>
    %cst_16 = arith.constant 0.000000e+00 : f32
    %92 = vector.broadcast %cst_16 : f32 to vector<4x128xf32>
    %93 = arith.cmpf oge, %91, %92 : vector<4x128xf32>
    %cst_17 = arith.constant 0.00999999977 : f32
    %94 = vector.broadcast %cst_17 : f32 to vector<4x128xf32>
    %95 = arith.mulf %94, %91 : vector<4x128xf32>
    %96 = arith.select %93, %91, %95 : vector<4x128xi1>, vector<4x128xf32>
    %97 = vector.shape_cast %87 : vector<4x128xf32> to vector<4x128x1xf32>
    %98 = vector.broadcast %31 : vector<4x1x1xf32> to vector<4x128x1xf32>
    %99 = arith.mulf %98, %97 : vector<4x128x1xf32>
    %100 = vector.shape_cast %96 : vector<4x128xf32> to vector<4x1x128xf32>
    %101 = vector.broadcast %33 : vector<4x1x1xf32> to vector<4x1x128xf32>
    %102 = arith.mulf %101, %100 : vector<4x1x128xf32>
    %103 = vector.broadcast %99 : vector<4x128x1xf32> to vector<4x128x128xf32>
    %104 = vector.broadcast %102 : vector<4x1x128xf32> to vector<4x128x128xf32>
    %105 = arith.addf %103, %104 : vector<4x128x128xf32>
    %106 = vector.broadcast %35 : vector<4x1x1xf32> to vector<4x128x128xf32>
    %107 = arith.mulf %106, %72 : vector<4x128x128xf32>
    %108 = arith.addf %105, %107 : vector<4x128x128xf32>
    %109 = vector.broadcast %36 : vector<4x1x1xf32> to vector<4x128x128xf32>
    %110 = arith.addf %108, %109 : vector<4x128x128xf32>
    %cst_18 = arith.constant 0.000000e+00 : f32
    %111 = vector.broadcast %cst_18 : f32 to vector<4x128x128xf32>
    %112 = arith.cmpf oge, %110, %111 : vector<4x128x128xf32>
    %cst_19 = arith.constant 0.00999999977 : f32
    %113 = vector.broadcast %cst_19 : f32 to vector<4x128x128xf32>
    %114 = arith.mulf %113, %110 : vector<4x128x128xf32>
    %115 = arith.select %112, %110, %114 : vector<4x128x128xi1>, vector<4x128x128xf32>
    %c0_20 = arith.constant 0 : index
    %c0_21 = arith.constant 0 : index
    %c0_22 = arith.constant 0 : index
    %c0_23 = arith.constant 0 : index
    %116 = vector.load %arg4[%c0_20, %c0_21, %c0_22, %c0_23] : memref<1x4x128x128xf32, #tpu.memory_space<vmem>>, vector<1x4x128x128xf32>
    %117 = vector.shape_cast %116 : vector<1x4x128x128xf32> to vector<4x128x128xf32>
    %118 = vector.shape_cast %115 : vector<4x128x128xf32> to vector<1x4x128x128xf32>
    tpu.vector_store %arg4[%c0_20, %c0_21, %c0_22, %c0_23], %118 {strides = array<i32>} : memref<1x4x128x128xf32, #tpu.memory_space<vmem>>, vector<1x4x128x128xf32>,
    return
  }
  func.func @transform_0(%arg0: i32) -> (i32, i32, i32, i32) {
    %c0_i32 = arith.constant 0 : i32
    %c0_i32_0 = arith.constant 0 : i32
    %c0_i32_1 = arith.constant 0 : i32
    %c0_i32_2 = arith.constant 0 : i32
    return %arg0, %c0_i32, %c0_i32_0, %c0_i32_1 : i32, i32, i32, i32
  }
  func.func @transform_1(%arg0: i32) -> (i32, i32, i32) {
    %c0_i32 = arith.constant 0 : i32
    %c0_i32_0 = arith.constant 0 : i32
    %c0_i32_1 = arith.constant 0 : i32
    return %arg0, %c0_i32, %c0_i32_0 : i32, i32, i32
  }
  func.func @transform_2(%arg0: i32) -> (i32, i32) {
    %c0_i32 = arith.constant 0 : i32
    %c0_i32_0 = arith.constant 0 : i32
    %c0_i32_1 = arith.constant 0 : i32
    return %c0_i32, %c0_i32_0 : i32, i32
  }
  func.func @transform_3(%arg0: i32) -> (i32, i32, i32, i32) {
    %c0_i32 = arith.constant 0 : i32
    %c0_i32_0 = arith.constant 0 : i32
    %c0_i32_1 = arith.constant 0 : i32
    %c0_i32_2 = arith.constant 0 : i32
    return %arg0, %c0_i32, %c0_i32_0, %c0_i32_1 : i32, i32, i32, i32
  }
}

</mosaic_0001>

<bundles_post_ra>
// kernel: tpu_custom_call.1
= control target key start
LH: loop header
LB: loop body
LE: loop exit
PB: predicated region body
PF: predicated region fallthrough
CT: control target
= control target key end

     0   :  { %8 = vsyncpa [#allocation3], 0  ;;  %s5486_s0 = inlined_call_operand.vmem [shape: f32[2,4,9,128], index: 0, kind: input, shape index: {}]   ;;  %s5487_s1 = inlined_call_operand.vmem [shape: f32[2,4,128], index: 1, kind: input, shape index: {}]   ;;  %s5488_s2 = inlined_call_operand.vmem [shape: f32[4,23], index: 2, kind: input, shape index: {}]   ;;  %s5489_s3 = inlined_call_operand.hbm [shape: f32[2,4,128,128], index: 3, kind: output, shape index: {}]  }
   0x1   :  { %10 = vsyncpa [#allocation3 + $0x1], 0  ;;  %s3687_s12 = smov 0   ;;  %s3689_s13 = smov 0  }
   0x2   :  { %s3691_s14 = smov 0   ;;  %s3693_s15 = smov 0  }
   0x3 LB: > { %s3708_s16 = sadd.s32 4294967295, %s3645_s15   ;;  %s3481_s17 = sadd.s32 4294967294, %s3645_s15   ;;  %s3645_s15 = sphi %s3693_s15, %s5949_s15   ;;  %s3641_s14 = sphi %s3691_s14, %s5948_s14   ;;  %s3637_s13 = sphi %s3689_s13, %s5947_s13   ;;  %s3633_s12 = sphi %s3687_s12, %s5946_s12  }
   0x4   : > { %s3712_s18 = sadd.s32 1, %s3645_s15   ;;  %s96_s19 = sadd.s32 1, %s3641_s14 }
   0x5   : > { %s93_s20 = ssub.s32 %s3645_s15, %s3712_s18  ;;  %p106_p0 = scmp.ne.s32.totalorder %s3641_s14, %s3637_s13 }
   0x6   : > { %p94_p1 = scmp.eq.s32.totalorder %s93_s20, 0  ;;  %p107_p2 = scmp.eq.s32.totalorder %s3708_s16, 1 }
   0x7   : > { %p112_p3 = scmp.ne.s32.totalorder %s3637_s13, %s3633_s12  ;;  %p113_p4 = scmp.eq.s32.totalorder %s3481_s17, 1 }
   0x8   : > { %s3723_s21 = scalar_select %p94_p1, %s3641_s14, %s96_s19  }
   0x9   : > { %p3725_p5 = por %p107_p2, %p106_p0  ;;  %p3729_p6 = por %p113_p4, %p112_p3 }
   0xa   : > { %p3484_p7 = scmp.ge.s32.totalorder %s3645_s15, 1  ;;  %p149_p8 = scmp.lt.s32.totalorder %s3645_s15, 3 }
   0xc   : > { %p150_p9 = pnand %p3484_p7, %p149_p8 }
   0xe   : > { %153 = sbr.rel (%p150_p9) target bundleno = 1410 (0x582), region = 32 }
  0x15   : > { %v5493_v0 = vlaneseq  ;;  %v3647_v1 = vmov 1966171168   ;;  %v3648_v3 = vmov 0   ;;  %v195_v5 = vld [vmem:[%s5488_s2] sm:$0xf]  ;;  %v3649_v26 = vmov 1  }
  0x16   : > { %v198_v2 = vunpack.c.l.s4 %v3647_v1  ;;  %3556 = vset.pattern.permute.xlu1 %v3648_v3  ;;  %3555 = vset.pattern.permute.xlu0 %v3648_v3  ;;  %v3650_v27 = vmov 2   ;;  %v3651_v28 = vmov 3   ;;  %v3652_v29 = vmov 11   ;;  %p177_p10 = scmp.lt.s32.totalorder %s3708_s16, 1  ;;  %s174_s10 = sand.u32 1, %s3637_s13  }
  0x17   : > { %v3736_v4 = vshrl.u32 %v5493_v0, 7  ;;  %vm357_vm0 = vcmask 1045504   ;;  %vm442_vm3 = vcmask 1046528   ;;  %vm1734_vm6 = vcmask 130112   ;;  %s5133_s11 = sshll.u32 %s174_s10, 9  ;;  %s3496_s19 = sshll.u32 %s3708_s16, 13 }
  0x18   : > { %v199_v6 = vunpack.c.0.s8 %v198_v2  ;;  %s3816_s26 = scalar_select %p177_p10, %s3708_s16, 1  ;;  %vm1741_vm7 = vcmask 195712   ;;  %vm1748_vm8 = vcmask 261312   ;;  %vm1755_vm9 = vcmask 326912  }
  0x19   : > { %5643 = vst [vmem:[#allocation5_spill] sm:$0xff] %v3736_v4  ;;  %v3742_v7 = vsub.s32 0, %v3736_v4  ;;  %v5491_v8 = vsub.s32 2, %v3736_v4  ;;  %v5490_v9 = vsub.s32 3, %v3736_v4  ;;  %v5492_v10 = vsub.s32 1, %v3736_v4  ;;  %s5146_s17 = scalar_lea.vmem [#allocation2], %s5133_s11 }
  0x1a   : > { %v3748_v11 = vsub.s32 %v199_v6, %v3736_v4  ;;  %s3495_s27 = sshll.u32 %s3816_s26, 6  ;;  %s3488_s4 = sshll.u32 %s3816_s26, 2  ;;  %vm1762_vm10 = vcmask 392512   ;;  %vm1769_vm11 = vcmask 458112   ;;  %vm1776_vm12 = vcmask 523712  }
  0x1b   : > { %5644 = vst [vmem:[#allocation6_spill] sm:$0xff] %v3742_v7  ;;  %v240_v12 = vrot.slane %v195_v5, %v5491_v8  ;;  %v224_v13 = vrot.slane %v195_v5, %v3742_v7  ;;  %v248_v15 = vrot.slane %v195_v5, %v5490_v9  ;;  %v232_v16 = vrot.slane %v195_v5, %v5492_v10  ;;  %s3824_s30 = scalar_lea.vmem %s5486_s0, %s3495_s27  ;;  %s185_s7 = scalar_lea.vmem %s5487_s1, %s3488_s4 }
  0x1c   : > { %5645 = vst [vmem:[#allocation7_spill] sm:$0xff] %v3748_v11  ;;  %v203_v14 = vrot.slane %v195_v5, %v3748_v11  ;;  %v187_v42 = vld [vmem:[%s3824_s30 + $0x8] sm:$0x1]  ;;  %v186_v43 = vld [vmem:[%s3824_s30] sm:$0xff]  ;;  %v188_v45 = vld [vmem:[%s3824_s30 + $0x10] sm:$0xff]  ;;  %vm1783_vm13 = vcmask 589312   ;;  %s5417_s26 = scalar_lea.hbm %s5489_s3, %s3496_s19 }
  0x1d   : > { %243 = vbcast.lane.b32.xlu1 %v240_v12, 260  ;;  %227 = vbcast.lane.b32.xlu0 %v224_v13, 260  ;;  %v189_v50 = vld [vmem:[%s3824_s30 + $0x18] sm:$0x1]  ;;  %v192_v61 = vld [vmem:[%s3824_s30 + $0x30] sm:$0xff]  ;;  %vm1790_vm14 = vcmask 654912  }
  0x1e   : > { %v204_v17 = vcombine.high %v203_v14, %v203_v14  ;;  %v3759_v18 = vrot.slane %v203_v14, %v3748_v11  ;;  %v193_v60 = vld [vmem:[%s3824_s30 + $0x38] sm:$0x1]  ;;  %vm1797_vm15 = vcmask 720512   ;;  %s3407_s20 = sshll.u32 %s5146_s17, 4  ;;  %s5445_s16 = scalar_lea.sflag [#allocation3], %s174_s10  ;;  %s5421_s20 = int_to_ptr.vmem [resolvable:$true] %s3407_s20 }
  0x1f   : > { %s3583_s27 = scalar_lea.vmem %s5421_s20, 8192  ;;  %s3664_s28 = smov [#allocation2]  }
  0x20   : > { %5646 = vst [vmem:[#allocation8_spill] sm:$0xff] %v3759_v18  ;;  %v3762_v19 = vrot.slane %v204_v17, %v3748_v11  ;;  %v3766_v20 = vcombine.high %v3759_v18, %v3759_v18  ;;  %v3770_v21 = vrot.slane %v3759_v18, %v3742_v7  ;;  %v419_v17 = vrot.slane %v187_v42, 2  ;;  %p3584_p11 = scmp.ne.s32.totalorder %s5421_s20, %s3583_s27  ;;  %s3587_s29 = sshll.u32 %s3664_s28, 4  ;;  %s3588_s29 = int_to_ptr.vmem [resolvable:$false] %s3587_s29 }
  0x21   : > { %251 = vbcast.lane.b32.xlu1 %v248_v15, 260  ;;  %235 = vbcast.lane.b32.xlu0 %v232_v16, 260  ;;  %v418_v16 = vrot.slane %v186_v43, 2  ;;  %p3590_p0 = scmp.lt.s32.totalorder %s5421_s20, %s3588_s29 }
  0x22   : > { %5647 = vst [vmem:[#allocation9_spill] sm:$0xff] %v3762_v19  ;;  %5648 = vst [vmem:[#allocation10_spill] sm:$0xff] %v3766_v20  ;;  %v3774_v22 = vcombine.high %v3762_v19, %v3762_v19  ;;  %v3778_v23 = vrot.slane %v3762_v19, %v3742_v7  ;;  %v3782_v24 = vrot.slane %v3766_v20, %v3742_v7  ;;  %p3585_p12 = pnand %p3584_p11, %p3725_p5 }
  0x23   : > { %5649 = vst [vmem:[#allocation11_spill] sm:$0xff] %v3770_v21 }
  0x24   : > { %5650 = vst [vmem:[#allocation12_spill] sm:$0xff] %v3774_v22  ;;  %5651 = vst [vmem:[#allocation13_spill] sm:$0xff] %v3778_v23  ;;  %v3786_v25 = vrot.slane %v3774_v22, %v3742_v7  ;;  %p3586_p13 = pneg %p3585_p12 }
  0x25   : > { %5652 = vst [vmem:[#allocation14_spill] sm:$0xff] %v3782_v24  ;;  %270 = vperm.xlu0 %3555, %v3770_v21   ;;  %274 = vperm.xlu1 %3556, %v3778_v23  }
  0x26   : > { %5653 = vst [vmem:[#allocation15_spill] sm:$0xff] %v3786_v25 }
  0x29   : > { %278 = vperm.xlu1 %3556, %v3782_v24   ;;  %282 = vperm.xlu0 %3555, %v3786_v25  }
  0x2d   : > { %3557 = vset.pattern.permute.xlu1 %v3649_v26  ;;  %3558 = vset.pattern.permute.xlu0 %v3649_v26 }
  0x2e   : > { %290 = vperm.xlu1 %3557, %v3770_v21   ;;  %294 = vperm.xlu0 %3558, %v3778_v23  }
  0x32   : > { %298 = vperm.xlu1 %3557, %v3782_v24   ;;  %3559 = vset.pattern.permute.xlu0 %v3650_v27 }
  0x33   : > { %326 = vperm.xlu0 %3559, %v3770_v21  }
  0x36   : > { %302 = vperm.xlu1 %3557, %v3786_v25  }
  0x37   : > { %338 = vperm.xlu0 %3559, %v3786_v25  }
  0x3a   : > { %3560 = vset.pattern.permute.xlu1 %v3650_v27 }
  0x3b   : > { %330 = vperm.xlu1 %3560, %v3778_v23   ;;  %3562 = vset.pattern.permute.xlu0 %v3651_v28 }
  0x3c   : > { %383 = vperm.xlu0 %3562, %v3778_v23  }
  0x3f   : > { %334 = vperm.xlu1 %3560, %v3782_v24  }
  0x40   : > { %3563 = vset.pattern.permute.xlu0 %v3652_v29 }
  0x41   : > { %472 = vperm.xlu0 %3563, %v195_v5  }
  0x43   : > { %3561 = vset.pattern.permute.xlu1 %v3651_v28 }
  0x44   : > { %379 = vperm.xlu1 %3561, %v3770_v21  }
  0x48   : > { %387 = vperm.xlu1 %3561, %v3782_v24  }
  0x4c   : > { %391 = vperm.xlu1 %3561, %v3786_v25  }
  0x8f   : > { %v3804_v30 = vpop.permute.xlu1 %243  ;;  %v3806_v31 = vpop.permute.xlu0 %227 }
  0x93   : > { %v3808_v32 = vpop.permute.xlu1 %251  ;;  %v3810_v33 = vpop.permute.xlu0 %235 }
  0xa4   : > { %v275_v34 = vpop.permute.xlu1 %274  ;;  %v271_v35 = vpop.permute.xlu0 %270 }
  0xa5   : > { %v285_v56 = vmul.f32 %v271_v35, %v186_v43  ;;  %v286_v1 = vmul.f32 %v275_v34, %v188_v45 }
  0xa8   : > { %v3813_v36 = vpop.permute.xlu1 %278  ;;  %v283_v37 = vpop.permute.xlu0 %282 }
  0xa9   : > { %v288_v34 = vmul.f32 %v283_v37, %v192_v61 }
  0xad   : > { %v291_v38 = vpop.permute.xlu1 %290  ;;  %v295_v39 = vpop.permute.xlu0 %294 }
  0xae   : > { %v305_v48 = vmul.f32 %v291_v38, %v186_v43  ;;  %v306_v49 = vmul.f32 %v295_v39, %v188_v45 }
  0xb0   : > { %v313_v57 = vrot.slane %v305_v48, 1  ;;  %v314_v58 = vrot.slane %v306_v49, 1 }
  0xb1   : > { %v3819_v40 = vpop.permute.xlu1 %298 }
  0xb2   : > { %v327_v41 = vpop.permute.xlu0 %326  ;;  %v321_v14 = vadd.f32 %v313_v57, %v285_v56  ;;  %v322_v15 = vadd.f32 %v314_v58, %v286_v1 }
  0xb3   : > { %v341_v46 = vmul.f32 %v327_v41, %v186_v43  ;;  %v342_v47 = vmul.f32 %v327_v41, %v187_v42  ;;  %v421_v43 = vrot.slane %v188_v45, 2 }
  0xb5   : > { %v303_v44 = vpop.permute.xlu1 %302  ;;  %v358_v52 = vrot.slane %v341_v46, 2  ;;  %v359_v53 = vrot.slane %v342_v47, 2 }
  0xb6   : > { %v339_v59 = vpop.permute.xlu0 %338  ;;  %v308_v2 = vmul.f32 %v303_v44, %v192_v61  ;;  %v420_v44 = vsel %vm357_vm0, %v418_v16, %v419_v17  ;;  %v191_v16 = vld [vmem:[%s3824_s30 + $0x28] sm:$0x1] }
  0xb7   : > { %v347_v5 = vmul.f32 %v339_v59, %v192_v61  ;;  %v348_v6 = vmul.f32 %v339_v59, %v193_v60  ;;  %v360_v13 = vsel %vm357_vm0, %v358_v52, %v359_v53  ;;  %v427_v52 = vrot.slane %v192_v61, 2 }
  0xb8   : > { %v316_v26 = vrot.slane %v308_v2, 1  ;;  %v374_v28 = vadd.f32 %v360_v13, %v321_v14  ;;  %v428_v53 = vrot.slane %v193_v60, 2 }
  0xb9   : > { %v367_v29 = vrot.slane %v347_v5, 2  ;;  %v368_v35 = vrot.slane %v348_v6, 2 }
  0xba   : > { %v331_v51 = vpop.permute.xlu1 %330  ;;  %v324_v46 = vadd.f32 %v316_v26, %v288_v34  ;;  %v190_v26 = vld [vmem:[%s3824_s30 + $0x20] sm:$0xff]  ;;  %v3653_v34 = vmov 13   ;;  %s3589_s30 = scalar_lea.vmem %s3588_s29, 16384 }
  0xbb   : > { %v343_v54 = vmul.f32 %v331_v51, %v188_v45  ;;  %v344_v55 = vmul.f32 %v331_v51, %v189_v50  ;;  %v384_v38 = vpop.permute.xlu0 %383  ;;  %v369_v51 = vsel %vm357_vm0, %v367_v29, %v368_v35  ;;  %v429_v45 = vsel %vm357_vm0, %v427_v52, %v428_v53  ;;  %3564 = vset.pattern.permute.xlu0 %v3653_v34  ;;  %p3591_p1 = scmp.lt.s32.totalorder %s3589_s30, %s3583_s27 }
  0xbc   : > { %v377_v57 = vadd.f32 %v369_v51, %v324_v46  ;;  %3565 = vset.pattern.permute.xlu1 %v3653_v34 }
  0xbd   : > { %v361_v62 = vrot.slane %v343_v54, 2  ;;  %v362_v63 = vrot.slane %v344_v55, 2  ;;  %v422_v54 = vrot.slane %v189_v50, 2  ;;  %p3592_p2 = por %p3591_p1, %p3590_p0 }
  0xbe   : > { %v335_v3 = vpop.permute.xlu1 %334 }
  0xbf   : > { %v363_v12 = vsel %vm357_vm0, %v361_v62, %v362_v63  ;;  %v423_v62 = vsel %vm357_vm0, %v421_v43, %v422_v54  ;;  %v346_v29 = vmul.f32 %v335_v3, %v191_v16  ;;  %v424_v54 = vrot.slane %v190_v26, 2  ;;  %p3593_p3 = pnand %p3592_p2, %p3586_p13 }
  0xc0   : > { %v375_v27 = vadd.f32 %v363_v12, %v322_v15 }
  0xc1   : > { %v365_v46 = vrot.slane %v346_v29, 2 }
  0xc2   : > { %v395_v47 = vadd.f32 %v384_v38, %v375_v27  ;;  %v3848_v38 = vpop.permute.xlu0 %472 }
  0xc3   : > { %v380_v39 = vpop.permute.xlu1 %379 }
  0xc4   : > { %v394_v41 = vadd.f32 %v380_v39, %v374_v28  ;;  %v403_v56 = vmul.f32 0.01, %v395_v47  ;;  %vm399_vm2 = vcmp.ge.f32.partialorder %v395_v47, 0.0  ;;  %v345_v28 = vmul.f32 %v335_v3, %v190_v26 }
  0xc5   : > { %v307_v39 = vmul.f32 %v3819_v40, %v190_v26  ;;  %v287_v3 = vmul.f32 %v3813_v36, %v190_v26 }
  0xc6   : > { %vm398_vm1 = vcmp.ge.f32.partialorder %v394_v41, 0.0  ;;  %v402_v48 = vmul.f32 0.01, %v394_v41  ;;  %v407_v61 = vsel %vm399_vm2, %v395_v47, %v403_v56  ;;  %vm1818_vm2 = vcmask 917312  }
  0xc7   : > { %v388_v49 = vpop.permute.xlu1 %387  ;;  %v435_v5 = vadd.f32 %v423_v62, %v407_v61  ;;  %v315_v47 = vrot.slane %v307_v39, 1 }
  0xc8   : > { %v406_v42 = vsel %vm398_vm1, %v394_v41, %v402_v48  ;;  %vm1811_vm1 = vcmask 851712  }
  0xc9   : > { %v434_v55 = vadd.f32 %v420_v44, %v406_v42  ;;  %v439_v14 = vmul.f32 %v435_v5, %v3810_v33  ;;  %v364_v44 = vrot.slane %v345_v28, 2  ;;  %v323_v43 = vadd.f32 %v315_v47, %v287_v3 }
  0xca   : > { %v476_v28 = vrot.slane %v3848_v38, 3 }
  0xcb   : > { %v438_v37 = vmul.f32 %v434_v55, %v3806_v31  ;;  %v392_v58 = vpop.permute.xlu1 %391  ;;  %v450_v35 = vsel %vm442_vm3, %v439_v14, 0.0  ;;  %v366_v51 = vsel %vm357_vm0, %v364_v44, %v365_v46  ;;  %v425_v55 = vrot.slane %v191_v16, 2 }
  0xcc   : > { %v397_v59 = vadd.f32 %v392_v58, %v377_v57  ;;  %v451_v33 = vrot.slane %v450_v35, 4  ;;  %v376_v42 = vadd.f32 %v366_v51, %v323_v43 }
  0xcd   : > { %v443_v63 = vsel %vm442_vm3, %v438_v37, 0.0  ;;  %v426_v37 = vsel %vm357_vm0, %v424_v54, %v425_v55  ;;  %vm1804_vm0 = vcmask 786112  }
  0xce   : > { %v444_v60 = vrot.slane %v443_v63, 4  ;;  %vm401_vm4 = vcmp.ge.f32.partialorder %v397_v59, 0.0  ;;  %v405_v50 = vmul.f32 0.01, %v397_v59  ;;  %v452_v48 = vadd.f32 %v451_v33, %v450_v35 }
  0xcf   : > { %v396_v52 = vadd.f32 %v388_v49, %v376_v42 }
  0xd0   : > { %v445_v1 = vadd.f32 %v444_v60, %v443_v63  ;;  %v409_v2 = vsel %vm401_vm4, %v397_v59, %v405_v50  ;;  %v453_v40 = vrot.slane %v452_v48, 2  ;;  %v474_v59 = vrot.slane %v3848_v38, 1 }
  0xd1   : > { %v437_v6 = vadd.f32 %v429_v45, %v409_v2  ;;  %v404_v56 = vmul.f32 0.01, %v396_v52  ;;  %vm400_vm5 = vcmp.ge.f32.partialorder %v396_v52, 0.0  ;;  %vm1832_vm4 = vcmask 1048512  }
  0xd2   : > { %v446_v31 = vrot.slane %v445_v1, 2  ;;  %v454_v53 = vadd.f32 %v453_v40, %v452_v48  ;;  %v3654_v48 = vmov 12  }
  0xd3   : > { %v441_v12 = vmul.f32 %v437_v6, %v3808_v32  ;;  %v408_v36 = vsel %vm400_vm5, %v396_v52, %v404_v56  ;;  %v475_v6 = vrot.slane %v3848_v38, 2  ;;  %vm2071_vm5 = vcmask 1041409  }
  0xd4   : > { %v447_v13 = vadd.f32 %v446_v31, %v445_v1  ;;  %v455_v57 = vrot.slane %v454_v53, 1  ;;  %v436_v62 = vadd.f32 %v426_v37, %v408_v36 }
  0xd5   : > { %v3843_v15 = vsel %vm442_vm3, %v441_v12, 0.0 }
  0xd6   : > { %v448_v17 = vrot.slane %v447_v13, 1  ;;  %v456_v58 = vadd.f32 %v455_v57, %v454_v53  ;;  %v440_v63 = vmul.f32 %v436_v62, %v3804_v30 }
  0xd8   : > { %v449_v27 = vadd.f32 %v448_v17, %v447_v13  ;;  %v482_v49 = vadd.f32 %v474_v59, %v456_v58  ;;  %v457_v61 = vsel %vm442_vm3, %v440_v63, 0.0  ;;  %v465_v13 = vrot.slane %v3843_v15, 4 }
  0xd9   : > { %v458_v60 = vrot.slane %v457_v61, 4  ;;  %vm1825_vm3 = vcmask 982912  }
  0xda   : > { %v481_v32 = vadd.f32 %v3848_v38, %v449_v27  ;;  %v555_v45 = vrot.slane %v482_v49, %v3742_v7  ;;  %v466_v14 = vadd.f32 %v465_v13, %v3843_v15 }
  0xdb   : > { %v459_v50 = vadd.f32 %v458_v60, %v457_v61 }
  0xdc   : > { %v488_v41 = vrot.slane %v481_v32, %v3742_v7  ;;  %v467_v16 = vrot.slane %v466_v14, 2 }
  0xdd   : > { %v460_v1 = vrot.slane %v459_v50, 2 }
  0xde   : > { %498 = vbcast.lane.b32.xlu0 %v488_v41, 272  ;;  %490 = vbcast.lane.b32.xlu1 %v488_v41, 256  ;;  %v468_v17 = vadd.f32 %v467_v16, %v466_v14 }
  0xdf   : > { %v461_v2 = vadd.f32 %v460_v1, %v459_v50 }
  0xe0   : > { %v469_v26 = vrot.slane %v468_v17, 1 }
  0xe1   : > { %v462_v30 = vrot.slane %v461_v2, 1 }
  0xe2   : > { %506 = vbcast.lane.b32.xlu0 %v488_v41, 288  ;;  %494 = vbcast.lane.b32.xlu1 %v488_v41, 264  ;;  %v470_v27 = vadd.f32 %v469_v26, %v468_v17 }
  0xe3   : > { %v463_v5 = vadd.f32 %v462_v30, %v461_v2 }
  0xe4   : > { %v484_v29 = vadd.f32 %v476_v28, %v470_v27 }
  0xe5   : > { %v483_v31 = vadd.f32 %v475_v6, %v463_v5 }
  0xe6   : > { %514 = vbcast.lane.b32.xlu0 %v488_v41, 304  ;;  %502 = vbcast.lane.b32.xlu1 %v488_v41, 280  ;;  %v689_v15 = vrot.slane %v484_v29, %v3742_v7 }
  0xe7   : > { %v622_v12 = vrot.slane %v483_v31, %v3742_v7 }
  0xea   : > { %522 = vbcast.lane.b32.xlu0 %v488_v41, 320  ;;  %510 = vbcast.lane.b32.xlu1 %v488_v41, 296 }
  0xee   : > { %530 = vbcast.lane.b32.xlu0 %v488_v41, 336  ;;  %518 = vbcast.lane.b32.xlu1 %v488_v41, 312 }
  0xf2   : > { %538 = vbcast.lane.b32.xlu0 %v488_v41, 352  ;;  %526 = vbcast.lane.b32.xlu1 %v488_v41, 328 }
  0xf6   : > { %546 = vbcast.lane.b32.xlu0 %v488_v41, 368  ;;  %534 = vbcast.lane.b32.xlu1 %v488_v41, 344 }
  0xfa   : > { %557 = vbcast.lane.b32.xlu0 %v555_v45, 256  ;;  %542 = vbcast.lane.b32.xlu1 %v488_v41, 360 }
  0xfe   : > { %565 = vbcast.lane.b32.xlu0 %v555_v45, 272  ;;  %550 = vbcast.lane.b32.xlu1 %v488_v41, 376 }
 0x102   : > { %573 = vbcast.lane.b32.xlu0 %v555_v45, 288  ;;  %561 = vbcast.lane.b32.xlu1 %v555_v45, 264 }
 0x106   : > { %581 = vbcast.lane.b32.xlu0 %v555_v45, 304  ;;  %569 = vbcast.lane.b32.xlu1 %v555_v45, 280 }
 0x10a   : > { %589 = vbcast.lane.b32.xlu0 %v555_v45, 320  ;;  %577 = vbcast.lane.b32.xlu1 %v555_v45, 296 }
 0x10e   : > { %597 = vbcast.lane.b32.xlu0 %v555_v45, 336  ;;  %585 = vbcast.lane.b32.xlu1 %v555_v45, 312 }
 0x112   : > { %605 = vbcast.lane.b32.xlu0 %v555_v45, 352  ;;  %593 = vbcast.lane.b32.xlu1 %v555_v45, 328 }
 0x116   : > { %613 = vbcast.lane.b32.xlu0 %v555_v45, 368  ;;  %601 = vbcast.lane.b32.xlu1 %v555_v45, 344 }
 0x11a   : > { %624 = vbcast.lane.b32.xlu0 %v622_v12, 256  ;;  %609 = vbcast.lane.b32.xlu1 %v555_v45, 360 }
 0x11e   : > { %632 = vbcast.lane.b32.xlu0 %v622_v12, 272  ;;  %617 = vbcast.lane.b32.xlu1 %v555_v45, 376 }
 0x122   : > { %640 = vbcast.lane.b32.xlu0 %v622_v12, 288  ;;  %628 = vbcast.lane.b32.xlu1 %v622_v12, 264 }
 0x126   : > { %648 = vbcast.lane.b32.xlu0 %v622_v12, 304  ;;  %636 = vbcast.lane.b32.xlu1 %v622_v12, 280 }
 0x12a   : > { %656 = vbcast.lane.b32.xlu0 %v622_v12, 320  ;;  %644 = vbcast.lane.b32.xlu1 %v622_v12, 296 }
 0x12e   : > { %664 = vbcast.lane.b32.xlu0 %v622_v12, 336  ;;  %652 = vbcast.lane.b32.xlu1 %v622_v12, 312 }
 0x132   : > { %672 = vbcast.lane.b32.xlu0 %v622_v12, 352  ;;  %660 = vbcast.lane.b32.xlu1 %v622_v12, 328 }
 0x136   : > { %680 = vbcast.lane.b32.xlu0 %v622_v12, 368  ;;  %668 = vbcast.lane.b32.xlu1 %v622_v12, 344 }
 0x13a   : > { %691 = vbcast.lane.b32.xlu0 %v689_v15, 256  ;;  %676 = vbcast.lane.b32.xlu1 %v622_v12, 360 }
 0x13e   : > { %699 = vbcast.lane.b32.xlu0 %v689_v15, 272  ;;  %684 = vbcast.lane.b32.xlu1 %v622_v12, 376 }
 0x142   : > { %707 = vbcast.lane.b32.xlu0 %v689_v15, 288  ;;  %695 = vbcast.lane.b32.xlu1 %v689_v15, 264 }
 0x146   : > { %715 = vbcast.lane.b32.xlu0 %v689_v15, 304  ;;  %703 = vbcast.lane.b32.xlu1 %v689_v15, 280 }
 0x14a   : > { %723 = vbcast.lane.b32.xlu0 %v689_v15, 320  ;;  %711 = vbcast.lane.b32.xlu1 %v689_v15, 296 }
 0x14e   : > { %731 = vbcast.lane.b32.xlu0 %v689_v15, 336  ;;  %719 = vbcast.lane.b32.xlu1 %v689_v15, 312 }
 0x150   : > { %v499_v35 = vpop.permute.xlu0 %498  ;;  %v491_v38 = vpop.permute.xlu1 %490 }
 0x151   : > { %v786_v53 = vmul.f32 %v491_v38, %v3770_v21  ;;  %v788_v57 = vmul.f32 %v499_v35, %v3770_v21 }
 0x152   : > { %739 = vbcast.lane.b32.xlu0 %v689_v15, 352  ;;  %727 = vbcast.lane.b32.xlu1 %v689_v15, 328 }
 0x154   : > { %v507_v39 = vpop.permute.xlu0 %506  ;;  %v495_v32 = vpop.permute.xlu1 %494 }
 0x155   : > { %v787_v3 = vmul.f32 %v495_v32, %v3770_v21  ;;  %v790_v40 = vmul.f32 %v507_v39, %v3770_v21 }
 0x156   : > { %747 = vbcast.lane.b32.xlu0 %v689_v15, 368  ;;  %735 = vbcast.lane.b32.xlu1 %v689_v15, 344 }
 0x158   : > { %v515_v34 = vpop.permute.xlu0 %514  ;;  %v503_v33 = vpop.permute.xlu1 %502 }
 0x159   : > { %v792_v54 = vmul.f32 %v515_v34, %v3770_v21  ;;  %v789_v59 = vmul.f32 %v503_v33, %v3770_v21 }
 0x15a   : > { %851 = vperm.xlu0 %3564, %v3759_v18   ;;  %743 = vbcast.lane.b32.xlu1 %v689_v15, 360  ;;  %v3489_v18 = vld.sshfl [vmem:[%s185_s7] sm:$0x33 pattern:$0x75316420] }
 0x15b   : > { %v4063_v4 = vrot.slane %v3489_v18, %v3748_v11 }
 0x15c   : > { %v523_v41 = vpop.permute.xlu0 %522  ;;  %v511_v44 = vpop.permute.xlu1 %510 }
 0x15d   : > { %v794_v36 = vmul.f32 %v523_v41, %v3770_v21  ;;  %v791_v45 = vmul.f32 %v511_v44, %v3770_v21 }
 0x15e   : > { %875 = vperm.xlu0 %3564, %v3774_v22   ;;  %751 = vbcast.lane.b32.xlu1 %v689_v15, 376 }
 0x160   : > { %v531_v46 = vpop.permute.xlu0 %530  ;;  %v519_v47 = vpop.permute.xlu1 %518 }
 0x161   : > { %v796_v62 = vmul.f32 %v531_v46, %v3770_v21  ;;  %v793_v1 = vmul.f32 %v519_v47, %v3770_v21 }
 0x162   : > { %3567 = vset.pattern.permute.xlu0 %v3654_v48  ;;  %859 = vperm.xlu1 %3565, %v3762_v19  }
 0x163   : > { %893 = vperm.xlu0 %3567, %v787_v3  }
 0x164   : > { %v539_v51 = vpop.permute.xlu0 %538  ;;  %v527_v43 = vpop.permute.xlu1 %526 }
 0x165   : > { %v798_v61 = vmul.f32 %v539_v51, %v3770_v21  ;;  %v795_v6 = vmul.f32 %v527_v43, %v3770_v21 }
 0x166   : > { %867 = vperm.xlu1 %3565, %v3766_v20  }
 0x167   : > { %908 = vperm.xlu0 %3567, %v790_v40  }
 0x168   : > { %v547_v42 = vpop.permute.xlu0 %546  ;;  %v535_v52 = vpop.permute.xlu1 %534 }
 0x169   : > { %v800_v2 = vmul.f32 %v547_v42, %v3770_v21  ;;  %v797_v14 = vmul.f32 %v535_v52, %v3770_v21 }
 0x16a   : > { %3566 = vset.pattern.permute.xlu1 %v3654_v48 }
 0x16b   : > { %888 = vperm.xlu1 %3566, %v786_v53   ;;  %918 = vperm.xlu0 %3567, %v792_v54  }
 0x16c   : > { %v558_v55 = vpop.permute.xlu0 %557  ;;  %v543_v56 = vpop.permute.xlu1 %542 }
 0x16d   : > { %v802_v31 = vmul.f32 %v558_v55, %v3778_v23  ;;  %v799_v27 = vmul.f32 %v543_v56, %v3770_v21 }
 0x16f   : > { %898 = vperm.xlu1 %3566, %v788_v57   ;;  %928 = vperm.xlu0 %3567, %v794_v36  }
 0x170   : > { %v566_v37 = vpop.permute.xlu0 %565  ;;  %v551_v58 = vpop.permute.xlu1 %550 }
 0x171   : > { %v804_v16 = vmul.f32 %v566_v37, %v3778_v23  ;;  %v801_v35 = vmul.f32 %v551_v58, %v3770_v21 }
 0x173   : > { %938 = vperm.xlu0 %3567, %v796_v62   ;;  %903 = vperm.xlu1 %3566, %v789_v59  }
 0x174   : > { %v574_v49 = vpop.permute.xlu0 %573  ;;  %v562_v63 = vpop.permute.xlu1 %561 }
 0x175   : > { %v806_v28 = vmul.f32 %v574_v49, %v3778_v23  ;;  %v803_v34 = vmul.f32 %v562_v63, %v3778_v23 }
 0x177   : > { %948 = vperm.xlu0 %3567, %v798_v61   ;;  %913 = vperm.xlu1 %3566, %v791_v45  }
 0x178   : > { %v582_v60 = vpop.permute.xlu0 %581  ;;  %v570_v50 = vpop.permute.xlu1 %569 }
 0x179   : > { %v808_v38 = vmul.f32 %v582_v60, %v3778_v23  ;;  %v805_v46 = vmul.f32 %v570_v50, %v3778_v23 }
 0x17b   : > { %958 = vperm.xlu0 %3567, %v800_v2   ;;  %923 = vperm.xlu1 %3566, %v793_v1  }
 0x17c   : > { %v590_v30 = vpop.permute.xlu0 %589  ;;  %v578_v5 = vpop.permute.xlu1 %577 }
 0x17d   : > { %v810_v33 = vmul.f32 %v590_v30, %v3778_v23  ;;  %v807_v51 = vmul.f32 %v578_v5, %v3778_v23 }
 0x17f   : > { %968 = vperm.xlu0 %3567, %v802_v31   ;;  %933 = vperm.xlu1 %3566, %v795_v6  }
 0x180   : > { %v598_v12 = vpop.permute.xlu0 %597  ;;  %v586_v13 = vpop.permute.xlu1 %585 }
 0x181   : > { %v812_v47 = vmul.f32 %v598_v12, %v3778_v23  ;;  %v809_v52 = vmul.f32 %v586_v13, %v3778_v23 }
 0x183   : > { %978 = vperm.xlu0 %3567, %v804_v16   ;;  %943 = vperm.xlu1 %3566, %v797_v14  }
 0x184   : > { %v606_v17 = vpop.permute.xlu0 %605  ;;  %v594_v26 = vpop.permute.xlu1 %593 }
 0x185   : > { %v814_v43 = vmul.f32 %v606_v17, %v3778_v23  ;;  %v811_v56 = vmul.f32 %v594_v26, %v3778_v23 }
 0x187   : > { %988 = vperm.xlu0 %3567, %v806_v28   ;;  %953 = vperm.xlu1 %3566, %v799_v27  }
 0x188   : > { %v614_v29 = vpop.permute.xlu0 %613  ;;  %v602_v15 = vpop.permute.xlu1 %601 }
 0x189   : > { %v816_v53 = vmul.f32 %v614_v29, %v3778_v23  ;;  %v813_v58 = vmul.f32 %v602_v15, %v3778_v23 }
 0x18b   : > { %998 = vperm.xlu0 %3567, %v808_v38   ;;  %963 = vperm.xlu1 %3566, %v801_v35  }
 0x18c   : > { %v625_v39 = vpop.permute.xlu0 %624  ;;  %v610_v32 = vpop.permute.xlu1 %609 }
 0x18d   : > { %v818_v57 = vmul.f32 %v625_v39, %v3782_v24  ;;  %v815_v63 = vmul.f32 %v610_v32, %v3778_v23 }
 0x18f   : > { %1008 = vperm.xlu0 %3567, %v810_v33   ;;  %973 = vperm.xlu1 %3566, %v803_v34  }
 0x190   : > { %v633_v41 = vpop.permute.xlu0 %632  ;;  %v618_v44 = vpop.permute.xlu1 %617 }
 0x191   : > { %v820_v59 = vmul.f32 %v633_v41, %v3782_v24  ;;  %v817_v50 = vmul.f32 %v618_v44, %v3778_v23 }
 0x193   : > { %1018 = vperm.xlu0 %3567, %v812_v47   ;;  %983 = vperm.xlu1 %3566, %v805_v46  }
 0x194   : > { %v641_v3 = vpop.permute.xlu0 %640  ;;  %v629_v48 = vpop.permute.xlu1 %628 }
 0x195   : > { %v822_v45 = vmul.f32 %v641_v3, %v3782_v24  ;;  %v819_v5 = vmul.f32 %v629_v48, %v3782_v24 }
 0x197   : > { %1028 = vperm.xlu0 %3567, %v814_v43   ;;  %993 = vperm.xlu1 %3566, %v807_v51  }
 0x198   : > { %v649_v40 = vpop.permute.xlu0 %648  ;;  %v637_v42 = vpop.permute.xlu1 %636 }
 0x199   : > { %v824_v1 = vmul.f32 %v649_v40, %v3782_v24  ;;  %v821_v12 = vmul.f32 %v637_v42, %v3782_v24 }
 0x19b   : > { %1038 = vperm.xlu0 %3567, %v816_v53   ;;  %1003 = vperm.xlu1 %3566, %v809_v52  }
 0x19c   : > { %v657_v54 = vpop.permute.xlu0 %656  ;;  %v645_v55 = vpop.permute.xlu1 %644 }
 0x19d   : > { %v826_v6 = vmul.f32 %v657_v54, %v3782_v24  ;;  %v823_v17 = vmul.f32 %v645_v55, %v3782_v24 }
 0x19f   : > { %1048 = vperm.xlu0 %3567, %v818_v57   ;;  %1013 = vperm.xlu1 %3566, %v811_v56  }
 0x1a0   : > { %v665_v36 = vpop.permute.xlu0 %664  ;;  %v653_v37 = vpop.permute.xlu1 %652 }
 0x1a1   : > { %v828_v13 = vmul.f32 %v665_v36, %v3782_v24  ;;  %v825_v28 = vmul.f32 %v653_v37, %v3782_v24 }
 0x1a3   : > { %1058 = vperm.xlu0 %3567, %v820_v59   ;;  %1023 = vperm.xlu1 %3566, %v813_v58  }
 0x1a4   : > { %v673_v62 = vpop.permute.xlu0 %672  ;;  %v661_v49 = vpop.permute.xlu1 %660 }
 0x1a5   : > { %v830_v26 = vmul.f32 %v673_v62, %v3782_v24  ;;  %v827_v35 = vmul.f32 %v661_v49, %v3782_v24 }
 0x1a7   : > { %1068 = vperm.xlu0 %3567, %v822_v45   ;;  %1033 = vperm.xlu1 %3566, %v815_v63  }
 0x1a8   : > { %v681_v61 = vpop.permute.xlu0 %680  ;;  %v669_v60 = vpop.permute.xlu1 %668 }
 0x1a9   : > { %v832_v29 = vmul.f32 %v681_v61, %v3782_v24  ;;  %v829_v34 = vmul.f32 %v669_v60, %v3782_v24  ;;  %v3655_v61 = vmov 14  }
 0x1ab   : > { %1078 = vperm.xlu0 %3567, %v824_v1   ;;  %1043 = vperm.xlu1 %3566, %v817_v50  }
 0x1ac   : > { %v692_v2 = vpop.permute.xlu0 %691  ;;  %v677_v30 = vpop.permute.xlu1 %676 }
 0x1ad   : > { %v834_v38 = vmul.f32 %v692_v2, %v3786_v25  ;;  %v831_v44 = vmul.f32 %v677_v30, %v3782_v24 }
 0x1af   : > { %1088 = vperm.xlu0 %3567, %v826_v6   ;;  %1053 = vperm.xlu1 %3566, %v819_v5  }
 0x1b0   : > { %v685_v31 = vpop.permute.xlu1 %684  ;;  %v700_v14 = vpop.permute.xlu0 %699 }
 0x1b1   : > { %v836_v33 = vmul.f32 %v700_v14, %v3786_v25  ;;  %v833_v3 = vmul.f32 %v685_v31, %v3782_v24 }
 0x1b3   : > { %1098 = vperm.xlu0 %3567, %v828_v13   ;;  %1063 = vperm.xlu1 %3566, %v821_v12  }
 0x1b4   : > { %v696_v16 = vpop.permute.xlu1 %695  ;;  %v708_v27 = vpop.permute.xlu0 %707 }
 0x1b5   : > { %v838_v46 = vmul.f32 %v708_v27, %v3786_v25  ;;  %v835_v40 = vmul.f32 %v696_v16, %v3786_v25 }
 0x1b7   : > { %1108 = vperm.xlu0 %3567, %v830_v26   ;;  %1073 = vperm.xlu1 %3566, %v823_v17  }
 0x1b8   : > { %v704_v15 = vpop.permute.xlu1 %703  ;;  %v716_v39 = vpop.permute.xlu0 %715 }
 0x1b9   : > { %v840_v48 = vmul.f32 %v716_v39, %v3786_v25  ;;  %v837_v53 = vmul.f32 %v704_v15, %v3786_v25 }
 0x1bb   : > { %1118 = vperm.xlu0 %3567, %v832_v29   ;;  %1083 = vperm.xlu1 %3566, %v825_v28  }
 0x1bc   : > { %v712_v32 = vpop.permute.xlu1 %711  ;;  %v724_v41 = vpop.permute.xlu0 %723 }
 0x1bd   : > { %v842_v42 = vmul.f32 %v724_v41, %v3786_v25  ;;  %v839_v56 = vmul.f32 %v712_v32, %v3786_v25 }
 0x1bf   : > { %1128 = vperm.xlu0 %3567, %v834_v38   ;;  %1093 = vperm.xlu1 %3566, %v827_v35  }
 0x1c0   : > { %v720_v47 = vpop.permute.xlu1 %719  ;;  %v732_v51 = vpop.permute.xlu0 %731 }
 0x1c1   : > { %v844_v54 = vmul.f32 %v732_v51, %v3786_v25  ;;  %v841_v58 = vmul.f32 %v720_v47, %v3786_v25 }
 0x1c3   : > { %1138 = vperm.xlu0 %3567, %v836_v33   ;;  %1103 = vperm.xlu1 %3566, %v829_v34  }
 0x1c4   : > { %v728_v43 = vpop.permute.xlu1 %727  ;;  %v740_v52 = vpop.permute.xlu0 %739 }
 0x1c5   : > { %v846_v57 = vmul.f32 %v740_v52, %v3786_v25  ;;  %v843_v49 = vmul.f32 %v728_v43, %v3786_v25 }
 0x1c7   : > { %1148 = vperm.xlu0 %3567, %v838_v46   ;;  %1113 = vperm.xlu1 %3566, %v831_v44  }
 0x1c8   : > { %v736_v55 = vpop.permute.xlu1 %735  ;;  %v748_v36 = vpop.permute.xlu0 %747 }
 0x1c9   : > { %v848_v59 = vmul.f32 %v748_v36, %v3786_v25  ;;  %v845_v60 = vmul.f32 %v736_v55, %v3786_v25 }
 0x1cb   : > { %1158 = vperm.xlu0 %3567, %v840_v48   ;;  %1123 = vperm.xlu1 %3566, %v833_v3  }
 0x1cc   : > { %v744_v37 = vpop.permute.xlu1 %743 }
 0x1cd   : > { %v847_v2 = vmul.f32 %v744_v37, %v3786_v25 }
 0x1cf   : > { %1168 = vperm.xlu0 %3567, %v842_v42   ;;  %1133 = vperm.xlu1 %3566, %v835_v40  }
 0x1d0   : > { %v752_v63 = vpop.permute.xlu1 %751 }
 0x1d1   : > { %v849_v6 = vmul.f32 %v752_v63, %v3786_v25 }
 0x1d3   : > { %1178 = vperm.xlu0 %3567, %v844_v54   ;;  %1143 = vperm.xlu1 %3566, %v837_v53  }
 0x1d7   : > { %1188 = vperm.xlu0 %3567, %v846_v57   ;;  %1153 = vperm.xlu1 %3566, %v839_v56  }
 0x1d9   : > { %v3930_v62 = vpop.permute.xlu0 %851 }
 0x1db   : > { %1198 = vperm.xlu0 %3567, %v848_v59   ;;  %1163 = vperm.xlu1 %3566, %v841_v58  }
 0x1dd   : > { %v3933_v45 = vpop.permute.xlu0 %875 }
 0x1df   : > { %3568 = vset.pattern.permute.xlu0 %v3655_v61  ;;  %1173 = vperm.xlu1 %3566, %v843_v49  }
 0x1e0   : > { %1295 = vperm.xlu0 %3568, %v3770_v21  }
 0x1e1   : > { %v3937_v50 = vpop.permute.xlu1 %859 }
 0x1e2   : > { %v3939_v1 = vpop.permute.xlu0 %893 }
 0x1e3   : > { %1183 = vperm.xlu1 %3566, %v845_v60  }
 0x1e4   : > { %1307 = vperm.xlu0 %3568, %v3786_v25  }
 0x1e5   : > { %v3943_v30 = vpop.permute.xlu1 %867 }
 0x1e6   : > { %v3945_v5 = vpop.permute.xlu0 %908 }
 0x1e7   : > { %1193 = vperm.xlu1 %3566, %v847_v2  }
 0x1ea   : > { %v3948_v31 = vpop.permute.xlu0 %918  ;;  %v3950_v12 = vpop.permute.xlu1 %888 }
 0x1eb   : > { %1203 = vperm.xlu1 %3566, %v849_v6  }
 0x1ee   : > { %v3952_v13 = vpop.permute.xlu0 %928  ;;  %v3954_v14 = vpop.permute.xlu1 %898 }
 0x1ef   : > { %3569 = vset.pattern.permute.xlu1 %v3655_v61 }
 0x1f0   : > { %1299 = vperm.xlu1 %3569, %v3778_v23  }
 0x1f2   : > { %v3957_v16 = vpop.permute.xlu0 %938  ;;  %v3959_v17 = vpop.permute.xlu1 %903 }
 0x1f4   : > { %1303 = vperm.xlu1 %3569, %v3782_v24  }
 0x1f6   : > { %v3962_v26 = vpop.permute.xlu0 %948  ;;  %v3964_v27 = vpop.permute.xlu1 %913 }
 0x1fa   : > { %v3966_v28 = vpop.permute.xlu0 %958  ;;  %v3968_v29 = vpop.permute.xlu1 %923 }
 0x1fe   : > { %v3970_v15 = vpop.permute.xlu0 %968  ;;  %v3972_v35 = vpop.permute.xlu1 %933 }
 0x202   : > { %v3974_v38 = vpop.permute.xlu0 %978  ;;  %v3976_v39 = vpop.permute.xlu1 %943 }
 0x206   : > { %v3978_v32 = vpop.permute.xlu0 %988  ;;  %v3980_v34 = vpop.permute.xlu1 %953 }
 0x20a   : > { %v3982_v33 = vpop.permute.xlu0 %998  ;;  %v3984_v41 = vpop.permute.xlu1 %963 }
 0x20e   : > { %v3986_v44 = vpop.permute.xlu0 %1008  ;;  %v3988_v46 = vpop.permute.xlu1 %973 }
 0x212   : > { %v3990_v47 = vpop.permute.xlu0 %1018  ;;  %v3992_v3 = vpop.permute.xlu1 %983 }
 0x216   : > { %v3994_v48 = vpop.permute.xlu0 %1028  ;;  %v3996_v51 = vpop.permute.xlu1 %993 }
 0x21a   : > { %v3998_v43 = vpop.permute.xlu0 %1038  ;;  %v4000_v40 = vpop.permute.xlu1 %1003 }
 0x21e   : > { %v4002_v42 = vpop.permute.xlu0 %1048  ;;  %v4004_v52 = vpop.permute.xlu1 %1013 }
 0x222   : > { %v4006_v53 = vpop.permute.xlu0 %1058  ;;  %v4008_v54 = vpop.permute.xlu1 %1023 }
 0x226   : > { %v4010_v55 = vpop.permute.xlu0 %1068  ;;  %v4012_v56 = vpop.permute.xlu1 %1033 }
 0x22a   : > { %v4014_v57 = vpop.permute.xlu0 %1078  ;;  %v4016_v36 = vpop.permute.xlu1 %1043 }
 0x22e   : > { %v4018_v37 = vpop.permute.xlu0 %1088  ;;  %v4020_v58 = vpop.permute.xlu1 %1053 }
 0x232   : > { %v4022_v59 = vpop.permute.xlu0 %1098  ;;  %v4024_v49 = vpop.permute.xlu1 %1063 }
 0x236   : > { %v4026_v63 = vpop.permute.xlu0 %1108  ;;  %v4028_v61 = vpop.permute.xlu1 %1073 }
 0x23a   : > { %v4030_v60 = vpop.permute.xlu0 %1118  ;;  %v4032_v2 = vpop.permute.xlu1 %1083 }
 0x23b   : > { %5654 = vst [vmem:[#allocation16_spill] sm:$0xff] %v4030_v60 }
 0x23e   : > { %v4034_v6 = vpop.permute.xlu0 %1128  ;;  %v4036_v9 = vpop.permute.xlu1 %1093 }
 0x23f   : > { %5655 = vst [vmem:[#allocation17_spill] sm:$0xff] %v4034_v6 }
 0x242   : > { %v4038_v8 = vpop.permute.xlu0 %1138  ;;  %v4040_v10 = vpop.permute.xlu1 %1103 }
 0x243   : > { %5656 = vst [vmem:[#allocation18_spill] sm:$0xff] %v4038_v8 }
 0x246   : > { %v4042_v0 = vpop.permute.xlu0 %1148  ;;  %v4044_v25 = vpop.permute.xlu1 %1113 }
 0x247   : > { %5657 = vst [vmem:[#allocation19_spill] sm:$0xff] %v4042_v0  ;;  %5658 = vst [vmem:[#allocation20_spill] sm:$0xff] %v4044_v25  ;;  %v3656_v25 = vmov 16  }
 0x248   : > { %3571 = vset.pattern.permute.xlu1 %v3656_v25 }
 0x24a   : > { %v4046_v24 = vpop.permute.xlu0 %1158  ;;  %v4048_v23 = vpop.permute.xlu1 %1123 }
 0x24b   : > { %5659 = vst [vmem:[#allocation21_spill] sm:$0xff] %v4046_v24  ;;  %5660 = vst [vmem:[#allocation22_spill] sm:$0xff] %v4048_v23  ;;  %v857_v24 = vrot.slane %v3930_v62, %v3742_v7 }
 0x24d   : > { %v882_v8 = vmul.f32 %v857_v24, %v4063_v4 }
 0x24e   : > { %v4054_v22 = vpop.permute.xlu0 %1168  ;;  %v4056_v20 = vpop.permute.xlu1 %1133 }
 0x24f   : > { %5661 = vst [vmem:[#allocation23_spill] sm:$0xff] %v4054_v22  ;;  %5662 = vst [vmem:[#allocation24_spill] sm:$0xff] %v4056_v20  ;;  %v1213_v20 = vrot.slane %v882_v8, %v3742_v7 }
 0x251   : > { %v1232_v24 = vadd.f32 %v1213_v20, %v3954_v14  ;;  %v1234_v25 = vadd.f32 %v1213_v20, %v3945_v5 }
 0x252   : > { %v4058_v21 = vpop.permute.xlu0 %1178  ;;  %v4060_v19 = vpop.permute.xlu1 %1143 }
 0x253   : > { %5663 = vst [vmem:[#allocation25_spill] sm:$0xff] %v4058_v21  ;;  %5664 = vst [vmem:[#allocation26_spill] sm:$0xff] %v4060_v19  ;;  %v1231_v21 = vadd.f32 %v1213_v20, %v3939_v1  ;;  %v1230_v19 = vadd.f32 %v1213_v20, %v3950_v12 }
 0x256   : > { %v4067_v0 = vpop.permute.xlu0 %1188  ;;  %v4070_v6 = vpop.permute.xlu1 %1153 }
 0x257   : > { %5665 = vst [vmem:[#allocation27_spill] sm:$0xff] %v4067_v0  ;;  %5666 = vst [vmem:[#allocation28_spill] sm:$0xff] %v4070_v6  ;;  %v1233_v6 = vadd.f32 %v1213_v20, %v3959_v17  ;;  %v1236_v17 = vadd.f32 %v1213_v20, %v3948_v31 }
 0x25a   : > { %v4072_v22 = vpop.permute.xlu0 %1198  ;;  %v4077_v23 = vpop.permute.xlu1 %1163 }
 0x25e   : > { %v4091_v12 = vpop.permute.xlu1 %1173 }
 0x25f   : > { %v1296_v60 = vpop.permute.xlu0 %1295 }
 0x260   : > { %v4079_v62 = vadd.f32 %v1296_v60, %v1231_v21  ;;  %v4081_v0 = vadd.f32 %v1296_v60, %v1230_v19  ;;  %v4087_v8 = vadd.f32 %v1296_v60, %v1232_v24  ;;  %v4089_v1 = vadd.f32 %v1296_v60, %v1233_v6 }
 0x261   : > { %v1235_v21 = vadd.f32 %v1213_v20, %v3964_v27  ;;  %v4097_v19 = vadd.f32 %v1296_v60, %v1234_v25  ;;  %v1237_v24 = vadd.f32 %v1213_v20, %v3968_v29  ;;  %v4107_v5 = vadd.f32 %v1296_v60, %v1236_v17 }
 0x262   : > { %5667 = vst [vmem:[#allocation29_spill] sm:$0xff] %v4079_v62  ;;  %5668 = vst [vmem:[#allocation30_spill] sm:$0xff] %v4081_v0  ;;  %1376 = vadd.xlane.f32.xlu0 %v4079_v62  ;;  %1374 = vadd.xlane.f32.xlu1 %v4081_v0  ;;  %v4105_v6 = vpop.permute.xlu1 %1183  ;;  %v1239_v25 = vadd.f32 %v1213_v20, %v3972_v35  ;;  %v1240_v17 = vadd.f32 %v1213_v20, %v3957_v16 }
 0x263   : > { %5669 = vst [vmem:[#allocation31_spill] sm:$0xff] %v4087_v8  ;;  %5670 = vst [vmem:[#allocation32_spill] sm:$0xff] %v4089_v1  ;;  %v4099_v14 = vadd.f32 %v1296_v60, %v1235_v21  ;;  %v4109_v27 = vadd.f32 %v1296_v60, %v1237_v24  ;;  %v1241_v24 = vadd.f32 %v1213_v20, %v3976_v39 }
 0x264   : > { %5671 = vst [vmem:[#allocation33_spill] sm:$0xff] %v4097_v19  ;;  %5673 = vst [vmem:[#allocation35_spill] sm:$0xff] %v4107_v5  ;;  %v4117_v29 = vadd.f32 %v1296_v60, %v1239_v25  ;;  %v4127_v35 = vadd.f32 %v1296_v60, %v1240_v17  ;;  %v1243_v16 = vadd.f32 %v1213_v20, %v3980_v34 }
 0x265   : > { %5672 = vst [vmem:[#allocation34_spill] sm:$0xff] %v4099_v14  ;;  %5674 = vst [vmem:[#allocation36_spill] sm:$0xff] %v4109_v27 }
 0x266   : > { %1378 = vadd.xlane.f32.xlu0 %v4087_v8  ;;  %1380 = vadd.xlane.f32.xlu1 %v4089_v1  ;;  %v1238_v1 = vadd.f32 %v1213_v20, %v3952_v13  ;;  %5676 = vst [vmem:[#allocation38_spill] sm:$0xff] %v4117_v29  ;;  %v4119_v21 = vpop.permute.xlu1 %1193  ;;  %v865_v13 = vrot.slane %v3937_v50, %v3742_v7  ;;  %5677 = vst [vmem:[#allocation39_spill] sm:$0xff] %v4127_v35 }
 0x268   : > { %v4115_v31 = vadd.f32 %v1296_v60, %v1238_v1  ;;  %v4129_v1 = vadd.f32 %v1296_v60, %v1241_v24  ;;  %v4143_v24 = vadd.f32 %v1296_v60, %v1243_v16 }
 0x26a   : > { %1382 = vadd.xlane.f32.xlu0 %v4097_v19  ;;  %1384 = vadd.xlane.f32.xlu1 %v4099_v14  ;;  %5675 = vst [vmem:[#allocation37_spill] sm:$0xff] %v4115_v31  ;;  %v761_v14 = vcombine.high %v3489_v18, %v3489_v18  ;;  %5678 = vst [vmem:[#allocation40_spill] sm:$0xff] %v4129_v1  ;;  %v1242_v18 = vadd.f32 %v1213_v20, %v3962_v26  ;;  %v4138_v39 = vpop.permute.xlu1 %1203 }
 0x26b   : > { %5680 = vst [vmem:[#allocation42_spill] sm:$0xff] %v4143_v24  ;;  %v1245_v26 = vadd.f32 %v1213_v20, %v3984_v41 }
 0x26c   : > { %v4132_v25 = vrot.slane %v761_v14, %v3748_v11  ;;  %v4141_v17 = vadd.f32 %v1296_v60, %v1242_v18  ;;  %v1244_v14 = vadd.f32 %v1213_v20, %v3966_v28 }
 0x26e   : > { %1386 = vadd.xlane.f32.xlu0 %v4107_v5  ;;  %1388 = vadd.xlane.f32.xlu1 %v4109_v27  ;;  %v883_v50 = vmul.f32 %v865_v13, %v4132_v25  ;;  %5679 = vst [vmem:[#allocation41_spill] sm:$0xff] %v4141_v17  ;;  %v4150_v11 = vadd.f32 %v1296_v60, %v1244_v14 }
 0x270   : > { %v1217_v34 = vrot.slane %v883_v50, %v3742_v7  ;;  %5681 = vst [vmem:[#allocation43_spill] sm:$0xff] %v4150_v11 }
 0x272   : > { %1390 = vadd.xlane.f32.xlu0 %v4115_v31  ;;  %1392 = vadd.xlane.f32.xlu1 %v4117_v29  ;;  %v3657_v29 = vmov 15   ;;  %v1246_v13 = vadd.f32 %v1217_v34, %v3970_v15  ;;  %v1247_v18 = vadd.f32 %v1217_v34, %v3988_v46  ;;  %v1248_v41 = vadd.f32 %v1217_v34, %v3974_v38 }
 0x273   : > { %3570 = vset.pattern.permute.xlu0 %v3657_v29  ;;  %v1300_v29 = vpop.permute.xlu1 %1299  ;;  %v1249_v16 = vadd.f32 %v1217_v34, %v3992_v3  ;;  %v1250_v46 = vadd.f32 %v1217_v34, %v3978_v32  ;;  %v1251_v50 = vadd.f32 %v1217_v34, %v3996_v51  ;;  %v1252_v3 = vadd.f32 %v1217_v34, %v3982_v33 }
 0x274   : > { %v4158_v20 = vadd.f32 %v1300_v29, %v1247_v18  ;;  %v4160_v28 = vadd.f32 %v1300_v29, %v1246_v13  ;;  %v4168_v15 = vadd.f32 %v1300_v29, %v1248_v41  ;;  %v1254_v51 = vadd.f32 %v1217_v34, %v3986_v44 }
 0x275   : > { %v4174_v14 = vadd.f32 %v1300_v29, %v1251_v50  ;;  %v4176_v38 = vadd.f32 %v1300_v29, %v1250_v46  ;;  %v4184_v32 = vadd.f32 %v1300_v29, %v1252_v3  ;;  %v1255_v18 = vadd.f32 %v1217_v34, %v4004_v52 }
 0x276   : > { %1394 = vadd.xlane.f32.xlu0 %v4127_v35  ;;  %1396 = vadd.xlane.f32.xlu1 %v4129_v1  ;;  %v4152_v1 = vadd.f32 %v1296_v60, %v1245_v26  ;;  %5683 = vst [vmem:[#allocation45_spill] sm:$0xff] %v4158_v20  ;;  %5684 = vst [vmem:[#allocation46_spill] sm:$0xff] %v4160_v28  ;;  %v4166_v60 = vadd.f32 %v1300_v29, %v1249_v16 }
 0x277   : > { %5686 = vst [vmem:[#allocation48_spill] sm:$0xff] %v4168_v15  ;;  %5687 = vst [vmem:[#allocation49_spill] sm:$0xff] %v4174_v14  ;;  %v1253_v26 = vadd.f32 %v1217_v34, %v4000_v40  ;;  %v4190_v41 = vadd.f32 %v1300_v29, %v1255_v18  ;;  %v4192_v33 = vadd.f32 %v1300_v29, %v1254_v51 }
 0x278   : > { %5682 = vst [vmem:[#allocation44_spill] sm:$0xff] %v4152_v1  ;;  %5685 = vst [vmem:[#allocation47_spill] sm:$0xff] %v4166_v60  ;;  %v1256_v40 = vadd.f32 %v1217_v34, %v3990_v47  ;;  %v1257_v16 = vadd.f32 %v1217_v34, %v4008_v54  ;;  %v776_v44 = vcombine.high %v4063_v4, %v4063_v4 }
 0x279   : > { %5688 = vst [vmem:[#allocation50_spill] sm:$0xff] %v4176_v38  ;;  %v4182_v13 = vadd.f32 %v1300_v29, %v1253_v26  ;;  %5690 = vst [vmem:[#allocation52_spill] sm:$0xff] %v4184_v32  ;;  %v873_v52 = vrot.slane %v3943_v30, %v3742_v7  ;;  %v1258_v3 = vadd.f32 %v1217_v34, %v3994_v48 }
 0x27a   : > { %1398 = vadd.xlane.f32.xlu0 %v4141_v17  ;;  %1400 = vadd.xlane.f32.xlu1 %v4143_v24  ;;  %5691 = vst [vmem:[#allocation53_spill] sm:$0xff] %v4190_v41  ;;  %5692 = vst [vmem:[#allocation54_spill] sm:$0xff] %v4192_v33  ;;  %v4202_v46 = vadd.f32 %v1300_v29, %v1257_v16  ;;  %v4204_v50 = vadd.f32 %v1300_v29, %v1256_v40  ;;  %v1304_v40 = vpop.permute.xlu1 %1303 }
 0x27b   : > { %5689 = vst [vmem:[#allocation51_spill] sm:$0xff] %v4182_v13  ;;  %v1259_v47 = vadd.f32 %v1217_v34, %v4012_v56  ;;  %v884_v54 = vmul.f32 %v873_v52, %v776_v44  ;;  %v4212_v51 = vadd.f32 %v1300_v29, %v1258_v3  ;;  %v1260_v4 = vadd.f32 %v1217_v34, %v3998_v43 }
 0x27c   : > { %5693 = vst [vmem:[#allocation55_spill] sm:$0xff] %v4202_v46  ;;  %5694 = vst [vmem:[#allocation56_spill] sm:$0xff] %v4204_v50  ;;  %v1261_v30 = vadd.f32 %v1217_v34, %v4016_v36 }
 0x27d   : > { %v4210_v26 = vadd.f32 %v1300_v29, %v1259_v47  ;;  %5696 = vst [vmem:[#allocation58_spill] sm:$0xff] %v4212_v51  ;;  %v1221_v48 = vrot.slane %v884_v54, %v3742_v7  ;;  %v4221_v18 = vadd.f32 %v1300_v29, %v1260_v4 }
 0x27e   : > { %1402 = vadd.xlane.f32.xlu0 %v4150_v11  ;;  %1404 = vadd.xlane.f32.xlu1 %v4152_v1  ;;  %v4219_v56 = vadd.f32 %v1300_v29, %v1261_v30 }
 0x27f   : > { %5695 = vst [vmem:[#allocation57_spill] sm:$0xff] %v4210_v26  ;;  %5698 = vst [vmem:[#allocation60_spill] sm:$0xff] %v4221_v18  ;;  %v1262_v16 = vadd.f32 %v1221_v48, %v4002_v42  ;;  %v1263_v44 = vadd.f32 %v1221_v48, %v4020_v58  ;;  %v1264_v34 = vadd.f32 %v1221_v48, %v4006_v53 }
 0x280   : > { %5697 = vst [vmem:[#allocation59_spill] sm:$0xff] %v4219_v56  ;;  %v1265_v52 = vadd.f32 %v1221_v48, %v4024_v49  ;;  %v1266_v58 = vadd.f32 %v1221_v48, %v4010_v55  ;;  %v1267_v3 = vadd.f32 %v1221_v48, %v4028_v61  ;;  %v1268_v49 = vadd.f32 %v1221_v48, %v4014_v57 }
 0x281   : > { %v4227_v43 = vadd.f32 %v1304_v40, %v1263_v44  ;;  %v4229_v36 = vadd.f32 %v1304_v40, %v1262_v16  ;;  %v4237_v42 = vadd.f32 %v1304_v40, %v1264_v34  ;;  %v1269_v54 = vadd.f32 %v1221_v48, %v4032_v2 }
 0x282   : > { %1408 = vadd.xlane.f32.xlu1 %v4158_v20  ;;  %1406 = vadd.xlane.f32.xlu0 %v4160_v28  ;;  %v4235_v29 = vadd.f32 %v1304_v40, %v1265_v52  ;;  %v4243_v47 = vadd.f32 %v1304_v40, %v1267_v3  ;;  %v4245_v53 = vadd.f32 %v1304_v40, %v1266_v58  ;;  %v5711_v3 = vld [vmem:[#allocation20_spill] sm:$0xff] }
 0x283   : > { %5699 = vst [vmem:[#allocation61_spill] sm:$0xff] %v4227_v43  ;;  %5700 = vst [vmem:[#allocation62_spill] sm:$0xff] %v4229_v36  ;;  %v4251_v4 = vadd.f32 %v1304_v40, %v1269_v54  ;;  %v4253_v55 = vadd.f32 %v1304_v40, %v1268_v49  ;;  %v1270_v61 = vadd.f32 %v1221_v48, %v4018_v37 }
 0x284   : > { %5701 = vst [vmem:[#allocation63_spill] sm:$0xff] %v4235_v29  ;;  %5702 = vst [vmem:[#allocation64_spill] sm:$0xff] %v4237_v42  ;;  %v1271_v30 = vadd.f32 %v1221_v48, %v4036_v9  ;;  %v1272_v2 = vadd.f32 %v1221_v48, %v4022_v59  ;;  %v1273_v44 = vadd.f32 %v1221_v48, %v4040_v10 }
 0x285   : > { %5703 = vst [vmem:[#allocation65_spill] sm:$0xff] %v4243_v47  ;;  %5704 = vst [vmem:[#allocation66_spill] sm:$0xff] %v4245_v53  ;;  %v4261_v57 = vadd.f32 %v1304_v40, %v1270_v61  ;;  %v777_v37 = vcombine.high %v4132_v25, %v4132_v25  ;;  %v881_v9 = vrot.slane %v3933_v45, %v3742_v7  ;;  %v5714_v25 = vld [vmem:[#allocation16_spill] sm:$0xff]  ;;  %v5715_v45 = vld [vmem:[#allocation22_spill] sm:$0xff] }
 0x286   : > { %1412 = vadd.xlane.f32.xlu1 %v4166_v60  ;;  %1410 = vadd.xlane.f32.xlu0 %v4168_v15  ;;  %5705 = vst [vmem:[#allocation67_spill] sm:$0xff] %v4251_v4  ;;  %5706 = vst [vmem:[#allocation68_spill] sm:$0xff] %v4253_v55  ;;  %v4259_v16 = vadd.f32 %v1304_v40, %v1271_v30  ;;  %v4271_v34 = vadd.f32 %v1304_v40, %v1273_v44 }
 0x287   : > { %5708 = vst [vmem:[#allocation70_spill] sm:$0xff] %v4261_v57  ;;  %v4273_v52 = vadd.f32 %v1304_v40, %v1272_v2  ;;  %v1274_v58 = vadd.f32 %v1221_v48, %v4026_v63  ;;  %v1275_v59 = vadd.f32 %v1221_v48, %v5711_v3  ;;  %v885_v10 = vmul.f32 %v881_v9, %v777_v37  ;;  %v1308_v3 = vpop.permute.xlu0 %1307  ;;  %v5718_v37 = vld [vmem:[#allocation17_spill] sm:$0xff] }
 0x288   : > { %5707 = vst [vmem:[#allocation69_spill] sm:$0xff] %v4259_v16  ;;  %5709 = vst [vmem:[#allocation71_spill] sm:$0xff] %v4271_v34  ;;  %v1276_v61 = vadd.f32 %v1221_v48, %v5714_v25  ;;  %v1277_v30 = vadd.f32 %v1221_v48, %v5715_v45  ;;  %v5722_v45 = vld [vmem:[#allocation18_spill] sm:$0xff] }
 0x289   : > { %5710 = vst [vmem:[#allocation72_spill] sm:$0xff] %v4273_v52  ;;  %v4279_v49 = vadd.f32 %v1304_v40, %v1275_v59  ;;  %v4281_v54 = vadd.f32 %v1304_v40, %v1274_v58  ;;  %v1225_v63 = vrot.slane %v885_v10, %v3742_v7  ;;  %v5719_v59 = vld [vmem:[#allocation24_spill] sm:$0xff]  ;;  %v5723_v10 = vld [vmem:[#allocation26_spill] sm:$0xff] }
 0x28a   : > { %1416 = vadd.xlane.f32.xlu1 %v4174_v14  ;;  %1414 = vadd.xlane.f32.xlu0 %v4176_v38  ;;  %v4288_v2 = vadd.f32 %v1304_v40, %v1277_v30  ;;  %v4290_v44 = vadd.f32 %v1304_v40, %v1276_v61 }
 0x28b   : > { %5712 = vst [vmem:[#allocation20_spill] sm:$0xff] %v4279_v49  ;;  %5713 = vst [vmem:[#allocation73_spill] sm:$0xff] %v4281_v54  ;;  %v1278_v9 = vadd.f32 %v1225_v63, %v5718_v37  ;;  %v1279_v58 = vadd.f32 %v1225_v63, %v5719_v59  ;;  %v1280_v1 = vadd.f32 %v1225_v63, %v5722_v45  ;;  %v5726_v37 = vld [vmem:[#allocation19_spill] sm:$0xff]  ;;  %v5730_v45 = vld [vmem:[#allocation21_spill] sm:$0xff] }
 0x28c   : > { %5716 = vst [vmem:[#allocation16_spill] sm:$0xff] %v4288_v2  ;;  %5717 = vst [vmem:[#allocation22_spill] sm:$0xff] %v4290_v44  ;;  %v1281_v30 = vadd.f32 %v1225_v63, %v5723_v10  ;;  %v1282_v59 = vadd.f32 %v1225_v63, %v5726_v37  ;;  %v1284_v10 = vadd.f32 %v1225_v63, %v5730_v45  ;;  %v5736_v45 = vld [vmem:[#allocation25_spill] sm:$0xff] }
 0x28d   : > { %v4296_v48 = vadd.f32 %v1308_v3, %v1279_v58  ;;  %v4298_v25 = vadd.f32 %v1308_v3, %v1278_v9  ;;  %v4306_v61 = vadd.f32 %v1308_v3, %v1280_v1  ;;  %v1285_v11 = vadd.f32 %v1225_v63, %v4077_v23 }
 0x28e   : > { %1420 = vadd.xlane.f32.xlu1 %v4182_v13  ;;  %1418 = vadd.xlane.f32.xlu0 %v4184_v32  ;;  %v4304_v40 = vadd.f32 %v1308_v3, %v1281_v30  ;;  %v4314_v58 = vadd.f32 %v1308_v3, %v1282_v59  ;;  %v4322_v30 = vadd.f32 %v1308_v3, %v1284_v10 }
 0x28f   : > { %5720 = vst [vmem:[#allocation17_spill] sm:$0xff] %v4296_v48  ;;  %5721 = vst [vmem:[#allocation24_spill] sm:$0xff] %v4298_v25  ;;  %v4320_v1 = vadd.f32 %v1308_v3, %v1285_v11  ;;  %v1291_v11 = vadd.f32 %v1225_v63, %v4119_v21 }
 0x290   : > { %5724 = vst [vmem:[#allocation18_spill] sm:$0xff] %v4304_v40  ;;  %5725 = vst [vmem:[#allocation26_spill] sm:$0xff] %v4306_v61 }
 0x291   : > { %5731 = vst [vmem:[#allocation21_spill] sm:$0xff] %v4320_v1  ;;  %5732 = vst [vmem:[#allocation74_spill] sm:$0xff] %v4322_v30 }
 0x292   : > { %1424 = vadd.xlane.f32.xlu1 %v4190_v41  ;;  %1422 = vadd.xlane.f32.xlu0 %v4192_v33 }
 0x296   : > { %1428 = vadd.xlane.f32.xlu1 %v4202_v46  ;;  %1426 = vadd.xlane.f32.xlu0 %v4204_v50 }
 0x29a   : > { %1432 = vadd.xlane.f32.xlu1 %v4210_v26  ;;  %1430 = vadd.xlane.f32.xlu0 %v4212_v51 }
 0x29e   : > { %1436 = vadd.xlane.f32.xlu1 %v4219_v56  ;;  %1434 = vadd.xlane.f32.xlu0 %v4221_v18  ;;  %v1288_v18 = vadd.f32 %v1225_v63, %v5736_v45  ;;  %v1292_v45 = vadd.f32 %v1225_v63, %v4072_v22 }
 0x2a2   : > { %1440 = vadd.xlane.f32.xlu1 %v4227_v43  ;;  %1438 = vadd.xlane.f32.xlu0 %v4229_v36 }
 0x2a6   : > { %1444 = vadd.xlane.f32.xlu1 %v4235_v29  ;;  %1442 = vadd.xlane.f32.xlu0 %v4237_v42 }
 0x2aa   : > { %1448 = vadd.xlane.f32.xlu1 %v4243_v47  ;;  %1446 = vadd.xlane.f32.xlu0 %v4245_v53 }
 0x2ae   : > { %1452 = vadd.xlane.f32.xlu1 %v4251_v4  ;;  %1450 = vadd.xlane.f32.xlu0 %v4253_v55 }
 0x2b2   : > { %1456 = vadd.xlane.f32.xlu1 %v4259_v16  ;;  %1454 = vadd.xlane.f32.xlu0 %v4261_v57 }
 0x2b6   : > { %1460 = vadd.xlane.f32.xlu1 %v4271_v34  ;;  %1458 = vadd.xlane.f32.xlu0 %v4273_v52 }
 0x2ba   : > { %1464 = vadd.xlane.f32.xlu1 %v4279_v49  ;;  %1462 = vadd.xlane.f32.xlu0 %v4281_v54 }
 0x2be   : > { %1468 = vadd.xlane.f32.xlu1 %v4288_v2  ;;  %1466 = vadd.xlane.f32.xlu0 %v4290_v44  ;;  %v5727_v2 = vld [vmem:[#allocation28_spill] sm:$0xff]  ;;  %v1287_v44 = vadd.f32 %v1225_v63, %v4091_v12  ;;  %v4339_v12 = vadd.f32 %v1308_v3, %v1288_v18  ;;  %v4354_v18 = vadd.f32 %v1308_v3, %v1292_v45 }
 0x2bf   : > { %v1283_v56 = vadd.f32 %v1225_v63, %v5727_v2  ;;  %5729 = vst [vmem:[#allocation28_spill] sm:$0xff] %v4314_v58  ;;  %v5733_v2 = vld [vmem:[#allocation23_spill] sm:$0xff] }
 0x2c0   : > { %v1286_v37 = vadd.f32 %v1225_v63, %v5733_v2  ;;  %v4329_v59 = vadd.f32 %v1308_v3, %v1287_v44  ;;  %5738 = vst [vmem:[#allocation76_spill] sm:$0xff] %v4339_v12  ;;  %v5739_v2 = vld [vmem:[#allocation27_spill] sm:$0xff]  ;;  %v1293_v44 = vadd.f32 %v1225_v63, %v4138_v39  ;;  %5743 = vst [vmem:[#allocation79_spill] sm:$0xff] %v4354_v18  ;;  %v3582_v39 = vld [vmem:[%s5488_s2] sm:$0xf] }
 0x2c1   : > { %v4312_v9 = vadd.f32 %v1308_v3, %v1283_v56  ;;  %v1289_v56 = vadd.f32 %v1225_v63, %v4105_v6  ;;  %v1290_v24 = vadd.f32 %v1225_v63, %v5739_v2  ;;  %v4344_v6 = vadd.f32 %v1308_v3, %v1291_v11 }
 0x2c2   : > { %1472 = vadd.xlane.f32.xlu1 %v4296_v48  ;;  %1470 = vadd.xlane.f32.xlu0 %v4298_v25  ;;  %5734 = vst [vmem:[#allocation23_spill] sm:$0xff] %v4329_v59  ;;  %v4331_v23 = vadd.f32 %v1308_v3, %v1286_v37  ;;  %v4352_v21 = vadd.f32 %v1308_v3, %v1293_v44  ;;  %v3658_v63 = vmov 17   ;;  %v3659_v44 = vmov 18  }
 0x2c3   : > { %5728 = vst [vmem:[#allocation19_spill] sm:$0xff] %v4312_v9  ;;  %v4337_v10 = vadd.f32 %v1308_v3, %v1289_v56  ;;  %5740 = vst [vmem:[#allocation27_spill] sm:$0xff] %v4344_v6  ;;  %v4347_v37 = vadd.f32 %v1308_v3, %v1290_v24 }
 0x2c4   : > { %5735 = vst [vmem:[#allocation75_spill] sm:$0xff] %v4331_v23  ;;  %5742 = vst [vmem:[#allocation78_spill] sm:$0xff] %v4352_v21 }
 0x2c5   : > { %5737 = vst [vmem:[#allocation25_spill] sm:$0xff] %v4337_v10  ;;  %5741 = vst [vmem:[#allocation77_spill] sm:$0xff] %v4347_v37 }
 0x2c6   : > { %1476 = vadd.xlane.f32.xlu1 %v4304_v40  ;;  %1474 = vadd.xlane.f32.xlu0 %v4306_v61 }
 0x2ca   : > { %1480 = vadd.xlane.f32.xlu1 %v4312_v9  ;;  %1478 = vadd.xlane.f32.xlu0 %v4314_v58  ;;  %v5746_v9 = vld [vmem:[#allocation5_spill] sm:$0xff] }
 0x2ce   : > { %1484 = vadd.xlane.f32.xlu1 %v4320_v1  ;;  %1482 = vadd.xlane.f32.xlu0 %v4322_v30  ;;  %v5744_v1 = vlaneseq }
 0x2d0   : > { %v4412_v31 = vand.u32 127, %v5744_v1 }
 0x2d2   : > { %1488 = vadd.xlane.f32.xlu1 %v4329_v59  ;;  %1486 = vadd.xlane.f32.xlu0 %v4331_v23  ;;  %v1729_v30 = vadd.s32 4294967288, %v4412_v31  ;;  %v1736_v27 = vadd.s32 4294967280, %v4412_v31  ;;  %v4429_v1 = vsub.s32 %v4412_v31, %v5746_v9  ;;  %v1743_v58 = vadd.s32 4294967272, %v4412_v31 }
 0x2d3   : > { %v1750_v40 = vadd.s32 4294967264, %v4412_v31 }
 0x2d4   : > { %v4425_v5 = vsub.s32 %v1729_v30, %v5746_v9  ;;  %v4433_v47 = vsub.s32 %v1736_v27, %v5746_v9  ;;  %v1757_v30 = vadd.s32 4294967256, %v4412_v31  ;;  %v4445_v61 = vsub.s32 %v1743_v58, %v5746_v9 }
 0x2d5   : > { %v4449_v29 = vsub.s32 %v1750_v40, %v5746_v9 }
 0x2d6   : > { %1492 = vadd.xlane.f32.xlu1 %v4337_v10  ;;  %1490 = vadd.xlane.f32.xlu0 %v4339_v12 }
 0x2da   : > { %1496 = vadd.xlane.f32.xlu1 %v4344_v6  ;;  %1494 = vadd.xlane.f32.xlu0 %v4347_v37 }
 0x2de   : > { %1500 = vadd.xlane.f32.xlu1 %v4352_v21  ;;  %1498 = vadd.xlane.f32.xlu0 %v4354_v18 }
 0x2ef   : > { %v1377_v56 = vpop.xlane.xlu0 %1376  ;;  %2080 = vperm.xlu1 %3571, %v3582_v39   ;;  %v1375_v24 = vpop.xlane.xlu1 %1374 }
 0x2f0   : > { %v1504_v55 = vmul.f32 0.0078125, %v1377_v56  ;;  %v1503_v32 = vmul.f32 0.0078125, %v1375_v24  ;;  %v1764_v56 = vadd.s32 4294967248, %v4412_v31 }
 0x2f2   : > { %v1733_v38 = vrot.slane %v1504_v55, %v4425_v5  ;;  %v1728_v24 = vrot.slane %v1503_v32, %v4429_v1  ;;  %v4456_v55 = vsub.s32 %v1757_v30, %v5746_v9  ;;  %v4459_v32 = vsub.s32 %v1764_v56, %v5746_v9 }
 0x2f3   : > { %v1379_v22 = vpop.xlane.xlu0 %1378  ;;  %3572 = vset.pattern.permute.xlu1 %v3658_v63  ;;  %v1381_v11 = vpop.xlane.xlu1 %1380  ;;  %v1778_v30 = vadd.s32 4294967232, %v4412_v31 }
 0x2f4   : > { %2088 = vperm.xlu1 %3572, %v3582_v39   ;;  %1656 = vperm.xlu0 %3570, %v3582_v39   ;;  %v1505_v14 = vmul.f32 0.0078125, %v1379_v22  ;;  %v1506_v27 = vmul.f32 0.0078125, %v1381_v11  ;;  %v1735_v58 = vsel %vm1734_vm6, %v1733_v38, %v1728_v24  ;;  %v1771_v11 = vadd.s32 4294967240, %v4412_v31 }
 0x2f5   : > { %v1785_v38 = vadd.s32 4294967224, %v4412_v31 }
 0x2f6   : > { %v1740_v22 = vrot.slane %v1505_v14, %v4433_v47  ;;  %v1747_v14 = vrot.slane %v1506_v27, %v4445_v61  ;;  %v4477_v27 = vsub.s32 %v1771_v11, %v5746_v9 }
 0x2f7   : > { %v1383_v2 = vpop.xlane.xlu0 %1382  ;;  %v4361_v3 = vpop.xlane.xlu1 %1384 }
 0x2f8   : > { %3573 = vset.pattern.permute.xlu1 %v3659_v44  ;;  %v1507_v60 = vmul.f32 0.0078125, %v1383_v2  ;;  %v1508_v40 = vmul.f32 0.0078125, %v4361_v3  ;;  %v1742_v2 = vsel %vm1741_vm7, %v1740_v22, %v1735_v58  ;;  %v4483_v58 = vsub.s32 %v1778_v30, %v5746_v9 }
 0x2f9   : > { %2101 = vperm.xlu1 %3573, %v3582_v39   ;;  %v1749_v3 = vsel %vm1748_vm8, %v1747_v14, %v1742_v2 }
 0x2fa   : > { %v1754_v8 = vrot.slane %v1507_v60, %v4449_v29  ;;  %v1761_v24 = vrot.slane %v1508_v40, %v4456_v55  ;;  %v4491_v40 = vsub.s32 %v1785_v38, %v5746_v9  ;;  %v1806_v38 = vadd.s32 4294967200, %v4412_v31 }
 0x2fb   : > { %v4363_v45 = vpop.xlane.xlu0 %1386  ;;  %v4365_v21 = vpop.xlane.xlu1 %1388 }
 0x2fc   : > { %v1509_v42 = vmul.f32 0.0078125, %v4363_v45  ;;  %v1510_v60 = vmul.f32 0.0078125, %v4365_v21  ;;  %v1756_v45 = vsel %vm1755_vm9, %v1754_v8, %v1749_v3  ;;  %v1792_v21 = vadd.s32 4294967216, %v4412_v31 }
 0x2fd   : > { %v1763_v8 = vsel %vm1762_vm10, %v1761_v24, %v1756_v45  ;;  %v4524_v28 = vsub.s32 %v1806_v38, %v5746_v9  ;;  %v1827_v38 = vadd.s32 4294967176, %v4412_v31 }
 0x2fe   : > { %v1768_v22 = vrot.slane %v1509_v42, %v4459_v32  ;;  %v1775_v42 = vrot.slane %v1510_v60, %v4477_v27 }
 0x2ff   : > { %v4367_v18 = vpop.xlane.xlu0 %1390  ;;  %v4369_v6 = vpop.xlane.xlu1 %1392 }
 0x300   : > { %v1511_v62 = vmul.f32 0.0078125, %v4367_v18  ;;  %v1512_v11 = vmul.f32 0.0078125, %v4369_v6  ;;  %v1799_v18 = vadd.s32 4294967208, %v4412_v31  ;;  %v1770_v2 = vsel %vm1769_vm11, %v1768_v22, %v1763_v8 }
 0x301   : > { %v4509_v6 = vsub.s32 %v1792_v21, %v5746_v9 }
 0x302   : > { %v1782_v30 = vrot.slane %v1511_v62, %v4483_v58  ;;  %v1813_v62 = vadd.s32 4294967192, %v4412_v31  ;;  %v4516_v8 = vsub.s32 %v1799_v18, %v5746_v9 }
 0x303   : > { %v4371_v37 = vpop.xlane.xlu0 %1394  ;;  %v4373_v63 = vpop.xlane.xlu1 %1396 }
 0x304   : > { %v1513_v22 = vmul.f32 0.0078125, %v4371_v37  ;;  %v1514_v37 = vmul.f32 0.0078125, %v4373_v63 }
 0x307   : > { %v4375_v49 = vpop.xlane.xlu0 %1398  ;;  %v4377_v26 = vpop.xlane.xlu1 %1400 }
 0x30b   : > { %v4379_v10 = vpop.xlane.xlu0 %1402  ;;  %v4381_v44 = vpop.xlane.xlu1 %1404 }
 0x30f   : > { %v4383_v39 = vpop.xlane.xlu0 %1406  ;;  %v4385_v17 = vpop.xlane.xlu1 %1408 }
 0x310   : > { %v1519_v3 = vmul.f32 0.0078125, %v4383_v39  ;;  %v1520_v43 = vmul.f32 0.0078125, %v4385_v17  ;;  %v1777_v17 = vsel %vm1776_vm12, %v1775_v42, %v1770_v2  ;;  %v1789_v39 = vrot.slane %v1512_v11, %v4491_v40 }
 0x312   : > { %v1837_v36 = vrot.slane %v1519_v3, %v4429_v1  ;;  %v1841_v21 = vrot.slane %v1520_v43, %v4425_v5  ;;  %v1515_v3 = vmul.f32 0.0078125, %v4375_v49  ;;  %v4535_v43 = vsub.s32 %v1813_v62, %v5746_v9 }
 0x313   : > { %v4387_v54 = vpop.xlane.xlu0 %1410  ;;  %v4389_v51 = vpop.xlane.xlu1 %1412  ;;  %v1803_v62 = vrot.slane %v1514_v37, %v4516_v8 }
 0x314   : > { %v1521_v24 = vmul.f32 0.0078125, %v4387_v54  ;;  %v1784_v54 = vsel %vm1783_vm13, %v1782_v30, %v1777_v17  ;;  %v1522_v20 = vmul.f32 0.0078125, %v4389_v51  ;;  %v1796_v30 = vrot.slane %v1513_v22, %v4509_v6 }
 0x315   : > { %v1820_v51 = vadd.s32 4294967184, %v4412_v31  ;;  %v1791_v63 = vsel %vm1790_vm14, %v1789_v39, %v1784_v54  ;;  %v1842_v17 = vsel %vm1734_vm6, %v1841_v21, %v1837_v36 }
 0x316   : > { %v1846_v42 = vrot.slane %v1521_v24, %v4433_v47  ;;  %v1851_v7 = vrot.slane %v1522_v20, %v4445_v61  ;;  %v1798_v36 = vsel %vm1797_vm15, %v1796_v30, %v1791_v63  ;;  %v1810_v20 = vrot.slane %v1515_v3, %v4524_v28 }
 0x317   : > { %v4391_v12 = vpop.xlane.xlu0 %1414  ;;  %v4393_v34 = vpop.xlane.xlu1 %1416 }
 0x318   : > { %v1523_v11 = vmul.f32 0.0078125, %v4391_v12  ;;  %v1524_v22 = vmul.f32 0.0078125, %v4393_v34  ;;  %v1847_v39 = vsel %vm1741_vm7, %v1846_v42, %v1842_v17  ;;  %v4559_v34 = vsub.s32 %v1820_v51, %v5746_v9 }
 0x319   : > { %v1852_v42 = vsel %vm1748_vm8, %v1851_v7, %v1847_v39  ;;  %v1805_v51 = vsel %vm1804_vm0, %v1803_v62, %v1798_v36 }
 0x31a   : > { %v1856_v31 = vrot.slane %v1523_v11, %v4449_v29  ;;  %v1861_v11 = vrot.slane %v1524_v22, %v4456_v55 }
 0x31b   : > { %v4395_v46 = vpop.xlane.xlu0 %1418  ;;  %v4397_v59 = vpop.xlane.xlu1 %1420 }
 0x31c   : > { %v1857_v63 = vsel %vm1755_vm9, %v1856_v31, %v1852_v42 }
 0x31d   : > { %v1862_v31 = vsel %vm1762_vm10, %v1861_v11, %v1857_v63 }
 0x31f   : > { %v4399_v35 = vpop.xlane.xlu0 %1422  ;;  %v4401_v52 = vpop.xlane.xlu1 %1424 }
 0x320   : > { %v1528_v42 = vmul.f32 0.0078125, %v4401_v52 }
 0x323   : > { %v4403_v50 = vpop.xlane.xlu0 %1426  ;;  %v4405_v23 = vpop.xlane.xlu1 %1428 }
 0x327   : > { %v4407_v16 = vpop.xlane.xlu0 %1430  ;;  %v4409_v41 = vpop.xlane.xlu1 %1432 }
 0x32b   : > { %v4414_v57 = vpop.xlane.xlu0 %1434  ;;  %v4416_v33 = vpop.xlane.xlu1 %1436 }
 0x32c   : > { %5745 = vst [vmem:[#allocation80_spill] sm:$0xff] %v4416_v33  ;;  %v4548_v33 = vmul.f32 0.0078125, %v4377_v26  ;;  %v4563_v26 = vsub.s32 %v1827_v38, %v5746_v9  ;;  %v1526_v38 = vmul.f32 0.0078125, %v4397_v59 }
 0x32f   : > { %v4420_v4 = vpop.xlane.xlu0 %1438  ;;  %v4422_v13 = vpop.xlane.xlu1 %1440 }
 0x330   : > { %v1535_v24 = vmul.f32 0.0078125, %v4420_v4  ;;  %v1536_v12 = vmul.f32 0.0078125, %v4422_v13 }
 0x332   : > { %v1916_v54 = vrot.slane %v1535_v24, %v4429_v1  ;;  %v1920_v21 = vrot.slane %v1536_v12, %v4425_v5 }
 0x333   : > { %v4436_v19 = vpop.xlane.xlu0 %1442  ;;  %v4438_v53 = vpop.xlane.xlu1 %1444 }
 0x334   : > { %v1537_v49 = vmul.f32 0.0078125, %v4436_v19  ;;  %v1525_v19 = vmul.f32 0.0078125, %v4395_v46  ;;  %v1538_v37 = vmul.f32 0.0078125, %v4438_v53  ;;  %v1817_v46 = vrot.slane %v4548_v33, %v4535_v43 }
 0x335   : > { %v4578_v53 = vsel %vm1811_vm1, %v1810_v20, %v1805_v51 }
 0x336   : > { %v1925_v30 = vrot.slane %v1537_v49, %v4433_v47  ;;  %v1866_v7 = vrot.slane %v1525_v19, %v4459_v32  ;;  %v1921_v49 = vsel %vm1734_vm6, %v1920_v21, %v1916_v54  ;;  %v1930_v62 = vrot.slane %v1538_v37, %v4445_v61 }
 0x337   : > { %v4451_v48 = vpop.xlane.xlu0 %1446  ;;  %v4453_v25 = vpop.xlane.xlu1 %1448  ;;  %v1871_v19 = vrot.slane %v1526_v38, %v4477_v27 }
 0x338   : > { %v1539_v3 = vmul.f32 0.0078125, %v4451_v48  ;;  %v1527_v48 = vmul.f32 0.0078125, %v4399_v35  ;;  %v1540_v39 = vmul.f32 0.0078125, %v4453_v25  ;;  %v1926_v59 = vsel %vm1741_vm7, %v1925_v30, %v1921_v49 }
 0x339   : > { %v4594_v25 = vmul.f32 0.0078125, %v4379_v10  ;;  %v1867_v11 = vsel %vm1769_vm11, %v1866_v7, %v1862_v31 }
 0x33a   : > { %v1935_v36 = vrot.slane %v1539_v3, %v4449_v29  ;;  %v1876_v3 = vrot.slane %v1527_v48, %v4483_v58  ;;  %v1940_v63 = vrot.slane %v1540_v39, %v4456_v55 }
 0x33b   : > { %v4469_v15 = vpop.xlane.xlu0 %1450  ;;  %v4471_v56 = vpop.xlane.xlu1 %1452 }
 0x33c   : > { %v1541_v20 = vmul.f32 0.0078125, %v4469_v15  ;;  %v1931_v15 = vsel %vm1748_vm8, %v1930_v62, %v1926_v59  ;;  %v1542_v52 = vmul.f32 0.0078125, %v4471_v56  ;;  %v1529_v56 = vmul.f32 0.0078125, %v4403_v50 }
 0x33e   : > { %v1950_v31 = vrot.slane %v1542_v52, %v4477_v27 }
 0x33f   : > { %v4486_v0 = vpop.xlane.xlu0 %1454  ;;  %v4488_v14 = vpop.xlane.xlu1 %1456 }
 0x340   : > { %v1543_v38 = vmul.f32 0.0078125, %v4486_v0  ;;  %v1544_v59 = vmul.f32 0.0078125, %v4488_v14  ;;  %v1886_v14 = vrot.slane %v1529_v56, %v4509_v6 }
 0x343   : > { %v4504_v45 = vpop.xlane.xlu0 %1458  ;;  %v4506_v60 = vpop.xlane.xlu1 %1460 }
 0x347   : > { %v4528_v18 = vpop.xlane.xlu0 %1462  ;;  %v4530_v2 = vpop.xlane.xlu1 %1464 }
 0x348   : > { %v1548_v56 = vmul.f32 0.0078125, %v4530_v2 }
 0x34b   : > { %v4552_v4 = vpop.xlane.xlu0 %1466  ;;  %v4554_v13 = vpop.xlane.xlu1 %1468 }
 0x34f   : > { %v1471_v24 = vpop.xlane.xlu0 %1470  ;;  %v1473_v12 = vpop.xlane.xlu1 %1472 }
 0x350   : > { %v1551_v17 = vmul.f32 0.0078125, %v1471_v24  ;;  %v1552_v22 = vmul.f32 0.0078125, %v1473_v12  ;;  %v1872_v24 = vsel %vm1776_vm12, %v1871_v19, %v1867_v11  ;;  %v1881_v12 = vrot.slane %v1528_v42, %v4491_v40 }
 0x351   : > { %v1877_v0 = vsel %vm1783_vm13, %v1876_v3, %v1872_v24  ;;  %v4620_v19 = vmul.f32 0.0078125, %v4381_v44  ;;  %v1530_v42 = vmul.f32 0.0078125, %v4405_v23  ;;  %v1960_v23 = vrot.slane %v1544_v59, %v4491_v40 }
 0x352   : > { %v1995_v35 = vrot.slane %v1551_v17, %v4429_v1  ;;  %v1999_v54 = vrot.slane %v1552_v22, %v4425_v5  ;;  %v1936_v1 = vsel %vm1755_vm9, %v1935_v36, %v1931_v15  ;;  %v1945_v5 = vrot.slane %v1541_v20, %v4459_v32 }
 0x353   : > { %v1475_v21 = vpop.xlane.xlu0 %1474  ;;  %v1477_v37 = vpop.xlane.xlu1 %1476  ;;  %v1545_v20 = vmul.f32 0.0078125, %v4504_v45  ;;  %v1882_v45 = vsel %vm1790_vm14, %v1881_v12, %v1877_v0  ;;  %v1546_v15 = vmul.f32 0.0078125, %v4506_v60  ;;  %v1891_v52 = vrot.slane %v1530_v42, %v4516_v8 }
 0x354   : > { %v1553_v30 = vmul.f32 0.0078125, %v1475_v21  ;;  %v1554_v51 = vmul.f32 0.0078125, %v1477_v37  ;;  %v2000_v7 = vsel %vm1734_vm6, %v1999_v54, %v1995_v35  ;;  %v1887_v24 = vsel %vm1797_vm15, %v1886_v14, %v1882_v45 }
 0x355   : > { %v1824_v45 = vrot.slane %v4594_v25, %v4559_v34  ;;  %vm2073_vm6 = vcmask 1042434  }
 0x356   : > { %v2004_v10 = vrot.slane %v1553_v30, %v4433_v47  ;;  %v2009_v17 = vrot.slane %v1554_v51, %v4445_v61  ;;  %v1941_v47 = vsel %vm1762_vm10, %v1940_v63, %v1936_v1  ;;  %v1955_v61 = vrot.slane %v1543_v38, %v4483_v58 }
 0x357   : > { %v1479_v22 = vpop.xlane.xlu0 %1478  ;;  %v1481_v48 = vpop.xlane.xlu1 %1480  ;;  %v1946_v36 = vsel %vm1769_vm11, %v1945_v5, %v1941_v47  ;;  %v1547_v1 = vmul.f32 0.0078125, %v4528_v18 }
 0x358   : > { %v2005_v49 = vsel %vm1741_vm7, %v2004_v10, %v2000_v7  ;;  %v1555_v62 = vmul.f32 0.0078125, %v1479_v22  ;;  %v1556_v39 = vmul.f32 0.0078125, %v1481_v48  ;;  %v1951_v44 = vsel %vm1776_vm12, %v1950_v31, %v1946_v36 }
 0x359   : > { %v2010_v35 = vsel %vm1748_vm8, %v2009_v17, %v2005_v49  ;;  %v1956_v3 = vsel %vm1783_vm13, %v1955_v61, %v1951_v44  ;;  %v1533_v22 = vmul.f32 0.0078125, %v4414_v57  ;;  %v1892_v31 = vsel %vm1804_vm0, %v1891_v52, %v1887_v24 }
 0x35a   : > { %v2014_v50 = vrot.slane %v1555_v62, %v4449_v29  ;;  %v2019_v54 = vrot.slane %v1556_v39, %v4456_v55  ;;  %v1531_v29 = vmul.f32 0.0078125, %v4407_v16  ;;  %v1965_v55 = vrot.slane %v1545_v20, %v4509_v6 }
 0x35b   : > { %v1483_v21 = vpop.xlane.xlu0 %1482  ;;  %v1485_v37 = vpop.xlane.xlu1 %1484  ;;  %v1961_v18 = vsel %vm1790_vm14, %v1960_v23, %v1956_v3  ;;  %v1975_v62 = vrot.slane %v1547_v1, %v4524_v28  ;;  %v1549_v39 = vmul.f32 0.0078125, %v4552_v4  ;;  %v1906_v20 = vrot.slane %v1533_v22, %v4559_v34 }
 0x35c   : > { %v2015_v11 = vsel %vm1755_vm9, %v2014_v50, %v2010_v35  ;;  %v1557_v30 = vmul.f32 0.0078125, %v1483_v21  ;;  %v1558_v51 = vmul.f32 0.0078125, %v1485_v37  ;;  %v1896_v60 = vrot.slane %v1531_v29, %v4524_v28  ;;  %v5747_v50 = vld [vmem:[#allocation80_spill] sm:$0xff] }
 0x35d   : > { %v2020_v5 = vsel %vm1762_vm10, %v2019_v54, %v2015_v11  ;;  %v1966_v48 = vsel %vm1797_vm15, %v1965_v55, %v1961_v18  ;;  %v1534_v4 = vmul.f32 0.0078125, %v5747_v50  ;;  %v1550_v35 = vmul.f32 0.0078125, %v4554_v13 }
 0x35e   : > { %v2024_v63 = vrot.slane %v1557_v30, %v4459_v32  ;;  %v2029_v16 = vrot.slane %v1558_v51, %v4477_v27  ;;  %v1532_v32 = vmul.f32 0.0078125, %v4409_v41  ;;  %v1970_v27 = vrot.slane %v1546_v15, %v4516_v8 }
 0x35f   : > { %v1487_v38 = vpop.xlane.xlu0 %1486  ;;  %v1489_v10 = vpop.xlane.xlu1 %1488  ;;  %v1897_v2 = vsel %vm1811_vm1, %v1896_v60, %v1892_v31  ;;  %v1985_v37 = vrot.slane %v1549_v39, %v4559_v34  ;;  %v1990_v25 = vrot.slane %v1550_v35, %v4563_v26  ;;  %vm2075_vm7 = vcmask 1043459   ;;  %v5748_v39 = vld [vmem:[#allocation6_spill] sm:$0xff]  ;;  %v5753_v35 = vld [vmem:[#allocation11_spill] sm:$0xff] }
 0x360   : > { %v2025_v12 = vsel %vm1769_vm11, %v2024_v63, %v2020_v5  ;;  %v1559_v7 = vmul.f32 0.0078125, %v1487_v38  ;;  %v1560_v17 = vmul.f32 0.0078125, %v1489_v10  ;;  %v1971_v42 = vsel %vm1804_vm0, %v1970_v27, %v1966_v48 }
 0x361   : > { %v2030_v0 = vsel %vm1776_vm12, %v2029_v16, %v2025_v12  ;;  %v1976_v21 = vsel %vm1811_vm1, %v1975_v62, %v1971_v42  ;;  %v1831_v63 = vrot.slane %v4620_v19, %v4563_v26  ;;  %v3660_v27 = vmov 20  }
 0x362   : > { %v2034_v49 = vrot.slane %v1559_v7, %v4483_v58  ;;  %v2039_v41 = vrot.slane %v1560_v17, %v4491_v40  ;;  %v1901_v58 = vrot.slane %v1532_v32, %v4535_v43  ;;  %v1980_v40 = vrot.slane %v1548_v56, %v4535_v43  ;;  %3575 = vset.pattern.permute.xlu0 %v3660_v27 }
 0x363   : > { %v1491_v47 = vpop.xlane.xlu0 %1490  ;;  %v1493_v57 = vpop.xlane.xlu1 %1492  ;;  %3574 = vset.pattern.permute.xlu1 %v3660_v27  ;;  %v5764_v27 = vld [vmem:[#allocation48_spill] sm:$0xff] }
 0x364   : > { %v2035_v59 = vsel %vm1783_vm13, %v2034_v49, %v2030_v0  ;;  %v1561_v36 = vmul.f32 0.0078125, %v1491_v47  ;;  %v1562_v61 = vmul.f32 0.0078125, %v1493_v57  ;;  %v1902_v13 = vsel %vm1818_vm2, %v1901_v58, %v1897_v2 }
 0x365   : > { %v2040_v14 = vsel %vm1790_vm14, %v2039_v41, %v2035_v59  ;;  %v1907_v3 = vsel %vm1825_vm3, %v1906_v20, %v1902_v13  ;;  %v1981_v55 = vsel %vm1818_vm2, %v1980_v40, %v1976_v21  ;;  %v5749_v41 = vsub.s32 1, %v5746_v9 }
 0x366   : > { %v2044_v54 = vrot.slane %v1561_v36, %v4509_v6  ;;  %v2049_v11 = vrot.slane %v1562_v61, %v4516_v8  ;;  %v1819_v6 = vsel %vm1818_vm2, %v1817_v46, %v4578_v53  ;;  %v1911_v8 = vrot.slane %v1534_v4, %v4563_v26  ;;  %v5752_v4 = vld [vmem:[#allocation9_spill] sm:$0xff] }
 0x367   : > { %v1495_v30 = vpop.xlane.xlu0 %1494  ;;  %v1497_v51 = vpop.xlane.xlu1 %1496  ;;  %v1986_v33 = vsel %vm1825_vm3, %v1985_v37, %v1981_v55  ;;  %v1826_v5 = vsel %vm1825_vm3, %v1824_v45, %v1819_v6  ;;  %v5750_v57 = vsub.s32 2, %v5746_v9  ;;  %v5751_v59 = vsub.s32 3, %v5746_v9  ;;  %v5754_v6 = vld [vmem:[#allocation8_spill] sm:$0xff]  ;;  %v5755_v55 = vld [vmem:[#allocation10_spill] sm:$0xff] }
 0x368   : > { %v2045_v29 = vsel %vm1797_vm15, %v2044_v54, %v2040_v14  ;;  %v1563_v44 = vmul.f32 0.0078125, %v1495_v30  ;;  %v1564_v23 = vmul.f32 0.0078125, %v1497_v51  ;;  %v1912_v24 = vsel %vm1832_vm4, %v1911_v8, %v1907_v3 }
 0x369   : > { %v2050_v46 = vsel %vm1804_vm0, %v2049_v11, %v2045_v29  ;;  %v1991_v12 = vsel %vm1832_vm4, %v1990_v25, %v1986_v33  ;;  %v1833_v7 = vsel %vm1832_vm4, %v1831_v63, %v1826_v5  ;;  %v3661_v21 = vmov 19   ;;  %v5756_v33 = vld [vmem:[#allocation12_spill] sm:$0xff] }
 0x36a   : > { %v2054_v15 = vrot.slane %v1563_v44, %v4524_v28  ;;  %v2059_v53 = vrot.slane %v1564_v23, %v4535_v43  ;;  %v2072_v60 = vsel %vm2071_vm5, %v1912_v24, %v1833_v7  ;;  %v5757_v24 = vld [vmem:[#allocation46_spill] sm:$0xff] }
 0x36b   : > { %v1499_v52 = vpop.xlane.xlu0 %1498  ;;  %v1501_v1 = vpop.xlane.xlu1 %1500  ;;  %v2074_v22 = vsel %vm2073_vm6, %v1991_v12, %v2072_v60 }
 0x36c   : > { %v2055_v16 = vsel %vm1811_vm1, %v2054_v15, %v2050_v46  ;;  %v1565_v38 = vmul.f32 0.0078125, %v1499_v52  ;;  %v1566_v10 = vmul.f32 0.0078125, %v1501_v1 }
 0x36d   : > { %v2060_v43 = vsel %vm1818_vm2, %v2059_v53, %v2055_v16 }
 0x36e   : > { %v2064_v28 = vrot.slane %v1565_v38, %v4559_v34  ;;  %v2069_v19 = vrot.slane %v1566_v10, %v4563_v26 }
 0x36f   : > { %v2081_v48 = vpop.permute.xlu1 %2080 }
 0x370   : > { %v2065_v17 = vsel %vm1825_vm3, %v2064_v28, %v2060_v43  ;;  %v5758_v28 = vld [vmem:[#allocation45_spill] sm:$0xff]  ;;  %v5759_v43 = vld [vmem:[#allocation62_spill] sm:$0xff] }
 0x371   : > { %v2070_v32 = vsel %vm1832_vm4, %v2069_v19, %v2065_v17  ;;  %v1588_v19 = vadd.f32 %v5758_v28, %v5757_v24  ;;  %v5760_v17 = vld [vmem:[#allocation61_spill] sm:$0xff] }
 0x372   : > { %v2076_v34 = vsel %vm2075_vm7, %v2070_v32, %v2074_v22  ;;  %v1609_v60 = vadd.f32 %v5760_v17, %v5759_v43  ;;  %v5761_v22 = vld [vmem:[#allocation13_spill] sm:$0xff]  ;;  %v5799_v17 = vld [vmem:[#allocation72_spill] sm:$0xff] }
 0x373   : > { %v1657_v26 = vpop.permute.xlu0 %1656  ;;  %v4706_v61 = vpop.permute.xlu1 %2088 }
 0x374   : > { %v2078_v18 = vmul.f32 %v2076_v34, %v1657_v26  ;;  %v5762_v26 = vld [vmem:[#allocation30_spill] sm:$0xff] }
 0x376   : > { %v2083_v56 = vadd.f32 %v2081_v48, %v2078_v18  ;;  %v5763_v18 = vld [vmem:[#allocation29_spill] sm:$0xff] }
 0x377   : > { %v1567_v48 = vadd.f32 %v5763_v18, %v5762_v26 }
 0x378   : > { %vm2084_vm8 = vcmp.ge.f32.partialorder %v2083_v56, 0.0  ;;  %v2085_v49 = vmul.f32 0.01, %v2083_v56  ;;  %v4708_v2 = vpop.permute.xlu1 %2101 }
 0x37a   : > { %v2086_v62 = vsel %vm2084_vm8, %v2083_v56, %v2085_v49  ;;  %v1589_v56 = vadd.f32 %v1588_v19, %v5764_v27 }
 0x37b   : > { %v2111_v0 = vrot.slane %v2086_v62, %v5748_v39  ;;  %v2178_v47 = vrot.slane %v2086_v62, %v5749_v41  ;;  %v2245_v31 = vrot.slane %v2086_v62, %v5750_v57  ;;  %v2312_v36 = vrot.slane %v2086_v62, %v5751_v59 }
 0x37d   : > { %2133 = vbcast.lane.b32.xlu0 %v2111_v0, 296  ;;  %2113 = vbcast.lane.b32.xlu1 %v2111_v0, 256 }
 0x381   : > { %2141 = vbcast.lane.b32.xlu0 %v2111_v0, 312  ;;  %2117 = vbcast.lane.b32.xlu1 %v2111_v0, 264 }
 0x385   : > { %2149 = vbcast.lane.b32.xlu0 %v2111_v0, 328  ;;  %2121 = vbcast.lane.b32.xlu1 %v2111_v0, 272 }
 0x389   : > { %2157 = vbcast.lane.b32.xlu0 %v2111_v0, 344  ;;  %2125 = vbcast.lane.b32.xlu1 %v2111_v0, 280 }
 0x38d   : > { %2165 = vbcast.lane.b32.xlu0 %v2111_v0, 360  ;;  %2129 = vbcast.lane.b32.xlu1 %v2111_v0, 288 }
 0x391   : > { %2173 = vbcast.lane.b32.xlu0 %v2111_v0, 376  ;;  %2137 = vbcast.lane.b32.xlu1 %v2111_v0, 304 }
 0x395   : > { %2184 = vbcast.lane.b32.xlu0 %v2178_v47, 264  ;;  %2145 = vbcast.lane.b32.xlu1 %v2111_v0, 320 }
 0x399   : > { %2192 = vbcast.lane.b32.xlu0 %v2178_v47, 280  ;;  %2153 = vbcast.lane.b32.xlu1 %v2111_v0, 336 }
 0x39d   : > { %2200 = vbcast.lane.b32.xlu0 %v2178_v47, 296  ;;  %2161 = vbcast.lane.b32.xlu1 %v2111_v0, 352 }
 0x3a1   : > { %2208 = vbcast.lane.b32.xlu0 %v2178_v47, 312  ;;  %2169 = vbcast.lane.b32.xlu1 %v2111_v0, 368  ;;  %v5765_v0 = vld [vmem:[#allocation64_spill] sm:$0xff] }
 0x3a2   : > { %v1610_v41 = vadd.f32 %v1609_v60, %v5765_v0  ;;  %v5797_v0 = vld [vmem:[#allocation75_spill] sm:$0xff] }
 0x3a5   : > { %2216 = vbcast.lane.b32.xlu0 %v2178_v47, 328  ;;  %2180 = vbcast.lane.b32.xlu1 %v2178_v47, 256 }
 0x3a9   : > { %2224 = vbcast.lane.b32.xlu0 %v2178_v47, 344  ;;  %2188 = vbcast.lane.b32.xlu1 %v2178_v47, 272 }
 0x3ad   : > { %2232 = vbcast.lane.b32.xlu0 %v2178_v47, 360  ;;  %2196 = vbcast.lane.b32.xlu1 %v2178_v47, 288 }
 0x3b1   : > { %2240 = vbcast.lane.b32.xlu0 %v2178_v47, 376  ;;  %2204 = vbcast.lane.b32.xlu1 %v2178_v47, 304 }
 0x3b5   : > { %2251 = vbcast.lane.b32.xlu0 %v2245_v31, 264  ;;  %2212 = vbcast.lane.b32.xlu1 %v2178_v47, 320 }
 0x3b9   : > { %2259 = vbcast.lane.b32.xlu0 %v2245_v31, 280  ;;  %2220 = vbcast.lane.b32.xlu1 %v2178_v47, 336 }
 0x3bd   : > { %2267 = vbcast.lane.b32.xlu0 %v2245_v31, 296  ;;  %2228 = vbcast.lane.b32.xlu1 %v2178_v47, 352 }
 0x3c1   : > { %2275 = vbcast.lane.b32.xlu0 %v2245_v31, 312  ;;  %2236 = vbcast.lane.b32.xlu1 %v2178_v47, 368 }
 0x3c5   : > { %2283 = vbcast.lane.b32.xlu0 %v2245_v31, 328  ;;  %2247 = vbcast.lane.b32.xlu1 %v2245_v31, 256 }
 0x3c9   : > { %2291 = vbcast.lane.b32.xlu0 %v2245_v31, 344  ;;  %2255 = vbcast.lane.b32.xlu1 %v2245_v31, 272 }
 0x3cd   : > { %2299 = vbcast.lane.b32.xlu0 %v2245_v31, 360  ;;  %2263 = vbcast.lane.b32.xlu1 %v2245_v31, 288 }
 0x3d1   : > { %2307 = vbcast.lane.b32.xlu0 %v2245_v31, 376  ;;  %2271 = vbcast.lane.b32.xlu1 %v2245_v31, 304 }
 0x3d5   : > { %2318 = vbcast.lane.b32.xlu0 %v2312_v36, 264  ;;  %2279 = vbcast.lane.b32.xlu1 %v2245_v31, 320 }
 0x3d9   : > { %2326 = vbcast.lane.b32.xlu0 %v2312_v36, 280  ;;  %2287 = vbcast.lane.b32.xlu1 %v2245_v31, 336 }
 0x3dd   : > { %2334 = vbcast.lane.b32.xlu0 %v2312_v36, 296  ;;  %2295 = vbcast.lane.b32.xlu1 %v2245_v31, 352 }
 0x3e1   : > { %2342 = vbcast.lane.b32.xlu0 %v2312_v36, 312  ;;  %2303 = vbcast.lane.b32.xlu1 %v2245_v31, 368  ;;  %v5766_v31 = vld [vmem:[#allocation31_spill] sm:$0xff] }
 0x3e2   : > { %v1568_v59 = vadd.f32 %v1567_v48, %v5766_v31  ;;  %v5780_v48 = vld [vmem:[#allocation28_spill] sm:$0xff] }
 0x3e5   : > { %2350 = vbcast.lane.b32.xlu0 %v2312_v36, 328  ;;  %2314 = vbcast.lane.b32.xlu1 %v2312_v36, 256 }
 0x3e9   : > { %2358 = vbcast.lane.b32.xlu0 %v2312_v36, 344  ;;  %2322 = vbcast.lane.b32.xlu1 %v2312_v36, 272 }
 0x3ed   : > { %2366 = vbcast.lane.b32.xlu0 %v2312_v36, 360  ;;  %2330 = vbcast.lane.b32.xlu1 %v2312_v36, 288 }
 0x3ef   : > { %v2134_v9 = vpop.permute.xlu0 %2133  ;;  %v2114_v58 = vpop.permute.xlu1 %2113 }
 0x3f0   : > { %v2376_v54 = vmul.f32 %v2114_v58, %v5753_v35  ;;  %v2381_v45 = vmul.f32 %v2134_v9, %v5753_v35  ;;  %v5768_v9 = vld [vmem:[#allocation17_spill] sm:$0xff] }
 0x3f1   : > { %2374 = vbcast.lane.b32.xlu0 %v2312_v36, 376  ;;  %2338 = vbcast.lane.b32.xlu1 %v2312_v36, 304 }
 0x3f3   : > { %v2142_v20 = vpop.permute.xlu0 %2141  ;;  %v2118_v50 = vpop.permute.xlu1 %2117 }
 0x3f4   : > { %v2383_v23 = vmul.f32 %v2142_v20, %v5753_v35  ;;  %v2377_v52 = vmul.f32 %v2118_v50, %v5753_v35  ;;  %v5769_v20 = vld [vmem:[#allocation47_spill] sm:$0xff] }
 0x3f5   : > { %2478 = vperm.xlu0 %3575, %v5752_v4   ;;  %2346 = vbcast.lane.b32.xlu1 %v2312_v36, 320  ;;  %v1590_v50 = vadd.f32 %v1589_v56, %v5769_v20  ;;  %v5781_v56 = vld [vmem:[#allocation52_spill] sm:$0xff] }
 0x3f7   : > { %v2150_v42 = vpop.permute.xlu0 %2149  ;;  %v2122_v40 = vpop.permute.xlu1 %2121 }
 0x3f8   : > { %v2385_v3 = vmul.f32 %v2150_v42, %v5753_v35  ;;  %v2378_v38 = vmul.f32 %v2122_v40, %v5753_v35  ;;  %v5770_v40 = vld [vmem:[#allocation63_spill] sm:$0xff] }
 0x3f9   : > { %3576 = vset.pattern.permute.xlu0 %v3661_v21  ;;  %2354 = vbcast.lane.b32.xlu1 %v2312_v36, 336 }
 0x3fa   : > { %2507 = vperm.xlu0 %3576, %v2376_v54   ;;  %v1611_v54 = vadd.f32 %v1610_v41, %v5770_v40  ;;  %v5795_v40 = vld [vmem:[#allocation14_spill] sm:$0xff] }
 0x3fb   : > { %v2158_v37 = vpop.permute.xlu0 %2157  ;;  %v2126_v14 = vpop.permute.xlu1 %2125 }
 0x3fc   : > { %v2379_v11 = vmul.f32 %v2126_v14, %v5753_v35  ;;  %v2387_v63 = vmul.f32 %v2158_v37, %v5753_v35  ;;  %v5771_v14 = vld [vmem:[#allocation32_spill] sm:$0xff] }
 0x3fd   : > { %2362 = vbcast.lane.b32.xlu1 %v2312_v36, 352 }
 0x3fe   : > { %2522 = vperm.xlu0 %3576, %v2379_v11   ;;  %v1569_v11 = vadd.f32 %v1568_v59, %v5771_v14  ;;  %v5782_v59 = vld [vmem:[#allocation68_spill] sm:$0xff] }
 0x3ff   : > { %v2166_v30 = vpop.permute.xlu0 %2165  ;;  %v2130_v51 = vpop.permute.xlu1 %2129 }
 0x400   : > { %v2389_v1 = vmul.f32 %v2166_v30, %v5753_v35  ;;  %v2380_v32 = vmul.f32 %v2130_v51, %v5753_v35  ;;  %v5772_v30 = vld [vmem:[#allocation26_spill] sm:$0xff] }
 0x401   : > { %2370 = vbcast.lane.b32.xlu1 %v2312_v36, 368  ;;  %v5767_v36 = vld [vmem:[#allocation24_spill] sm:$0xff] }
 0x402   : > { %2532 = vperm.xlu0 %3576, %v2381_v45   ;;  %v1630_v58 = vadd.f32 %v5768_v9, %v5767_v36  ;;  %v5773_v45 = vld [vmem:[#allocation50_spill] sm:$0xff]  ;;  %v5813_v9 = vld [vmem:[#allocation77_spill] sm:$0xff] }
 0x403   : > { %v2174_v29 = vpop.permute.xlu0 %2173  ;;  %v2138_v44 = vpop.permute.xlu1 %2137 }
 0x404   : > { %v2391_v10 = vmul.f32 %v2174_v29, %v5753_v35  ;;  %v2382_v47 = vmul.f32 %v2138_v44, %v5753_v35  ;;  %v1631_v51 = vadd.f32 %v1630_v58, %v5772_v30  ;;  %v1591_v29 = vadd.f32 %v1590_v50, %v5773_v45 }
 0x405   : > { %2470 = vperm.xlu1 %3574, %v5754_v6   ;;  %v5774_v6 = vld [vmem:[#allocation66_spill] sm:$0xff] }
 0x406   : > { %2542 = vperm.xlu0 %3576, %v2383_v23  }
 0x407   : > { %v2185_v13 = vpop.permute.xlu0 %2184  ;;  %v2146_v8 = vpop.permute.xlu1 %2145 }
 0x408   : > { %v2393_v34 = vmul.f32 %v2185_v13, %v5761_v22  ;;  %v1612_v13 = vadd.f32 %v1611_v54, %v5774_v6 }
 0x409   : > { %2486 = vperm.xlu1 %3574, %v5755_v55  }
 0x40a   : > { %2552 = vperm.xlu0 %3576, %v2385_v3  }
 0x40b   : > { %v2193_v25 = vpop.permute.xlu0 %2192  ;;  %v2154_v15 = vpop.permute.xlu1 %2153 }
 0x40c   : > { %v2395_v57 = vmul.f32 %v2193_v25, %v5761_v22  ;;  %v2386_v3 = vmul.f32 %v2154_v15, %v5753_v35  ;;  %v5775_v25 = vld [vmem:[#allocation33_spill] sm:$0xff] }
 0x40d   : > { %2494 = vperm.xlu1 %3574, %v5756_v33  }
 0x40e   : > { %2562 = vperm.xlu0 %3576, %v2387_v63   ;;  %v5776_v63 = vld [vmem:[#allocation18_spill] sm:$0xff] }
 0x40f   : > { %v2201_v46 = vpop.permute.xlu0 %2200  ;;  %v2162_v53 = vpop.permute.xlu1 %2161  ;;  %v1632_v33 = vadd.f32 %v1631_v51, %v5776_v63  ;;  %v5809_v63 = vld [vmem:[#allocation25_spill] sm:$0xff] }
 0x410   : > { %v2397_v37 = vmul.f32 %v2201_v46, %v5761_v22  ;;  %v5777_v46 = vld [vmem:[#allocation49_spill] sm:$0xff]  ;;  %v2388_v60 = vmul.f32 %v2162_v53, %v5753_v35 }
 0x411   : > { %3577 = vset.pattern.permute.xlu1 %v3661_v21  ;;  %v2384_v21 = vmul.f32 %v2146_v8, %v5753_v35  ;;  %v1570_v8 = vadd.f32 %v1569_v11, %v5775_v25  ;;  %v5785_v11 = vld [vmem:[#allocation51_spill] sm:$0xff] }
 0x412   : > { %2512 = vperm.xlu1 %3577, %v2377_v52   ;;  %2572 = vperm.xlu0 %3576, %v2389_v1   ;;  %v1592_v52 = vadd.f32 %v1591_v29, %v5777_v46 }
 0x413   : > { %v2209_v5 = vpop.permute.xlu0 %2208  ;;  %v2170_v16 = vpop.permute.xlu1 %2169 }
 0x414   : > { %v2399_v55 = vmul.f32 %v2209_v5, %v5761_v22  ;;  %v1633_v5 = vadd.f32 %v1632_v33, %v5780_v48  ;;  %v1593_v41 = vadd.f32 %v1592_v52, %v5781_v56  ;;  %v2390_v50 = vmul.f32 %v2170_v16, %v5753_v35  ;;  %v5787_v52 = vld [vmem:[#allocation36_spill] sm:$0xff] }
 0x416   : > { %2517 = vperm.xlu1 %3577, %v2378_v38   ;;  %2582 = vperm.xlu0 %3576, %v2391_v10   ;;  %v5778_v10 = vld [vmem:[#allocation65_spill] sm:$0xff]  ;;  %v1594_v51 = vadd.f32 %v1593_v41, %v5785_v11 }
 0x417   : > { %v2217_v12 = vpop.permute.xlu0 %2216  ;;  %v2181_v7 = vpop.permute.xlu1 %2180  ;;  %v1613_v19 = vadd.f32 %v1612_v13, %v5778_v10  ;;  %v5794_v10 = vld [vmem:[#allocation69_spill] sm:$0xff] }
 0x419   : > { %v1614_v58 = vadd.f32 %v1613_v19, %v5782_v59  ;;  %v5788_v19 = vld [vmem:[#allocation74_spill] sm:$0xff]  ;;  %v5792_v59 = vld [vmem:[#allocation21_spill] sm:$0xff] }
 0x41a   : > { %2592 = vperm.xlu0 %3576, %v2393_v34   ;;  %2527 = vperm.xlu1 %3577, %v2380_v32   ;;  %v2401_v32 = vmul.f32 %v2217_v12, %v5761_v22  ;;  %v5779_v34 = vld [vmem:[#allocation34_spill] sm:$0xff] }
 0x41b   : > { %v2225_v49 = vpop.permute.xlu0 %2224  ;;  %v2189_v62 = vpop.permute.xlu1 %2188  ;;  %v1571_v15 = vadd.f32 %v1570_v8, %v5779_v34  ;;  %v2392_v8 = vmul.f32 %v2181_v7, %v5761_v22 }
 0x41c   : > { %v2403_v54 = vmul.f32 %v2225_v49, %v5761_v22 }
 0x41e   : > { %2602 = vperm.xlu0 %3576, %v2395_v57   ;;  %2537 = vperm.xlu1 %3577, %v2382_v47  }
 0x41f   : > { %v2233_v4 = vpop.permute.xlu0 %2232  ;;  %v2197_v42 = vpop.permute.xlu1 %2196 }
 0x420   : > { %v2405_v33 = vmul.f32 %v2233_v4, %v5761_v22  ;;  %v2396_v6 = vmul.f32 %v2197_v42, %v5761_v22 }
 0x422   : > { %2612 = vperm.xlu0 %3576, %v2397_v37   ;;  %2547 = vperm.xlu1 %3577, %v2384_v21   ;;  %v5783_v21 = vld [vmem:[#allocation35_spill] sm:$0xff] }
 0x423   : > { %v2241_v44 = vpop.permute.xlu0 %2240  ;;  %v2205_v23 = vpop.permute.xlu1 %2204  ;;  %v1572_v53 = vadd.f32 %v1571_v15, %v5783_v21  ;;  %v5784_v37 = vld [vmem:[#allocation19_spill] sm:$0xff] }
 0x424   : > { %v1634_v12 = vadd.f32 %v1633_v5, %v5784_v37  ;;  %v2398_v43 = vmul.f32 %v2205_v23, %v5761_v22  ;;  %v5805_v37 = vld [vmem:[#allocation76_spill] sm:$0xff] }
 0x425   : > { %v1573_v16 = vadd.f32 %v1572_v53, %v5787_v52  ;;  %v5793_v53 = vld [vmem:[#allocation53_spill] sm:$0xff] }
 0x426   : > { %2622 = vperm.xlu0 %3576, %v2399_v55   ;;  %2557 = vperm.xlu1 %3577, %v2386_v3   ;;  %v5786_v3 = vld [vmem:[#allocation67_spill] sm:$0xff]  ;;  %v1635_v49 = vadd.f32 %v1634_v12, %v5788_v19 }
 0x427   : > { %v2252_v1 = vpop.permute.xlu0 %2251  ;;  %v2213_v38 = vpop.permute.xlu1 %2212  ;;  %v1615_v55 = vadd.f32 %v1614_v58, %v5786_v3  ;;  %v2407_v58 = vmul.f32 %v2241_v44, %v5761_v22  ;;  %v5791_v3 = vld [vmem:[#allocation37_spill] sm:$0xff] }
 0x428   : > { %v1574_v7 = vadd.f32 %v1573_v16, %v5791_v3  ;;  %v1636_v4 = vadd.f32 %v1635_v49, %v5792_v59  ;;  %v5798_v16 = vld [vmem:[#allocation56_spill] sm:$0xff]  ;;  %v5801_v59 = vld [vmem:[#allocation23_spill] sm:$0xff]  ;;  %v2400_v19 = vmul.f32 %v2213_v38, %v5761_v22 }
 0x42a   : > { %2632 = vperm.xlu0 %3576, %v2401_v32   ;;  %2567 = vperm.xlu1 %3577, %v2388_v60   ;;  %v5789_v60 = vld [vmem:[#allocation54_spill] sm:$0xff]  ;;  %v1637_v44 = vadd.f32 %v1636_v4, %v5797_v0  ;;  %v5803_v0 = vld [vmem:[#allocation71_spill] sm:$0xff] }
 0x42b   : > { %v2260_v47 = vpop.permute.xlu0 %2259  ;;  %v2221_v57 = vpop.permute.xlu1 %2220  ;;  %v1595_v32 = vadd.f32 %v1594_v51, %v5789_v60 }
 0x42c   : > { %v2402_v48 = vmul.f32 %v2221_v57, %v5761_v22 }
 0x42d   : > { %v1596_v12 = vadd.f32 %v1595_v32, %v5793_v53 }
 0x42e   : > { %2642 = vperm.xlu0 %3576, %v2403_v54   ;;  %2577 = vperm.xlu1 %3577, %v2390_v50   ;;  %v5790_v50 = vld [vmem:[#allocation70_spill] sm:$0xff]  ;;  %v2394_v54 = vmul.f32 %v2189_v62, %v5761_v22 }
 0x42f   : > { %v2268_v29 = vpop.permute.xlu0 %2267  ;;  %v2229_v13 = vpop.permute.xlu1 %2228  ;;  %v1616_v41 = vadd.f32 %v1615_v55, %v5790_v50  ;;  %v2409_v55 = vmul.f32 %v2252_v1, %v5795_v40  ;;  %v5796_v50 = vld [vmem:[#allocation38_spill] sm:$0xff]  ;;  %v1597_v49 = vadd.f32 %v1596_v12, %v5798_v16  ;;  %v1638_v1 = vadd.f32 %v1637_v44, %v5801_v59  ;;  %v5807_v59 = vld [vmem:[#allocation73_spill] sm:$0xff] }
 0x430   : > { %v1575_v62 = vadd.f32 %v1574_v7, %v5796_v50  ;;  %v5802_v7 = vld [vmem:[#allocation55_spill] sm:$0xff]  ;;  %v2404_v30 = vmul.f32 %v2229_v13, %v5761_v22 }
 0x431   : > { %v1617_v51 = vadd.f32 %v1616_v41, %v5794_v10  ;;  %v2411_v41 = vmul.f32 %v2260_v47, %v5795_v40  ;;  %v5800_v10 = vld [vmem:[#allocation39_spill] sm:$0xff]  ;;  %v1598_v4 = vadd.f32 %v1597_v49, %v5802_v7  ;;  %v1639_v47 = vadd.f32 %v1638_v1, %v5805_v37  ;;  %v5811_v37 = vld [vmem:[#allocation20_spill] sm:$0xff] }
 0x432   : > { %2652 = vperm.xlu0 %3576, %v2405_v33   ;;  %2587 = vperm.xlu1 %3577, %v2392_v8   ;;  %v1576_v42 = vadd.f32 %v1575_v62, %v5800_v10  ;;  %v5806_v62 = vld [vmem:[#allocation58_spill] sm:$0xff] }
 0x433   : > { %v2276_v15 = vpop.permute.xlu0 %2275  ;;  %v2237_v5 = vpop.permute.xlu1 %2236  ;;  %v1618_v32 = vadd.f32 %v1617_v51, %v5799_v17  ;;  %v2413_v51 = vmul.f32 %v2268_v29, %v5795_v40  ;;  %v5804_v17 = vld [vmem:[#allocation40_spill] sm:$0xff]  ;;  %v1599_v44 = vadd.f32 %v1598_v4, %v5806_v62  ;;  %v1640_v29 = vadd.f32 %v1639_v47, %v5809_v63 }
 0x434   : > { %v1577_v23 = vadd.f32 %v1576_v42, %v5804_v17  ;;  %v5810_v42 = vld [vmem:[#allocation57_spill] sm:$0xff] }
 0x435   : > { %v1619_v12 = vadd.f32 %v1618_v32, %v5803_v0  ;;  %v2415_v32 = vmul.f32 %v2276_v15, %v5795_v40  ;;  %v5808_v0 = vld [vmem:[#allocation41_spill] sm:$0xff]  ;;  %v1600_v1 = vadd.f32 %v1599_v44, %v5810_v42  ;;  %v1641_v15 = vadd.f32 %v1640_v29, %v5813_v9 }
 0x436   : > { %2662 = vperm.xlu0 %3576, %v2407_v58   ;;  %2597 = vperm.xlu1 %3577, %v2394_v54   ;;  %v1578_v38 = vadd.f32 %v1577_v23, %v5808_v0  ;;  %v5814_v23 = vld [vmem:[#allocation60_spill] sm:$0xff]  ;;  %v2406_v44 = vmul.f32 %v2237_v5, %v5761_v22  ;;  %v5817_v0 = vld [vmem:[#allocation27_spill] sm:$0xff] }
 0x437   : > { %v2284_v33 = vpop.permute.xlu0 %2283  ;;  %v2248_v8 = vpop.permute.xlu1 %2247  ;;  %v1620_v49 = vadd.f32 %v1619_v12, %v5807_v59  ;;  %v5812_v59 = vld [vmem:[#allocation42_spill] sm:$0xff]  ;;  %v1601_v47 = vadd.f32 %v1600_v1, %v5814_v23 }
 0x438   : > { %v2417_v12 = vmul.f32 %v2284_v33, %v5795_v40  ;;  %v1579_v57 = vadd.f32 %v1578_v38, %v5812_v59  ;;  %v1642_v33 = vadd.f32 %v1641_v15, %v5817_v0  ;;  %v5818_v38 = vld [vmem:[#allocation59_spill] sm:$0xff]  ;;  %v2408_v1 = vmul.f32 %v2248_v8, %v5795_v40 }
 0x439   : > { %v1621_v4 = vadd.f32 %v1620_v49, %v5811_v37  ;;  %v5816_v37 = vld [vmem:[#allocation43_spill] sm:$0xff]  ;;  %v1602_v29 = vadd.f32 %v1601_v47, %v5818_v38 }
 0x43a   : > { %2672 = vperm.xlu0 %3576, %v2409_v55   ;;  %2607 = vperm.xlu1 %3577, %v2396_v6   ;;  %v1580_v13 = vadd.f32 %v1579_v57, %v5816_v37  ;;  %v5821_v59 = vld [vmem:[#allocation79_spill] sm:$0xff] }
 0x43b   : > { %v2292_v58 = vpop.permute.xlu0 %2291  ;;  %v2256_v54 = vpop.permute.xlu1 %2255  ;;  %v1603_v57 = vrot.slane %v1602_v29, 4 }
 0x43c   : > { %v2419_v36 = vmul.f32 %v2292_v58, %v5795_v40  ;;  %v1643_v58 = vadd.f32 %v1642_v33, %v5821_v59  ;;  %v5823_v59 = vld [vmem:[#allocation15_spill] sm:$0xff] }
 0x43d   : > { %v1604_v8 = vadd.f32 %v1603_v57, %v1602_v29 }
 0x43e   : > { %2682 = vperm.xlu0 %3576, %v2411_v41   ;;  %2617 = vperm.xlu1 %3577, %v2398_v43  }
 0x43f   : > { %v2300_v55 = vpop.permute.xlu0 %2299  ;;  %v2264_v6 = vpop.permute.xlu1 %2263 }
 0x440   : > { %v2412_v33 = vmul.f32 %v2264_v6, %v5795_v40 }
 0x442   : > { %2692 = vperm.xlu0 %3576, %v2413_v51   ;;  %2627 = vperm.xlu1 %3577, %v2400_v19  }
 0x443   : > { %v2308_v41 = vpop.permute.xlu0 %2307  ;;  %v2272_v43 = vpop.permute.xlu1 %2271 }
 0x444   : > { %v2423_v47 = vmul.f32 %v2308_v41, %v5795_v40  ;;  %v2414_v41 = vmul.f32 %v2272_v43, %v5795_v40 }
 0x446   : > { %2702 = vperm.xlu0 %3576, %v2415_v32   ;;  %2637 = vperm.xlu1 %3577, %v2402_v48   ;;  %v5815_v48 = vld [vmem:[#allocation22_spill] sm:$0xff] }
 0x447   : > { %v2319_v51 = vpop.permute.xlu0 %2318  ;;  %v2280_v19 = vpop.permute.xlu1 %2279  ;;  %v1622_v63 = vadd.f32 %v1621_v4, %v5815_v48  ;;  %v2421_v4 = vmul.f32 %v2300_v55, %v5795_v40  ;;  %v5820_v48 = vld [vmem:[#allocation44_spill] sm:$0xff] }
 0x448   : > { %v1581_v5 = vadd.f32 %v1580_v13, %v5820_v48 }
 0x44a   : > { %2712 = vperm.xlu0 %3576, %v2417_v12   ;;  %2647 = vperm.xlu1 %3577, %v2404_v30   ;;  %v5819_v30 = vld [vmem:[#allocation16_spill] sm:$0xff]  ;;  %v1582_v0 = vrot.slane %v1581_v5, 4 }
 0x44b   : > { %v2288_v32 = vpop.permute.xlu1 %2287  ;;  %v2327_v49 = vpop.permute.xlu0 %2326  ;;  %v1623_v9 = vadd.f32 %v1622_v63, %v5819_v30  ;;  %v5822_v63 = vld [vmem:[#allocation78_spill] sm:$0xff] }
 0x44c   : > { %v1644_v30 = vadd.f32 %v1643_v58, %v5822_v63  ;;  %v1583_v48 = vadd.f32 %v1582_v0, %v1581_v5  ;;  %v2427_v58 = vmul.f32 %v2327_v49, %v5823_v59  ;;  %v2418_v49 = vmul.f32 %v2288_v32, %v5795_v40 }
 0x44e   : > { %2722 = vperm.xlu0 %3576, %v2419_v36   ;;  %2657 = vperm.xlu1 %3577, %v2406_v44   ;;  %v1624_v36 = vrot.slane %v1623_v9, 4  ;;  %v2410_v44 = vmul.f32 %v2256_v54, %v5795_v40  ;;  %v1645_v37 = vrot.slane %v1644_v30, 4  ;;  %v1605_v54 = vrot.slane %v1604_v8, 2 }
 0x44f   : > { %v2296_v12 = vpop.permute.xlu1 %2295  ;;  %v2335_v17 = vpop.permute.xlu0 %2334 }
 0x450   : > { %v1625_v13 = vadd.f32 %v1624_v36, %v1623_v9  ;;  %v1646_v29 = vadd.f32 %v1645_v37, %v1644_v30  ;;  %v1606_v9 = vadd.f32 %v1605_v54, %v1604_v8  ;;  %v2429_v0 = vmul.f32 %v2335_v17, %v5823_v59 }
 0x451   : > { %v2420_v17 = vmul.f32 %v2296_v12, %v5795_v40 }
 0x452   : > { %2732 = vperm.xlu0 %3576, %v2421_v4   ;;  %2667 = vperm.xlu1 %3577, %v2408_v1   ;;  %v2425_v4 = vmul.f32 %v2319_v51, %v5823_v59  ;;  %v1626_v10 = vrot.slane %v1625_v13, 2  ;;  %v2416_v51 = vmul.f32 %v2280_v19, %v5795_v40  ;;  %v1647_v36 = vrot.slane %v1646_v29, 2 }
 0x453   : > { %v2304_v15 = vpop.permute.xlu1 %2303  ;;  %v2343_v1 = vpop.permute.xlu0 %2342  ;;  %v1607_v43 = vrot.slane %v1606_v9, 1 }
 0x454   : > { %v1627_v6 = vadd.f32 %v1626_v10, %v1625_v13  ;;  %v2431_v37 = vmul.f32 %v2343_v1, %v5823_v59  ;;  %v2422_v1 = vmul.f32 %v2304_v15, %v5795_v40 }
 0x455   : > { %v1608_v10 = vadd.f32 %v1607_v43, %v1606_v9 }
 0x456   : > { %2742 = vperm.xlu0 %3576, %v2423_v47   ;;  %2677 = vperm.xlu1 %3577, %v2410_v44   ;;  %v1584_v44 = vrot.slane %v1583_v48, 2 }
 0x457   : > { %v2315_v55 = vpop.permute.xlu1 %2314  ;;  %v2351_v57 = vpop.permute.xlu0 %2350  ;;  %v1652_v32 = vmul.f32 0.0078125, %v1608_v10 }
 0x458   : > { %v1585_v5 = vadd.f32 %v1584_v44, %v1583_v48  ;;  %v2433_v48 = vmul.f32 %v2351_v57, %v5823_v59 }
 0x45a   : > { %2752 = vperm.xlu0 %3576, %v2425_v4   ;;  %2687 = vperm.xlu1 %3577, %v2412_v33   ;;  %v1628_v4 = vrot.slane %v1627_v6, 1 }
 0x45b   : > { %v2323_v47 = vpop.permute.xlu1 %2322  ;;  %v2359_v30 = vpop.permute.xlu0 %2358 }
 0x45c   : > { %v1629_v19 = vadd.f32 %v1628_v4, %v1627_v6  ;;  %v2424_v6 = vmul.f32 %v2315_v55, %v5823_v59 }
 0x45e   : > { %2762 = vperm.xlu0 %3576, %v2427_v58   ;;  %2697 = vperm.xlu1 %3577, %v2414_v41   ;;  %v1586_v58 = vrot.slane %v1585_v5, 1  ;;  %v1648_v41 = vadd.f32 %v1647_v36, %v1646_v29  ;;  %v2435_v29 = vmul.f32 %v2359_v30, %v5823_v59 }
 0x45f   : > { %v2331_v33 = vpop.permute.xlu1 %2330  ;;  %v2367_v44 = vpop.permute.xlu0 %2366 }
 0x460   : > { %v1587_v13 = vadd.f32 %v1586_v58, %v1585_v5  ;;  %v1649_v54 = vrot.slane %v1648_v41, 1  ;;  %v2437_v5 = vmul.f32 %v2367_v44, %v5823_v59  ;;  %v2428_v55 = vmul.f32 %v2331_v33, %v5823_v59  ;;  %v5824_v33 = vld [vmem:[#allocation7_spill] sm:$0xff] }
 0x461   : > { %v3663_v44 = vmov 22  }
 0x462   : > { %2772 = vperm.xlu0 %3576, %v2429_v0   ;;  %2707 = vperm.xlu1 %3577, %v2416_v51   ;;  %v1653_v51 = vmul.f32 0.0078125, %v1629_v19  ;;  %v1650_v0 = vadd.f32 %v1649_v54, %v1648_v41  ;;  %v1651_v36 = vmul.f32 0.0078125, %v1587_v13  ;;  %v3662_v13 = vmov 21  }
 0x463   : > { %v2339_v8 = vpop.permute.xlu1 %2338  ;;  %v2375_v43 = vpop.permute.xlu0 %2374 }
 0x464   : > { %v2095_v12 = vsel %vm2071_vm5, %v1652_v32, %v1651_v36  ;;  %v1654_v4 = vmul.f32 0.0078125, %v1650_v0  ;;  %v2439_v30 = vmul.f32 %v2375_v43, %v5823_v59 }
 0x465   : > { %v2096_v57 = vsel %vm2073_vm6, %v1653_v51, %v2095_v12 }
 0x466   : > { %2782 = vperm.xlu0 %3576, %v2431_v37   ;;  %2717 = vperm.xlu1 %3577, %v2418_v49   ;;  %v2097_v15 = vsel %vm2075_vm7, %v1654_v4, %v2096_v57  ;;  %v2426_v37 = vmul.f32 %v2323_v47, %v5823_v59 }
 0x467   : > { %v2347_v9 = vpop.permute.xlu1 %2346  ;;  %v2099_v49 = vmul.f32 %v2097_v15, %v4706_v61  ;;  %v2430_v61 = vmul.f32 %v2339_v8, %v5823_v59 }
 0x469   : > { %v2104_v10 = vadd.f32 %v4708_v2, %v2099_v49  ;;  %v2432_v2 = vmul.f32 %v2347_v9, %v5823_v59 }
 0x46a   : > { %2792 = vperm.xlu0 %3576, %v2433_v48   ;;  %2727 = vperm.xlu1 %3577, %v2420_v17  }
 0x46b   : > { %v2355_v58 = vpop.permute.xlu1 %2354  ;;  %v2106_v17 = vmul.f32 0.01, %v2104_v10  ;;  %vm2105_vm9 = vcmp.ge.f32.partialorder %v2104_v10, 0.0 }
 0x46d   : > { %v2107_v54 = vsel %vm2105_vm9, %v2104_v10, %v2106_v17 }
 0x46e   : > { %2802 = vperm.xlu0 %3576, %v2435_v29   ;;  %2737 = vperm.xlu1 %3577, %v2422_v1   ;;  %v2447_v51 = vrot.slane %v2107_v54, %v5824_v33  ;;  %v2434_v29 = vmul.f32 %v2355_v58, %v5823_v59 }
 0x46f   : > { %v2363_v48 = vpop.permute.xlu1 %2362 }
 0x470   : > { %v4850_v8 = vrot.slane %v2447_v51, %v5824_v33  ;;  %v2436_v57 = vmul.f32 %v2363_v48, %v5823_v59  ;;  %v2448_v17 = vcombine.high %v2447_v51, %v2447_v51 }
 0x472   : > { %2812 = vperm.xlu0 %3576, %v2437_v5   ;;  %2747 = vperm.xlu1 %3577, %v2424_v6  }
 0x473   : > { %v2371_v32 = vpop.permute.xlu1 %2370 }
 0x474   : > { %v2479_v41 = vpop.permute.xlu0 %2478 }
 0x476   : > { %2822 = vperm.xlu0 %3576, %v2439_v30   ;;  %2757 = vperm.xlu1 %3577, %v2426_v37   ;;  %v2438_v37 = vmul.f32 %v2371_v32, %v5823_v59 }
 0x479   : > { %v2508_v19 = vpop.permute.xlu0 %2507 }
 0x47a   : > { %3579 = vset.pattern.permute.xlu0 %v3662_v13  ;;  %2767 = vperm.xlu1 %3577, %v2428_v55  }
 0x47b   : > { %2918 = vperm.xlu0 %3579, %v5761_v22  }
 0x47d   : > { %v2523_v47 = vpop.permute.xlu0 %2522 }
 0x47e   : > { %2777 = vperm.xlu1 %3577, %v2430_v61   ;;  %v2484_v61 = vrot.slane %v2479_v41, %v5748_v39 }
 0x47f   : > { %3580 = vset.pattern.permute.xlu0 %v3663_v44 }
 0x480   : > { %3058 = vperm.xlu0 %3580, %v5753_v35  }
 0x481   : > { %v2533_v1 = vpop.permute.xlu0 %2532 }
 0x482   : > { %2787 = vperm.xlu1 %3577, %v2432_v2  }
 0x484   : > { %v2471_v0 = vpop.permute.xlu1 %2470  ;;  %3070 = vperm.xlu0 %3580, %v5823_v59  }
 0x485   : > { %v2476_v36 = vrot.slane %v2471_v0, %v5748_v39  ;;  %v2543_v12 = vpop.permute.xlu0 %2542 }
 0x486   : > { %2797 = vperm.xlu1 %3577, %v2434_v29  }
 0x487   : > { %v2501_v9 = vmul.f32 %v2476_v36, %v4850_v8 }
 0x488   : > { %v4855_v6 = vpop.permute.xlu1 %2486 }
 0x489   : > { %v2832_v5 = vrot.slane %v2501_v9, %v5748_v39  ;;  %v2553_v43 = vpop.permute.xlu0 %2552 }
 0x48a   : > { %2807 = vperm.xlu1 %3577, %v2436_v57  }
 0x48b   : > { %v4858_v4 = vadd.f32 %v2832_v5, %v2543_v12  ;;  %v4860_v15 = vadd.f32 %v2832_v5, %v2553_v43  ;;  %v4862_v49 = vadd.f32 %v2832_v5, %v2508_v19  ;;  %v4867_v58 = vadd.f32 %v2832_v5, %v2523_v47 }
 0x48c   : > { %v4865_v30 = vpop.permute.xlu1 %2494  ;;  %v4869_v10 = vadd.f32 %v2832_v5, %v2533_v1  ;;  %v4875_v19 = vrot.slane %v2448_v17, %v5824_v33 }
 0x48d   : > { %5825 = vst [vmem:[#allocation5_spill] sm:$0xff] %v4858_v4  ;;  %5826 = vst [vmem:[#allocation80_spill] sm:$0xff] %v4860_v15  ;;  %v2563_v55 = vpop.permute.xlu0 %2562 }
 0x48e   : > { %5827 = vst [vmem:[#allocation6_spill] sm:$0xff] %v4862_v49  ;;  %5828 = vst [vmem:[#allocation9_spill] sm:$0xff] %v4867_v58  ;;  %v4871_v48 = vadd.f32 %v2832_v5, %v2563_v55  ;;  %2817 = vperm.xlu1 %3577, %v2438_v37   ;;  %v2502_v47 = vmul.f32 %v2484_v61, %v4875_v19 }
 0x48f   : > { %5829 = vst [vmem:[#allocation11_spill] sm:$0xff] %v4869_v10 }
 0x490   : > { %5830 = vst [vmem:[#allocation8_spill] sm:$0xff] %v4871_v48  ;;  %v4889_v41 = vrot.slane %v2502_v47, %v5748_v39 }
 0x491   : > { %v2573_v54 = vpop.permute.xlu0 %2572  ;;  %v2513_v2 = vpop.permute.xlu1 %2512 }
 0x492   : > { %v4877_v29 = vadd.f32 %v2832_v5, %v2573_v54  ;;  %v4879_v32 = vadd.f32 %v2832_v5, %v2513_v2  ;;  %3578 = vset.pattern.permute.xlu1 %v3662_v13 }
 0x493   : > { %2914 = vperm.xlu1 %3578, %v5753_v35  }
 0x494   : > { %5831 = vst [vmem:[#allocation10_spill] sm:$0xff] %v4877_v29  ;;  %5832 = vst [vmem:[#allocation12_spill] sm:$0xff] %v4879_v32 }
 0x495   : > { %v2583_v51 = vpop.permute.xlu0 %2582  ;;  %v2518_v1 = vpop.permute.xlu1 %2517 }
 0x496   : > { %v4883_v0 = vadd.f32 %v2832_v5, %v2583_v51  ;;  %v4885_v36 = vadd.f32 %v2832_v5, %v2518_v1 }
 0x497   : > { %2922 = vperm.xlu1 %3578, %v5795_v40  }
 0x498   : > { %5833 = vst [vmem:[#allocation46_spill] sm:$0xff] %v4883_v0  ;;  %5834 = vst [vmem:[#allocation45_spill] sm:$0xff] %v4885_v36 }
 0x499   : > { %v2593_v33 = vpop.permute.xlu0 %2592  ;;  %v2528_v12 = vpop.permute.xlu1 %2527 }
 0x49a   : > { %v4892_v9 = vadd.f32 %v4889_v41, %v2593_v33  ;;  %v4894_v13 = vadd.f32 %v2832_v5, %v2528_v12 }
 0x49b   : > { %2926 = vperm.xlu1 %3578, %v5823_v59  }
 0x49c   : > { %5835 = vst [vmem:[#allocation13_spill] sm:$0xff] %v4894_v13 }
 0x49d   : > { %v2603_v35 = vpop.permute.xlu0 %2602  ;;  %v2538_v57 = vpop.permute.xlu1 %2537 }
 0x49e   : > { %v4898_v43 = vadd.f32 %v4889_v41, %v2603_v35  ;;  %v4900_v37 = vadd.f32 %v2832_v5, %v2538_v57 }
 0x49f   : > { %3581 = vset.pattern.permute.xlu1 %v3663_v44 }
 0x4a0   : > { %5836 = vst [vmem:[#allocation30_spill] sm:$0xff] %v4900_v37  ;;  %3062 = vperm.xlu1 %3581, %v5761_v22  }
 0x4a1   : > { %v2613_v55 = vpop.permute.xlu0 %2612  ;;  %v2548_v17 = vpop.permute.xlu1 %2547 }
 0x4a2   : > { %v4904_v61 = vadd.f32 %v4889_v41, %v2613_v55  ;;  %v4906_v54 = vadd.f32 %v2832_v5, %v2548_v17  ;;  %v2492_v55 = vrot.slane %v4855_v6, %v5748_v39 }
 0x4a4   : > { %5837 = vst [vmem:[#allocation29_spill] sm:$0xff] %v4906_v54  ;;  %3066 = vperm.xlu1 %3581, %v5795_v40  }
 0x4a5   : > { %v2623_v59 = vpop.permute.xlu0 %2622  ;;  %v2558_v2 = vpop.permute.xlu1 %2557 }
 0x4a6   : > { %v4910_v47 = vadd.f32 %v4889_v41, %v2623_v59  ;;  %v4912_v51 = vadd.f32 %v2832_v5, %v2558_v2  ;;  %v2463_v2 = vcombine.high %v4850_v8, %v4850_v8 }
 0x4a8   : > { %5838 = vst [vmem:[#allocation48_spill] sm:$0xff] %v4912_v51  ;;  %v2503_v63 = vmul.f32 %v2492_v55, %v2463_v2 }
 0x4a9   : > { %v2633_v1 = vpop.permute.xlu0 %2632  ;;  %v2568_v44 = vpop.permute.xlu1 %2567 }
 0x4aa   : > { %v4915_v22 = vadd.f32 %v4889_v41, %v2633_v1  ;;  %v4917_v33 = vadd.f32 %v2832_v5, %v2568_v44  ;;  %v2840_v6 = vrot.slane %v2503_v63, %v5748_v39 }
 0x4ac   : > { %5839 = vst [vmem:[#allocation31_spill] sm:$0xff] %v4917_v33 }
 0x4ad   : > { %v2643_v12 = vpop.permute.xlu0 %2642  ;;  %v2578_v35 = vpop.permute.xlu1 %2577 }
 0x4ae   : > { %v4920_v57 = vadd.f32 %v4889_v41, %v2643_v12  ;;  %v4922_v40 = vadd.f32 %v2832_v5, %v2578_v35 }
 0x4b0   : > { %5840 = vst [vmem:[#allocation47_spill] sm:$0xff] %v4922_v40 }
 0x4b1   : > { %v2653_v17 = vpop.permute.xlu0 %2652  ;;  %v2588_v59 = vpop.permute.xlu1 %2587 }
 0x4b2   : > { %v4929_v1 = vadd.f32 %v4889_v41, %v2653_v17  ;;  %v4932_v44 = vadd.f32 %v4889_v41, %v2588_v59 }
 0x4b5   : > { %v2663_v0 = vpop.permute.xlu0 %2662  ;;  %v2598_v12 = vpop.permute.xlu1 %2597 }
 0x4b6   : > { %v4935_v5 = vadd.f32 %v4889_v41, %v2663_v0  ;;  %v4938_v35 = vadd.f32 %v4889_v41, %v2598_v12 }
 0x4b9   : > { %v2673_v40 = vpop.permute.xlu0 %2672  ;;  %v2608_v29 = vpop.permute.xlu1 %2607 }
 0x4ba   : > { %v4941_v8 = vadd.f32 %v2840_v6, %v2673_v40  ;;  %v4944_v17 = vadd.f32 %v4889_v41, %v2608_v29 }
 0x4bc   : > { %5841 = vst [vmem:[#allocation32_spill] sm:$0xff] %v4941_v8 }
 0x4bd   : > { %v2683_v59 = vpop.permute.xlu0 %2682  ;;  %v2618_v33 = vpop.permute.xlu1 %2617 }
 0x4be   : > { %v4946_v55 = vadd.f32 %v2840_v6, %v2683_v59  ;;  %v4949_v2 = vadd.f32 %v4889_v41, %v2618_v33 }
 0x4c0   : > { %5842 = vst [vmem:[#allocation50_spill] sm:$0xff] %v4946_v55 }
 0x4c1   : > { %v2693_v0 = vpop.permute.xlu0 %2692  ;;  %v2628_v48 = vpop.permute.xlu1 %2627 }
 0x4c2   : > { %v4951_v12 = vadd.f32 %v2840_v6, %v2693_v0  ;;  %v4954_v63 = vadd.f32 %v4889_v41, %v2628_v48 }
 0x4c4   : > { %5843 = vst [vmem:[#allocation33_spill] sm:$0xff] %v4951_v12 }
 0x4c5   : > { %v2703_v51 = vpop.permute.xlu0 %2702  ;;  %v2638_v40 = vpop.permute.xlu1 %2637 }
 0x4c6   : > { %v4956_v8 = vadd.f32 %v2840_v6, %v2703_v51  ;;  %v4959_v29 = vadd.f32 %v4889_v41, %v2638_v40 }
 0x4c8   : > { %5844 = vst [vmem:[#allocation49_spill] sm:$0xff] %v4956_v8 }
 0x4c9   : > { %v2713_v15 = vpop.permute.xlu0 %2712  ;;  %v2648_v59 = vpop.permute.xlu1 %2647 }
 0x4ca   : > { %v4961_v55 = vadd.f32 %v2840_v6, %v2713_v15  ;;  %v4964_v33 = vadd.f32 %v4889_v41, %v2648_v59 }
 0x4cc   : > { %5845 = vst [vmem:[#allocation52_spill] sm:$0xff] %v4961_v55 }
 0x4cd   : > { %v2723_v54 = vpop.permute.xlu0 %2722  ;;  %v2658_v0 = vpop.permute.xlu1 %2657 }
 0x4ce   : > { %v4966_v12 = vadd.f32 %v2840_v6, %v2723_v54  ;;  %v4969_v48 = vadd.f32 %v4889_v41, %v2658_v0 }
 0x4d0   : > { %5846 = vst [vmem:[#allocation51_spill] sm:$0xff] %v4966_v12 }
 0x4d1   : > { %v2733_v4 = vpop.permute.xlu0 %2732  ;;  %v2668_v51 = vpop.permute.xlu1 %2667 }
 0x4d2   : > { %v4971_v8 = vadd.f32 %v2840_v6, %v2733_v4  ;;  %v4973_v40 = vadd.f32 %v2840_v6, %v2668_v51 }
 0x4d4   : > { %5847 = vst [vmem:[#allocation54_spill] sm:$0xff] %v4971_v8  ;;  %5848 = vst [vmem:[#allocation53_spill] sm:$0xff] %v4973_v40 }
 0x4d5   : > { %v2743_v37 = vpop.permute.xlu0 %2742  ;;  %v2678_v10 = vpop.permute.xlu1 %2677 }
 0x4d6   : > { %v4975_v15 = vadd.f32 %v2840_v6, %v2743_v37  ;;  %v4977_v55 = vadd.f32 %v2840_v6, %v2678_v10 }
 0x4d8   : > { %5849 = vst [vmem:[#allocation14_spill] sm:$0xff] %v4975_v15  ;;  %5850 = vst [vmem:[#allocation56_spill] sm:$0xff] %v4977_v55 }
 0x4d9   : > { %v2753_v59 = vpop.permute.xlu0 %2752  ;;  %v2688_v13 = vpop.permute.xlu1 %2687 }
 0x4da   : > { %v4979_v58 = vadd.f32 %v2840_v6, %v2688_v13 }
 0x4dc   : > { %5851 = vst [vmem:[#allocation55_spill] sm:$0xff] %v4979_v58 }
 0x4dd   : > { %v2763_v54 = vpop.permute.xlu0 %2762  ;;  %v2698_v12 = vpop.permute.xlu1 %2697 }
 0x4de   : > { %v4981_v41 = vadd.f32 %v2840_v6, %v2698_v12 }
 0x4e0   : > { %5852 = vst [vmem:[#allocation58_spill] sm:$0xff] %v4981_v41 }
 0x4e1   : > { %v2708_v0 = vpop.permute.xlu1 %2707  ;;  %v2773_v36 = vpop.permute.xlu0 %2772 }
 0x4e2   : > { %v4983_v4 = vadd.f32 %v2840_v6, %v2708_v0  ;;  %v2500_v0 = vrot.slane %v4865_v30, %v5748_v39 }
 0x4e4   : > { %5853 = vst [vmem:[#allocation57_spill] sm:$0xff] %v4983_v4 }
 0x4e5   : > { %v2718_v51 = vpop.permute.xlu1 %2717  ;;  %v2783_v40 = vpop.permute.xlu0 %2782 }
 0x4e6   : > { %v4985_v8 = vadd.f32 %v2840_v6, %v2718_v51  ;;  %v2464_v51 = vcombine.high %v4875_v19, %v4875_v19 }
 0x4e8   : > { %5854 = vst [vmem:[#allocation60_spill] sm:$0xff] %v4985_v8  ;;  %v2504_v50 = vmul.f32 %v2500_v0, %v2464_v51 }
 0x4e9   : > { %v2728_v37 = vpop.permute.xlu1 %2727  ;;  %v2793_v55 = vpop.permute.xlu0 %2792 }
 0x4ea   : > { %v4987_v15 = vadd.f32 %v2840_v6, %v2728_v37 }
 0x4ec   : > { %5855 = vst [vmem:[#allocation59_spill] sm:$0xff] %v4987_v15  ;;  %v2844_v15 = vrot.slane %v2504_v50, %v5748_v39 }
 0x4ed   : > { %v2738_v10 = vpop.permute.xlu1 %2737  ;;  %v2803_v58 = vpop.permute.xlu0 %2802 }
 0x4ee   : > { %v4989_v32 = vadd.f32 %v2840_v6, %v2738_v10  ;;  %v4996_v10 = vadd.f32 %v2844_v15, %v2753_v59  ;;  %v5000_v52 = vadd.f32 %v2844_v15, %v2773_v36  ;;  %v5002_v21 = vadd.f32 %v2844_v15, %v2783_v40 }
 0x4ef   : > { %v5004_v30 = vadd.f32 %v2844_v15, %v2793_v55  ;;  %v5006_v34 = vadd.f32 %v2844_v15, %v2803_v58 }
 0x4f0   : > { %5856 = vst [vmem:[#allocation15_spill] sm:$0xff] %v4989_v32  ;;  %v4998_v32 = vadd.f32 %v2844_v15, %v2763_v54 }
 0x4f1   : > { %v2748_v13 = vpop.permute.xlu1 %2747  ;;  %v2813_v41 = vpop.permute.xlu0 %2812 }
 0x4f2   : > { %v5008_v19 = vadd.f32 %v2844_v15, %v2813_v41  ;;  %v5010_v0 = vadd.f32 %v2844_v15, %v2748_v13 }
 0x4f5   : > { %v2758_v49 = vpop.permute.xlu1 %2757  ;;  %v2823_v8 = vpop.permute.xlu0 %2822 }
 0x4f6   : > { %v5012_v51 = vadd.f32 %v2844_v15, %v2823_v8  ;;  %v5014_v39 = vadd.f32 %v2844_v15, %v2758_v49 }
 0x4f8   : > { %5857 = vst [vmem:[#allocation7_spill] sm:$0xff] %v5012_v51 }
 0x4f9   : > { %v2768_v12 = vpop.permute.xlu1 %2767 }
 0x4fa   : > { %v2919_v6 = vpop.permute.xlu0 %2918  ;;  %v5016_v50 = vadd.f32 %v2844_v15, %v2768_v12 }
 0x4fb   : > { %v2945_v59 = vmul.f32 %v2919_v6, %v5757_v24  ;;  %v2946_v40 = vmul.f32 %v2919_v6, %v5758_v28  ;;  %v2947_v55 = vmul.f32 %v2919_v6, %v5764_v27  ;;  %v2948_v58 = vmul.f32 %v2919_v6, %v5769_v20 }
 0x4fc   : > { %v2949_v54 = vmul.f32 %v2919_v6, %v5773_v45  ;;  %v2950_v41 = vmul.f32 %v2919_v6, %v5777_v46  ;;  %v2951_v8 = vmul.f32 %v2919_v6, %v5781_v56  ;;  %v2952_v49 = vmul.f32 %v2919_v6, %v5785_v11 }
 0x4fd   : > { %v2778_v4 = vpop.permute.xlu1 %2777  ;;  %v2953_v13 = vmul.f32 %v2919_v6, %v5789_v60  ;;  %v2954_v12 = vmul.f32 %v2919_v6, %v5793_v53  ;;  %v2955_v24 = vmul.f32 %v2919_v6, %v5798_v16  ;;  %v2956_v28 = vmul.f32 %v2919_v6, %v5802_v7 }
 0x4fe   : > { %v2957_v27 = vmul.f32 %v2919_v6, %v5806_v62  ;;  %v2958_v20 = vmul.f32 %v2919_v6, %v5810_v42  ;;  %v2959_v45 = vmul.f32 %v2919_v6, %v5814_v23  ;;  %v2960_v46 = vmul.f32 %v2919_v6, %v5818_v38 }
 0x4ff   : > { %v5034_v51 = vadd.f32 %v2844_v15, %v2778_v4  ;;  %v5037_v11 = vadd.f32 %v2945_v59, %v4932_v44  ;;  %v5040_v60 = vadd.f32 %v2946_v40, %v4892_v9  ;;  %v5043_v53 = vadd.f32 %v2947_v55, %v4938_v35  ;;  %v5864_v59 = vld [vmem:[#allocation35_spill] sm:$0xff]  ;;  %v5866_v55 = vld [vmem:[#allocation37_spill] sm:$0xff] }
 0x500   : > { %v5046_v16 = vadd.f32 %v2948_v58, %v4898_v43  ;;  %v5049_v7 = vadd.f32 %v2949_v54, %v4944_v17  ;;  %v5052_v62 = vadd.f32 %v2950_v41, %v4904_v61  ;;  %v5055_v42 = vadd.f32 %v2951_v8, %v4949_v2  ;;  %v5868_v41 = vld [vmem:[#allocation39_spill] sm:$0xff]  ;;  %v5869_v8 = vld [vmem:[#allocation40_spill] sm:$0xff] }
 0x501   : > { %v2788_v37 = vpop.permute.xlu1 %2787  ;;  %v5058_v23 = vadd.f32 %v2952_v49, %v4910_v47  ;;  %v5063_v9 = vadd.f32 %v2953_v13, %v4954_v63  ;;  %v5066_v43 = vadd.f32 %v2954_v12, %v4915_v22  ;;  %v5069_v44 = vadd.f32 %v2955_v24, %v4959_v29  ;;  %v5870_v49 = vld [vmem:[#allocation41_spill] sm:$0xff]  ;;  %v5871_v13 = vld [vmem:[#allocation42_spill] sm:$0xff]  ;;  %v5872_v12 = vld [vmem:[#allocation43_spill] sm:$0xff] }
 0x502   : > { %v5060_v38 = vadd.f32 %v2844_v15, %v2788_v37  ;;  %v5072_v61 = vadd.f32 %v2956_v28, %v4920_v57  ;;  %v5075_v35 = vadd.f32 %v2957_v27, %v4964_v33  ;;  %v5078_v47 = vadd.f32 %v2958_v20, %v4929_v1  ;;  %v5873_v24 = vld [vmem:[#allocation44_spill] sm:$0xff]  ;;  %v5874_v27 = vld [vmem:[#allocation6_spill] sm:$0xff] }
 0x503   : > { %v5081_v17 = vadd.f32 %v2959_v45, %v4969_v48  ;;  %v5090_v4 = vadd.f32 %v2960_v46, %v4935_v5  ;;  %v5867_v5 = vld [vmem:[#allocation38_spill] sm:$0xff]  ;;  %v5875_v45 = vld [vmem:[#allocation12_spill] sm:$0xff] }
 0x504   : > { %5858 = vst [vmem:[#allocation81_spill] sm:$0xff] %v5072_v61  ;;  %5859 = vst [vmem:[#allocation82_spill] sm:$0xff] %v5075_v35 }
 0x505   : > { %v2798_v3 = vpop.permute.xlu1 %2797  ;;  %5860 = vst [vmem:[#allocation83_spill] sm:$0xff] %v5078_v47  ;;  %5861 = vst [vmem:[#allocation84_spill] sm:$0xff] %v5081_v17  ;;  %v5881_v17 = vld [vmem:[#allocation5_spill] sm:$0xff] }
 0x506   : > { %v5083_v2 = vadd.f32 %v2844_v15, %v2798_v3  ;;  %5862 = vst [vmem:[#allocation85_spill] sm:$0xff] %v5090_v4  ;;  %v5863_v3 = vld [vmem:[#allocation34_spill] sm:$0xff]  ;;  %v5882_v47 = vld [vmem:[#allocation29_spill] sm:$0xff] }
 0x509   : > { %v2808_v36 = vpop.permute.xlu1 %2807 }
 0x50a   : > { %v5085_v63 = vadd.f32 %v2844_v15, %v2808_v36 }
 0x50d   : > { %v2818_v56 = vpop.permute.xlu1 %2817 }
 0x50e   : > { %v5087_v22 = vadd.f32 %v2844_v15, %v2818_v56  ;;  %v5865_v15 = vld [vmem:[#allocation36_spill] sm:$0xff]  ;;  %v5876_v56 = vld [vmem:[#allocation45_spill] sm:$0xff] }
 0x512   : > { %v2915_v29 = vpop.permute.xlu1 %2914 }
 0x513   : > { %v2929_v57 = vmul.f32 %v2915_v29, %v5762_v26  ;;  %v2930_v33 = vmul.f32 %v2915_v29, %v5763_v18  ;;  %v2931_v1 = vmul.f32 %v2915_v29, %v5766_v31  ;;  %v2932_v37 = vmul.f32 %v2915_v29, %v5771_v14 }
 0x514   : > { %v2933_v48 = vmul.f32 %v2915_v29, %v5775_v25  ;;  %v2934_v6 = vmul.f32 %v2915_v29, %v5863_v3  ;;  %v2935_v36 = vmul.f32 %v2915_v29, %v5864_v59  ;;  %v2936_v40 = vmul.f32 %v2915_v29, %v5865_v15  ;;  %v5877_v59 = vld [vmem:[#allocation9_spill] sm:$0xff] }
 0x515   : > { %v2937_v58 = vmul.f32 %v2915_v29, %v5866_v55  ;;  %v2938_v54 = vmul.f32 %v2915_v29, %v5867_v5  ;;  %v2939_v26 = vmul.f32 %v2915_v29, %v5868_v41  ;;  %v2940_v18 = vmul.f32 %v2915_v29, %v5869_v8  ;;  %v3059_v55 = vpop.permute.xlu0 %3058  ;;  %v5878_v5 = vld [vmem:[#allocation13_spill] sm:$0xff]  ;;  %v5879_v8 = vld [vmem:[#allocation11_spill] sm:$0xff] }
 0x516   : > { %v2941_v31 = vmul.f32 %v2915_v29, %v5870_v49  ;;  %v2942_v14 = vmul.f32 %v2915_v29, %v5871_v13  ;;  %v2943_v25 = vmul.f32 %v2915_v29, %v5872_v12  ;;  %v2944_v28 = vmul.f32 %v2915_v29, %v5873_v24  ;;  %v5880_v49 = vld [vmem:[#allocation30_spill] sm:$0xff]  ;;  %v5883_v24 = vld [vmem:[#allocation80_spill] sm:$0xff]  ;;  %v5124_v61 = vpop.permute.xlu1 %2922 }
 0x517   : > { %v2993_v20 = vadd.f32 %v2929_v57, %v5874_v27  ;;  %v2994_v46 = vadd.f32 %v2930_v33, %v5875_v45  ;;  %v2995_v3 = vadd.f32 %v2931_v1, %v5876_v56  ;;  %v2996_v15 = vadd.f32 %v2932_v37, %v5877_v59  ;;  %v5884_v27 = vld [vmem:[#allocation48_spill] sm:$0xff]  ;;  %v5886_v56 = vld [vmem:[#allocation31_spill] sm:$0xff]  ;;  %v5887_v59 = vld [vmem:[#allocation10_spill] sm:$0xff]  ;;  %5890 = vst [vmem:[#allocation34_spill] sm:$0xff] %v5124_v61 }
 0x518   : > { %v2997_v41 = vadd.f32 %v2933_v48, %v5878_v5  ;;  %v2998_v4 = vadd.f32 %v2934_v6, %v5879_v8  ;;  %v2999_v13 = vadd.f32 %v2935_v36, %v5880_v49  ;;  %v3000_v12 = vadd.f32 %v2936_v40, %v5881_v17  ;;  %v5885_v45 = vld [vmem:[#allocation8_spill] sm:$0xff]  ;;  %v5888_v48 = vld [vmem:[#allocation47_spill] sm:$0xff]  ;;  %v5889_v6 = vld [vmem:[#allocation46_spill] sm:$0xff] }
 0x519   : > { %v3001_v29 = vadd.f32 %v2937_v58, %v5882_v47  ;;  %v3002_v57 = vadd.f32 %v2938_v54, %v5883_v24  ;;  %v3003_v33 = vadd.f32 %v2939_v26, %v5884_v27  ;;  %v3004_v1 = vadd.f32 %v2940_v18, %v5885_v45 }
 0x51a   : > { %v3005_v37 = vadd.f32 %v2941_v31, %v5886_v56  ;;  %v3006_v35 = vadd.f32 %v2942_v14, %v5887_v59  ;;  %v3007_v5 = vadd.f32 %v2943_v25, %v5888_v48  ;;  %v3008_v8 = vadd.f32 %v2944_v28, %v5889_v6 }
 0x51b   : > { %v3073_v36 = vadd.f32 %v3059_v55, %v2993_v20  ;;  %v3074_v17 = vadd.f32 %v3059_v55, %v2994_v46  ;;  %v3075_v47 = vadd.f32 %v3059_v55, %v2995_v3  ;;  %v3076_v40 = vadd.f32 %v3059_v55, %v2996_v15  ;;  %v5891_v3 = vld [vmem:[#allocation24_spill] sm:$0xff] }
 0x51c   : > { %v3077_v58 = vadd.f32 %v3059_v55, %v2997_v41  ;;  %v3078_v54 = vadd.f32 %v3059_v55, %v2998_v4  ;;  %v3079_v26 = vadd.f32 %v3059_v55, %v2999_v13  ;;  %v3080_v18 = vadd.f32 %v3059_v55, %v3000_v12  ;;  %v5135_v4 = vpop.permute.xlu1 %2926  ;;  %v5892_v12 = vld [vmem:[#allocation17_spill] sm:$0xff] }
 0x51d   : > { %v3081_v49 = vadd.f32 %v3059_v55, %v3001_v29  ;;  %v3082_v31 = vadd.f32 %v3059_v55, %v3002_v57  ;;  %v3083_v24 = vadd.f32 %v3059_v55, %v3003_v33  ;;  %v3084_v14 = vadd.f32 %v3059_v55, %v3004_v1 }
 0x51e   : > { %v3085_v27 = vadd.f32 %v3059_v55, %v3005_v37  ;;  %v3086_v25 = vadd.f32 %v3059_v55, %v3006_v35  ;;  %v5127_v45 = vadd.f32 %v3059_v55, %v3007_v5  ;;  %v5129_v28 = vadd.f32 %v3059_v55, %v3008_v8 }
 0x51f   : > { %vm3137_vm10 = vcmp.ge.f32.partialorder %v3073_v36, 0.0  ;;  %vm3138_vm11 = vcmp.ge.f32.partialorder %v3074_v17, 0.0  ;;  %vm3139_vm12 = vcmp.ge.f32.partialorder %v3075_v47, 0.0  ;;  %vm3140_vm13 = vcmp.ge.f32.partialorder %v3076_v40, 0.0 }
 0x520   : > { %vm3141_vm14 = vcmp.ge.f32.partialorder %v3077_v58, 0.0  ;;  %vm3142_vm15 = vcmp.ge.f32.partialorder %v3078_v54, 0.0  ;;  %vm3143_vm0 = vcmp.ge.f32.partialorder %v3079_v26, 0.0  ;;  %vm3144_vm1 = vcmp.ge.f32.partialorder %v3080_v18, 0.0 }
 0x521   : > { %vm3145_vm2 = vcmp.ge.f32.partialorder %v3081_v49, 0.0  ;;  %vm3146_vm3 = vcmp.ge.f32.partialorder %v3082_v31, 0.0  ;;  %vm3147_vm4 = vcmp.ge.f32.partialorder %v3083_v24, 0.0  ;;  %vm3148_vm5 = vcmp.ge.f32.partialorder %v3084_v14, 0.0 }
 0x522   : > { %vm3149_vm6 = vcmp.ge.f32.partialorder %v3085_v27, 0.0  ;;  %vm3150_vm7 = vcmp.ge.f32.partialorder %v3086_v25, 0.0  ;;  %vm3151_vm8 = vcmp.ge.f32.partialorder %v5127_v45, 0.0  ;;  %vm3152_vm9 = vcmp.ge.f32.partialorder %v5129_v28, 0.0 }
 0x523   : > { %v3201_v35 = vmul.f32 0.01, %v3073_v36  ;;  %v3202_v20 = vmul.f32 0.01, %v3074_v17  ;;  %v3203_v46 = vmul.f32 0.01, %v3075_v47  ;;  %v2977_v15 = vmul.f32 %v5135_v4, %v5891_v3 }
 0x524   : > { %v3204_v55 = vmul.f32 0.01, %v3076_v40  ;;  %v3205_v41 = vmul.f32 0.01, %v3077_v58  ;;  %v3206_v13 = vmul.f32 0.01, %v3078_v54  ;;  %v2978_v29 = vmul.f32 %v5135_v4, %v5892_v12 }
 0x525   : > { %v3207_v57 = vmul.f32 0.01, %v3079_v26  ;;  %v3208_v33 = vmul.f32 0.01, %v3080_v18  ;;  %v3209_v1 = vmul.f32 0.01, %v3081_v49  ;;  %v3265_v56 = vsel %vm3137_vm10, %v3073_v36, %v3201_v35 }
 0x526   : > { %v3210_v37 = vmul.f32 0.01, %v3082_v31  ;;  %v3211_v59 = vmul.f32 0.01, %v3083_v24  ;;  %v3212_v48 = vmul.f32 0.01, %v3084_v14  ;;  %v3266_v5 = vsel %vm3138_vm11, %v3074_v17, %v3202_v20  ;;  %3329 = vst [vmem:[%s5146_s17] sm:$0xff] %v3265_v56 }
 0x527   : > { %v3213_v6 = vmul.f32 0.01, %v3085_v27  ;;  %v3214_v8 = vmul.f32 0.01, %v3086_v25  ;;  %v3215_v3 = vmul.f32 0.01, %v5127_v45  ;;  %v3267_v36 = vsel %vm3139_vm12, %v3075_v47, %v3203_v46 }
 0x528   : > { %3330 = vst [vmem:[%s5146_s17 + $0x8] sm:$0xff] %v3266_v5  ;;  %v3216_v35 = vmul.f32 0.01, %v5129_v28  ;;  %v3268_v17 = vsel %vm3140_vm13, %v3076_v40, %v3204_v55  ;;  %v3269_v20 = vsel %vm3141_vm14, %v3077_v58, %v3205_v41  ;;  %v3270_v12 = vsel %vm3142_vm15, %v3078_v54, %v3206_v13  ;;  %3331 = vst [vmem:[%s5146_s17 + $0x10] sm:$0xff] %v3267_v36  ;;  %v5897_v41 = vld [vmem:[#allocation74_spill] sm:$0xff]  ;;  %v5898_v13 = vld [vmem:[#allocation21_spill] sm:$0xff] }
 0x529   : > { %v3271_v56 = vsel %vm3143_vm0, %v3079_v26, %v3207_v57  ;;  %v3272_v61 = vsel %vm3144_vm1, %v3080_v18, %v3208_v33  ;;  %v3273_v47 = vsel %vm3145_vm2, %v3081_v49, %v3209_v1  ;;  %v3274_v46 = vsel %vm3146_vm3, %v3082_v31, %v3210_v37  ;;  %3332 = vst [vmem:[%s5146_s17 + $0x18] sm:$0xff] %v3268_v17  ;;  %v5893_v31 = vld [vmem:[#allocation26_spill] sm:$0xff]  ;;  %v5899_v33 = vld [vmem:[#allocation75_spill] sm:$0xff] }
 0x52a   : > { %3333 = vst [vmem:[%s5146_s17 + $0x20] sm:$0xff] %v3269_v20  ;;  %3334 = vst [vmem:[%s5146_s17 + $0x28] sm:$0xff] %v3270_v12  ;;  %v3275_v40 = vsel %vm3147_vm4, %v3083_v24, %v3211_v59  ;;  %v3276_v58 = vsel %vm3148_vm5, %v3084_v14, %v3212_v48  ;;  %v3277_v54 = vsel %vm3149_vm6, %v3085_v27, %v3213_v6  ;;  %v5894_v14 = vld [vmem:[#allocation18_spill] sm:$0xff]  ;;  %v5895_v27 = vld [vmem:[#allocation28_spill] sm:$0xff] }
 0x52b   : > { %v3278_v26 = vsel %vm3150_vm7, %v3086_v25, %v3214_v8  ;;  %3335 = vst [vmem:[%s5146_s17 + $0x30] sm:$0xff] %v3271_v56  ;;  %3336 = vst [vmem:[%s5146_s17 + $0x38] sm:$0xff] %v3272_v61  ;;  %v3279_v18 = vsel %vm3151_vm8, %v5127_v45, %v3215_v3  ;;  %v3280_v49 = vsel %vm3152_vm9, %v5129_v28, %v3216_v35  ;;  %v5896_v45 = vld [vmem:[#allocation19_spill] sm:$0xff]  ;;  %v5901_v48 = vld [vmem:[#allocation76_spill] sm:$0xff] }
 0x52c   : > { %3337 = vst [vmem:[%s5146_s17 + $0x40] sm:$0xff] %v3273_v47  ;;  %3338 = vst [vmem:[%s5146_s17 + $0x48] sm:$0xff] %v3274_v46  ;;  %v2979_v24 = vmul.f32 %v5135_v4, %v5893_v31  ;;  %v2980_v61 = vmul.f32 %v5135_v4, %v5894_v14  ;;  %v2981_v25 = vmul.f32 %v5135_v4, %v5895_v27  ;;  %v5900_v37 = vld [vmem:[#allocation23_spill] sm:$0xff]  ;;  %v5902_v6 = vld [vmem:[#allocation25_spill] sm:$0xff] }
 0x52d   : > { %3339 = vst [vmem:[%s5146_s17 + $0x50] sm:$0xff] %v3275_v40  ;;  %3340 = vst [vmem:[%s5146_s17 + $0x58] sm:$0xff] %v3276_v58  ;;  %v2982_v55 = vmul.f32 %v5135_v4, %v5896_v45  ;;  %v2983_v28 = vmul.f32 %v5135_v4, %v5897_v41  ;;  %v2984_v57 = vmul.f32 %v5135_v4, %v5898_v13  ;;  %v5903_v3 = vld [vmem:[#allocation77_spill] sm:$0xff]  ;;  %v5904_v35 = vld [vmem:[#allocation27_spill] sm:$0xff] }
 0x52e   : > { %3341 = vst [vmem:[%s5146_s17 + $0x60] sm:$0xff] %v3277_v54  ;;  %3342 = vst [vmem:[%s5146_s17 + $0x68] sm:$0xff] %v3278_v26  ;;  %v2985_v1 = vmul.f32 %v5135_v4, %v5899_v33  ;;  %v2986_v59 = vmul.f32 %v5135_v4, %v5900_v37  ;;  %v2987_v5 = vmul.f32 %v5135_v4, %v5901_v48  ;;  %v5905_v20 = vld [vmem:[#allocation79_spill] sm:$0xff]  ;;  %v5906_v56 = vld [vmem:[#allocation78_spill] sm:$0xff]  ;;  %v3071_v26 = vpop.permute.xlu0 %3070 }
 0x52f   : > { %3343 = vst [vmem:[%s5146_s17 + $0x70] sm:$0xff] %v3279_v18  ;;  %3344 = vst [vmem:[%s5146_s17 + $0x78] sm:$0xff] %v3280_v49  ;;  %v2988_v8 = vmul.f32 %v5135_v4, %v5902_v6  ;;  %v2989_v36 = vmul.f32 %v5135_v4, %v5903_v3  ;;  %v2990_v17 = vmul.f32 %v5135_v4, %v5904_v35 }
 0x530   : > { %v2991_v12 = vmul.f32 %v5135_v4, %v5905_v20  ;;  %v2992_v47 = vmul.f32 %v5135_v4, %v5906_v56  ;;  %v3041_v46 = vadd.f32 %v2977_v15, %v5010_v0  ;;  %v3042_v40 = vadd.f32 %v2978_v29, %v4996_v10  ;;  %v5907_v15 = vld [vmem:[#allocation7_spill] sm:$0xff] }
 0x531   : > { %v3043_v58 = vadd.f32 %v2979_v24, %v5014_v39  ;;  %v3044_v54 = vadd.f32 %v2980_v61, %v4998_v32  ;;  %v3045_v18 = vadd.f32 %v2981_v25, %v5016_v50  ;;  %v3046_v49 = vadd.f32 %v2982_v55, %v5000_v52 }
 0x532   : > { %v3047_v31 = vadd.f32 %v2983_v28, %v5034_v51  ;;  %v3048_v14 = vadd.f32 %v2984_v57, %v5002_v21  ;;  %v3049_v27 = vadd.f32 %v2985_v1, %v5060_v38  ;;  %v3050_v4 = vadd.f32 %v2986_v59, %v5004_v30 }
 0x533   : > { %v3051_v0 = vadd.f32 %v2987_v5, %v5083_v2  ;;  %v3052_v10 = vadd.f32 %v2988_v8, %v5006_v34  ;;  %v3053_v39 = vadd.f32 %v2989_v36, %v5085_v63  ;;  %v3054_v32 = vadd.f32 %v2990_v17, %v5008_v19 }
 0x534   : > { %v3055_v50 = vadd.f32 %v2991_v12, %v5087_v22  ;;  %v3056_v52 = vadd.f32 %v2992_v47, %v5907_v15  ;;  %v3121_v29 = vadd.f32 %v3071_v26, %v3041_v46  ;;  %v3122_v51 = vadd.f32 %v3071_v26, %v3042_v40  ;;  %v5228_v22 = vpop.permute.xlu1 %3062 }
 0x535   : > { %v3123_v24 = vadd.f32 %v3071_v26, %v3043_v58  ;;  %v3124_v21 = vadd.f32 %v3071_v26, %v3044_v54  ;;  %v3125_v61 = vadd.f32 %v3071_v26, %v3045_v18  ;;  %v3126_v38 = vadd.f32 %v3071_v26, %v3046_v49 }
 0x536   : > { %v3127_v25 = vadd.f32 %v3071_v26, %v3047_v31  ;;  %v3128_v30 = vadd.f32 %v3071_v26, %v3048_v14  ;;  %v3129_v45 = vadd.f32 %v3071_v26, %v3049_v27  ;;  %v3130_v2 = vadd.f32 %v3071_v26, %v3050_v4 }
 0x537   : > { %v3131_v55 = vadd.f32 %v3071_v26, %v3051_v0  ;;  %v3132_v34 = vadd.f32 %v3071_v26, %v3052_v10  ;;  %v3133_v41 = vadd.f32 %v3071_v26, %v3053_v39  ;;  %v3134_v63 = vadd.f32 %v3071_v26, %v3054_v32 }
 0x538   : > { %v3135_v28 = vadd.f32 %v3071_v26, %v3055_v50  ;;  %v3136_v19 = vadd.f32 %v3071_v26, %v3056_v52  ;;  %vm3185_vm10 = vcmp.ge.f32.partialorder %v3121_v29, 0.0  ;;  %vm3186_vm11 = vcmp.ge.f32.partialorder %v3122_v51, 0.0 }
 0x539   : > { %vm3187_vm12 = vcmp.ge.f32.partialorder %v3123_v24, 0.0  ;;  %vm3188_vm13 = vcmp.ge.f32.partialorder %v3124_v21, 0.0  ;;  %vm3189_vm14 = vcmp.ge.f32.partialorder %v3125_v61, 0.0  ;;  %vm3190_vm15 = vcmp.ge.f32.partialorder %v3126_v38, 0.0 }
 0x53a   : > { %vm3191_vm0 = vcmp.ge.f32.partialorder %v3127_v25, 0.0  ;;  %vm3192_vm1 = vcmp.ge.f32.partialorder %v3128_v30, 0.0  ;;  %vm3193_vm2 = vcmp.ge.f32.partialorder %v3129_v45, 0.0  ;;  %vm3194_vm3 = vcmp.ge.f32.partialorder %v3130_v2, 0.0 }
 0x53b   : > { %vm3195_vm4 = vcmp.ge.f32.partialorder %v3131_v55, 0.0  ;;  %vm3196_vm5 = vcmp.ge.f32.partialorder %v3132_v34, 0.0  ;;  %vm3197_vm6 = vcmp.ge.f32.partialorder %v3133_v41, 0.0  ;;  %vm3198_vm7 = vcmp.ge.f32.partialorder %v3134_v63, 0.0 }
 0x53c   : > { %vm3199_vm8 = vcmp.ge.f32.partialorder %v3135_v28, 0.0  ;;  %vm3200_vm9 = vcmp.ge.f32.partialorder %v3136_v19, 0.0  ;;  %v3249_v13 = vmul.f32 0.01, %v3121_v29  ;;  %v3250_v57 = vmul.f32 0.01, %v3122_v51 }
 0x53d   : > { %v3251_v33 = vmul.f32 0.01, %v3123_v24  ;;  %v5232_v1 = vadd.f32 %v5228_v22, %v5037_v11  ;;  %v3252_v37 = vmul.f32 0.01, %v3124_v21  ;;  %v3253_v59 = vmul.f32 0.01, %v3125_v61 }
 0x53e   : > { %v3254_v48 = vmul.f32 0.01, %v3126_v38  ;;  %v5236_v5 = vadd.f32 %v5228_v22, %v5040_v60  ;;  %v3255_v6 = vmul.f32 0.01, %v3127_v25  ;;  %v3256_v8 = vmul.f32 0.01, %v3128_v30 }
 0x53f   : > { %v3257_v3 = vmul.f32 0.01, %v3129_v45  ;;  %v3313_v36 = vsel %vm3185_vm10, %v3121_v29, %v3249_v13  ;;  %v3258_v35 = vmul.f32 0.01, %v3130_v2  ;;  %v3259_v17 = vmul.f32 0.01, %v3131_v55 }
 0x540   : > { %v3260_v20 = vmul.f32 0.01, %v3132_v34  ;;  %v3314_v11 = vsel %vm3186_vm11, %v3122_v51, %v3250_v57  ;;  %3377 = vst [vmem:[%s5146_s17 + $0x180] sm:$0xff] %v3313_v36  ;;  %v3261_v12 = vmul.f32 0.01, %v3133_v41  ;;  %v3315_v60 = vsel %vm3187_vm12, %v3123_v24, %v3251_v33 }
 0x541   : > { %v3262_v56 = vmul.f32 0.01, %v3134_v63  ;;  %v3263_v47 = vmul.f32 0.01, %v3135_v28  ;;  %3378 = vst [vmem:[%s5146_s17 + $0x188] sm:$0xff] %v3314_v11  ;;  %v3316_v40 = vsel %vm3188_vm13, %v3124_v21, %v3252_v37  ;;  %v3317_v58 = vsel %vm3189_vm14, %v3125_v61, %v3253_v59  ;;  %3379 = vst [vmem:[%s5146_s17 + $0x190] sm:$0xff] %v3315_v60 }
 0x542   : > { %v3264_v46 = vmul.f32 0.01, %v3136_v19  ;;  %v3318_v54 = vsel %vm3190_vm15, %v3126_v38, %v3254_v48  ;;  %v3319_v26 = vsel %vm3191_vm0, %v3127_v25, %v3255_v6  ;;  %v3320_v18 = vsel %vm3192_vm1, %v3128_v30, %v3256_v8  ;;  %3380 = vst [vmem:[%s5146_s17 + $0x198] sm:$0xff] %v3316_v40  ;;  %3381 = vst [vmem:[%s5146_s17 + $0x1a0] sm:$0xff] %v3317_v58  ;;  %v5908_v21 = vld [vmem:[#allocation81_spill] sm:$0xff]  ;;  %v5909_v61 = vld [vmem:[#allocation82_spill] sm:$0xff] }
 0x543   : > { %v3321_v49 = vsel %vm3193_vm2, %v3129_v45, %v3257_v3  ;;  %v3322_v31 = vsel %vm3194_vm3, %v3130_v2, %v3258_v35  ;;  %3382 = vst [vmem:[%s5146_s17 + $0x1a8] sm:$0xff] %v3318_v54  ;;  %v3323_v14 = vsel %vm3195_vm4, %v3131_v55, %v3259_v17  ;;  %v3324_v27 = vsel %vm3196_vm5, %v3132_v34, %v3260_v20  ;;  %v5910_v38 = vld [vmem:[#allocation83_spill] sm:$0xff]  ;;  %v5911_v25 = vld [vmem:[#allocation84_spill] sm:$0xff]  ;;  %v5912_v30 = vld [vmem:[#allocation85_spill] sm:$0xff] }
 0x544   : > { %v3325_v4 = vsel %vm3197_vm6, %v3133_v41, %v3261_v12  ;;  %v3326_v0 = vsel %vm3198_vm7, %v3134_v63, %v3262_v56  ;;  %3383 = vst [vmem:[%s5146_s17 + $0x1b0] sm:$0xff] %v3319_v26  ;;  %3384 = vst [vmem:[%s5146_s17 + $0x1b8] sm:$0xff] %v3320_v18  ;;  %v3327_v10 = vsel %vm3199_vm8, %v3135_v28, %v3263_v47  ;;  %vm3153_vm10 = vcmp.ge.f32.partialorder %v5232_v1, 0.0  ;;  %v5913_v2 = vld [vmem:[#allocation62_spill] sm:$0xff] }
 0x545   : > { %3385 = vst [vmem:[%s5146_s17 + $0x1c0] sm:$0xff] %v3321_v49  ;;  %3386 = vst [vmem:[%s5146_s17 + $0x1c8] sm:$0xff] %v3322_v31  ;;  %v3328_v39 = vsel %vm3200_vm9, %v3136_v19, %v3264_v46  ;;  %v3091_v32 = vadd.f32 %v5228_v22, %v5043_v53  ;;  %v3092_v50 = vadd.f32 %v5228_v22, %v5046_v16  ;;  %vm3154_vm11 = vcmp.ge.f32.partialorder %v5236_v5, 0.0  ;;  %v5914_v55 = vld [vmem:[#allocation34_spill] sm:$0xff]  ;;  %v5915_v19 = vld [vmem:[#allocation61_spill] sm:$0xff] }
 0x546   : > { %3387 = vst [vmem:[%s5146_s17 + $0x1d0] sm:$0xff] %v3323_v14  ;;  %3388 = vst [vmem:[%s5146_s17 + $0x1d8] sm:$0xff] %v3324_v27  ;;  %v3093_v15 = vadd.f32 %v5228_v22, %v5049_v7  ;;  %v3094_v52 = vadd.f32 %v5228_v22, %v5052_v62  ;;  %v3095_v29 = vadd.f32 %v5228_v22, %v5055_v42  ;;  %v5916_v49 = vld [vmem:[#allocation64_spill] sm:$0xff]  ;;  %v5917_v14 = vld [vmem:[#allocation63_spill] sm:$0xff] }
 0x547   : > { %3389 = vst [vmem:[%s5146_s17 + $0x1e0] sm:$0xff] %v3325_v4  ;;  %3390 = vst [vmem:[%s5146_s17 + $0x1e8] sm:$0xff] %v3326_v0  ;;  %v3096_v51 = vadd.f32 %v5228_v22, %v5058_v23  ;;  %v3097_v53 = vadd.f32 %v5228_v22, %v5063_v9  ;;  %v3098_v16 = vadd.f32 %v5228_v22, %v5066_v43  ;;  %vm3155_vm12 = vcmp.ge.f32.partialorder %v3091_v32, 0.0  ;;  %v5918_v4 = vld [vmem:[#allocation66_spill] sm:$0xff] }
 0x548   : > { %3391 = vst [vmem:[%s5146_s17 + $0x1f0] sm:$0xff] %v3327_v10  ;;  %3392 = vst [vmem:[%s5146_s17 + $0x1f8] sm:$0xff] %v3328_v39  ;;  %v3099_v24 = vadd.f32 %v5228_v22, %v5069_v44  ;;  %v3100_v7 = vadd.f32 %v5228_v22, %v5908_v21  ;;  %v3101_v62 = vadd.f32 %v5228_v22, %v5909_v61  ;;  %vm3156_vm13 = vcmp.ge.f32.partialorder %v3092_v50, 0.0  ;;  %v5919_v10 = vld [vmem:[#allocation65_spill] sm:$0xff] }
 0x549   : > { %v3102_v42 = vadd.f32 %v5228_v22, %v5910_v38  ;;  %v3103_v23 = vadd.f32 %v5228_v22, %v5911_v25  ;;  %v3104_v9 = vadd.f32 %v5228_v22, %v5912_v30  ;;  %vm3157_vm14 = vcmp.ge.f32.partialorder %v3093_v15, 0.0 }
 0x54a   : > { %vm3158_vm15 = vcmp.ge.f32.partialorder %v3094_v52, 0.0  ;;  %vm3159_vm0 = vcmp.ge.f32.partialorder %v3095_v29, 0.0  ;;  %vm3160_vm1 = vcmp.ge.f32.partialorder %v3096_v51, 0.0  ;;  %vm3161_vm2 = vcmp.ge.f32.partialorder %v3097_v53, 0.0 }
 0x54b   : > { %vm3162_vm3 = vcmp.ge.f32.partialorder %v3098_v16, 0.0  ;;  %vm3163_vm4 = vcmp.ge.f32.partialorder %v3099_v24, 0.0  ;;  %vm3164_vm5 = vcmp.ge.f32.partialorder %v3100_v7, 0.0  ;;  %vm3165_vm6 = vcmp.ge.f32.partialorder %v3101_v62, 0.0 }
 0x54c   : > { %vm3166_vm7 = vcmp.ge.f32.partialorder %v3102_v42, 0.0  ;;  %vm3167_vm8 = vcmp.ge.f32.partialorder %v3103_v23, 0.0  ;;  %vm3168_vm9 = vcmp.ge.f32.partialorder %v3104_v9, 0.0  ;;  %v3217_v43 = vmul.f32 0.01, %v5232_v1 }
 0x54d   : > { %v3218_v44 = vmul.f32 0.01, %v5236_v5  ;;  %v3219_v45 = vmul.f32 0.01, %v3091_v32  ;;  %v2961_v34 = vmul.f32 %v5914_v55, %v5913_v2  ;;  %v3220_v41 = vmul.f32 0.01, %v3092_v50 }
 0x54e   : > { %v3221_v63 = vmul.f32 0.01, %v3093_v15  ;;  %v3222_v28 = vmul.f32 0.01, %v3094_v52  ;;  %v2962_v22 = vmul.f32 %v5914_v55, %v5915_v19  ;;  %v3223_v13 = vmul.f32 0.01, %v3095_v29 }
 0x54f   : > { %v3224_v57 = vmul.f32 0.01, %v3096_v51  ;;  %v3225_v33 = vmul.f32 0.01, %v3097_v53  ;;  %v3281_v37 = vsel %vm3153_vm10, %v5232_v1, %v3217_v43  ;;  %v3226_v59 = vmul.f32 0.01, %v3098_v16 }
 0x550   : > { %v3227_v48 = vmul.f32 0.01, %v3099_v24  ;;  %v3228_v6 = vmul.f32 0.01, %v3100_v7  ;;  %v3282_v8 = vsel %vm3154_vm11, %v5236_v5, %v3218_v44  ;;  %3345 = vst [vmem:[%s5146_s17 + $0x80] sm:$0xff] %v3281_v37  ;;  %v3283_v17 = vsel %vm3155_vm12, %v3091_v32, %v3219_v45  ;;  %v5920_v32 = vld [vmem:[#allocation68_spill] sm:$0xff] }
 0x551   : > { %v3229_v3 = vmul.f32 0.01, %v3101_v62  ;;  %v3230_v36 = vmul.f32 0.01, %v3102_v42  ;;  %v3231_v35 = vmul.f32 0.01, %v3103_v23  ;;  %v3284_v1 = vsel %vm3156_vm13, %v3092_v50, %v3220_v41 }
 0x552   : > { %3346 = vst [vmem:[%s5146_s17 + $0x88] sm:$0xff] %v3282_v8  ;;  %v3232_v20 = vmul.f32 0.01, %v3104_v9  ;;  %v3285_v11 = vsel %vm3157_vm14, %v3093_v15, %v3221_v63  ;;  %v3286_v5 = vsel %vm3158_vm15, %v3094_v52, %v3222_v28  ;;  %3347 = vst [vmem:[%s5146_s17 + $0x90] sm:$0xff] %v3283_v17  ;;  %v3287_v12 = vsel %vm3159_vm0, %v3095_v29, %v3223_v13  ;;  %v5921_v15 = vld [vmem:[#allocation67_spill] sm:$0xff]  ;;  %v5922_v29 = vld [vmem:[#allocation70_spill] sm:$0xff] }
 0x553   : > { %v3288_v56 = vsel %vm3160_vm1, %v3096_v51, %v3224_v57  ;;  %v3289_v47 = vsel %vm3161_vm2, %v3097_v53, %v3225_v33  ;;  %v3290_v60 = vsel %vm3162_vm3, %v3098_v16, %v3226_v59  ;;  %3348 = vst [vmem:[%s5146_s17 + $0x98] sm:$0xff] %v3284_v1  ;;  %3349 = vst [vmem:[%s5146_s17 + $0xa0] sm:$0xff] %v3285_v11  ;;  %v5923_v53 = vld [vmem:[#allocation69_spill] sm:$0xff]  ;;  %v5931_v2 = vld [vmem:[#allocation32_spill] sm:$0xff] }
 0x554   : > { %3350 = vst [vmem:[%s5146_s17 + $0xa8] sm:$0xff] %v3286_v5  ;;  %v3291_v46 = vsel %vm3163_vm4, %v3099_v24, %v3227_v48  ;;  %v3292_v40 = vsel %vm3164_vm5, %v3100_v7, %v3228_v6  ;;  %v3293_v58 = vsel %vm3165_vm6, %v3101_v62, %v3229_v3  ;;  %v3294_v54 = vsel %vm3166_vm7, %v3102_v42, %v3230_v36  ;;  %v5924_v24 = vld [vmem:[#allocation72_spill] sm:$0xff]  ;;  %v5925_v7 = vld [vmem:[#allocation71_spill] sm:$0xff]  ;;  %v5926_v62 = vld [vmem:[#allocation73_spill] sm:$0xff]  ;;  %v3067_v36 = vpop.permute.xlu1 %3066 }
 0x555   : > { %3351 = vst [vmem:[%s5146_s17 + $0xb0] sm:$0xff] %v3287_v12  ;;  %3352 = vst [vmem:[%s5146_s17 + $0xb8] sm:$0xff] %v3288_v56  ;;  %v3295_v26 = vsel %vm3167_vm8, %v3103_v23, %v3231_v35  ;;  %v3296_v18 = vsel %vm3168_vm9, %v3104_v9, %v3232_v20  ;;  %v2963_v31 = vmul.f32 %v5914_v55, %v5916_v49  ;;  %v5927_v42 = vld [vmem:[#allocation20_spill] sm:$0xff]  ;;  %v5928_v23 = vld [vmem:[#allocation22_spill] sm:$0xff] }
 0x556   : > { %3353 = vst [vmem:[%s5146_s17 + $0xc0] sm:$0xff] %v3289_v47  ;;  %3354 = vst [vmem:[%s5146_s17 + $0xc8] sm:$0xff] %v3290_v60  ;;  %v2964_v27 = vmul.f32 %v5914_v55, %v5917_v14  ;;  %v2965_v0 = vmul.f32 %v5914_v55, %v5918_v4  ;;  %v2966_v39 = vmul.f32 %v5914_v55, %v5919_v10  ;;  %v5929_v9 = vld [vmem:[#allocation16_spill] sm:$0xff]  ;;  %v5930_v44 = vld [vmem:[#allocation53_spill] sm:$0xff] }
 0x557   : > { %3355 = vst [vmem:[%s5146_s17 + $0xd0] sm:$0xff] %v3291_v46  ;;  %3356 = vst [vmem:[%s5146_s17 + $0xd8] sm:$0xff] %v3292_v40  ;;  %v2967_v50 = vmul.f32 %v5914_v55, %v5920_v32  ;;  %v2968_v52 = vmul.f32 %v5914_v55, %v5921_v15  ;;  %v2969_v51 = vmul.f32 %v5914_v55, %v5922_v29  ;;  %v5932_v63 = vld [vmem:[#allocation56_spill] sm:$0xff]  ;;  %v5933_v19 = vld [vmem:[#allocation50_spill] sm:$0xff] }
 0x558   : > { %3357 = vst [vmem:[%s5146_s17 + $0xe0] sm:$0xff] %v3293_v58  ;;  %3358 = vst [vmem:[%s5146_s17 + $0xe8] sm:$0xff] %v3294_v54  ;;  %v2970_v16 = vmul.f32 %v5914_v55, %v5923_v53  ;;  %v2971_v21 = vmul.f32 %v5914_v55, %v5924_v24  ;;  %v2972_v61 = vmul.f32 %v5914_v55, %v5925_v7  ;;  %v5934_v57 = vld [vmem:[#allocation55_spill] sm:$0xff]  ;;  %v5935_v37 = vld [vmem:[#allocation33_spill] sm:$0xff] }
 0x559   : > { %3359 = vst [vmem:[%s5146_s17 + $0xf0] sm:$0xff] %v3295_v26  ;;  %3360 = vst [vmem:[%s5146_s17 + $0xf8] sm:$0xff] %v3296_v18  ;;  %v2973_v38 = vmul.f32 %v5914_v55, %v5926_v62  ;;  %v2974_v25 = vmul.f32 %v5914_v55, %v5927_v42  ;;  %v2975_v30 = vmul.f32 %v5914_v55, %v5928_v23  ;;  %v5936_v48 = vld [vmem:[#allocation58_spill] sm:$0xff]  ;;  %v5937_v8 = vld [vmem:[#allocation49_spill] sm:$0xff] }
 0x55a   : > { %v2976_v43 = vmul.f32 %v5914_v55, %v5929_v9  ;;  %v3025_v45 = vadd.f32 %v2961_v34, %v5930_v44  ;;  %v3026_v41 = vadd.f32 %v2962_v22, %v5931_v2  ;;  %v3027_v28 = vadd.f32 %v2963_v31, %v5932_v63  ;;  %v5938_v35 = vld [vmem:[#allocation57_spill] sm:$0xff]  ;;  %v5939_v55 = vld [vmem:[#allocation52_spill] sm:$0xff]  ;;  %v5941_v22 = vld [vmem:[#allocation51_spill] sm:$0xff] }
 0x55b   : > { %v3028_v13 = vadd.f32 %v2964_v27, %v5933_v19  ;;  %v3029_v33 = vadd.f32 %v2965_v0, %v5934_v57  ;;  %v3030_v59 = vadd.f32 %v2966_v39, %v5935_v37  ;;  %v3031_v6 = vadd.f32 %v2967_v50, %v5936_v48  ;;  %v5940_v34 = vld [vmem:[#allocation60_spill] sm:$0xff]  ;;  %v5942_v5 = vld [vmem:[#allocation59_spill] sm:$0xff]  ;;  %v5943_v56 = vld [vmem:[#allocation54_spill] sm:$0xff] }
 0x55c   : > { %v3032_v3 = vadd.f32 %v2968_v52, %v5937_v8  ;;  %v3033_v17 = vadd.f32 %v2969_v51, %v5938_v35  ;;  %v3034_v20 = vadd.f32 %v2970_v16, %v5939_v55  ;;  %v3035_v1 = vadd.f32 %v2971_v21, %v5940_v34  ;;  %v5944_v60 = vld [vmem:[#allocation15_spill] sm:$0xff]  ;;  %v5945_v40 = vld [vmem:[#allocation14_spill] sm:$0xff] }
 0x55d   : > { %v3036_v11 = vadd.f32 %v2972_v61, %v5941_v22  ;;  %v3037_v12 = vadd.f32 %v2973_v38, %v5942_v5  ;;  %v3038_v47 = vadd.f32 %v2974_v25, %v5943_v56  ;;  %v3039_v46 = vadd.f32 %v2975_v30, %v5944_v60 }
 0x55e   : > { %v3040_v58 = vadd.f32 %v2976_v43, %v5945_v40  ;;  %v3105_v54 = vadd.f32 %v3067_v36, %v3025_v45  ;;  %v3106_v26 = vadd.f32 %v3067_v36, %v3026_v41  ;;  %v3107_v18 = vadd.f32 %v3067_v36, %v3027_v28 }
 0x55f   : > { %v3108_v49 = vadd.f32 %v3067_v36, %v3028_v13  ;;  %v3109_v31 = vadd.f32 %v3067_v36, %v3029_v33  ;;  %v3110_v14 = vadd.f32 %v3067_v36, %v3030_v59  ;;  %v3111_v27 = vadd.f32 %v3067_v36, %v3031_v6 }
 0x560   : > { %v3112_v4 = vadd.f32 %v3067_v36, %v3032_v3  ;;  %v3113_v0 = vadd.f32 %v3067_v36, %v3033_v17  ;;  %v3114_v10 = vadd.f32 %v3067_v36, %v3034_v20  ;;  %v3115_v39 = vadd.f32 %v3067_v36, %v3035_v1 }
 0x561   : > { %v3116_v32 = vadd.f32 %v3067_v36, %v3036_v11  ;;  %v3117_v50 = vadd.f32 %v3067_v36, %v3037_v12  ;;  %v3118_v15 = vadd.f32 %v3067_v36, %v3038_v47  ;;  %v5386_v52 = vadd.f32 %v3067_v36, %v3039_v46 }
 0x562   : > { %v5388_v29 = vadd.f32 %v3067_v36, %v3040_v58  ;;  %vm3169_vm10 = vcmp.ge.f32.partialorder %v3105_v54, 0.0  ;;  %vm3170_vm11 = vcmp.ge.f32.partialorder %v3106_v26, 0.0  ;;  %vm3171_vm12 = vcmp.ge.f32.partialorder %v3107_v18, 0.0 }
 0x563   : > { %vm3172_vm13 = vcmp.ge.f32.partialorder %v3108_v49, 0.0  ;;  %vm3173_vm14 = vcmp.ge.f32.partialorder %v3109_v31, 0.0  ;;  %vm3174_vm15 = vcmp.ge.f32.partialorder %v3110_v14, 0.0  ;;  %vm3175_vm0 = vcmp.ge.f32.partialorder %v3111_v27, 0.0 }
 0x564   : > { %vm3176_vm1 = vcmp.ge.f32.partialorder %v3112_v4, 0.0  ;;  %vm3177_vm2 = vcmp.ge.f32.partialorder %v3113_v0, 0.0  ;;  %vm3178_vm3 = vcmp.ge.f32.partialorder %v3114_v10, 0.0  ;;  %vm3179_vm4 = vcmp.ge.f32.partialorder %v3115_v39, 0.0 }
 0x565   : > { %vm3180_vm5 = vcmp.ge.f32.partialorder %v3116_v32, 0.0  ;;  %vm3181_vm6 = vcmp.ge.f32.partialorder %v3117_v50, 0.0  ;;  %vm3182_vm7 = vcmp.ge.f32.partialorder %v3118_v15, 0.0  ;;  %vm3183_vm8 = vcmp.ge.f32.partialorder %v5386_v52, 0.0 }
 0x566   : > { %vm3184_vm9 = vcmp.ge.f32.partialorder %v5388_v29, 0.0  ;;  %v3233_v51 = vmul.f32 0.01, %v3105_v54  ;;  %v3234_v53 = vmul.f32 0.01, %v3106_v26 }
 0x567   : > { %v3235_v16 = vmul.f32 0.01, %v3107_v18  ;;  %v3236_v24 = vmul.f32 0.01, %v3108_v49  ;;  %v3237_v21 = vmul.f32 0.01, %v3109_v31 }
 0x568   : > { %v3238_v7 = vmul.f32 0.01, %v3110_v14  ;;  %v3239_v61 = vmul.f32 0.01, %v3111_v27  ;;  %v3240_v62 = vmul.f32 0.01, %v3112_v4  ;;  %v3297_v42 = vsel %vm3169_vm10, %v3105_v54, %v3233_v51 }
 0x569   : > { %v3241_v38 = vmul.f32 0.01, %v3113_v0  ;;  %v3242_v25 = vmul.f32 0.01, %v3114_v10  ;;  %v3243_v23 = vmul.f32 0.01, %v3115_v39  ;;  %v3298_v9 = vsel %vm3170_vm11, %v3106_v26, %v3234_v53 }
 0x56a   : > { %v3244_v30 = vmul.f32 0.01, %v3116_v32  ;;  %3361 = vst [vmem:[%s5146_s17 + $0x100] sm:$0xff] %v3297_v42  ;;  %v3245_v43 = vmul.f32 0.01, %v3117_v50  ;;  %v3299_v2 = vsel %vm3171_vm12, %v3107_v18, %v3235_v16  ;;  %3362 = vst [vmem:[%s5146_s17 + $0x108] sm:$0xff] %v3298_v9  ;;  %v3300_v63 = vsel %vm3172_vm13, %v3108_v49, %v3236_v24 }
 0x56b   : > { %v3246_v44 = vmul.f32 0.01, %v3118_v15  ;;  %v3247_v45 = vmul.f32 0.01, %v5386_v52  ;;  %v3248_v41 = vmul.f32 0.01, %v5388_v29  ;;  %v3301_v28 = vsel %vm3173_vm14, %v3109_v31, %v3237_v21 }
 0x56c   : > { %v3302_v19 = vsel %vm3174_vm15, %v3110_v14, %v3238_v7  ;;  %3363 = vst [vmem:[%s5146_s17 + $0x110] sm:$0xff] %v3299_v2  ;;  %v3303_v13 = vsel %vm3175_vm0, %v3111_v27, %v3239_v61  ;;  %v3304_v57 = vsel %vm3176_vm1, %v3112_v4, %v3240_v62  ;;  %v3305_v33 = vsel %vm3177_vm2, %v3113_v0, %v3241_v38 }
 0x56d   : > { %v3306_v37 = vsel %vm3178_vm3, %v3114_v10, %v3242_v25  ;;  %3364 = vst [vmem:[%s5146_s17 + $0x118] sm:$0xff] %v3300_v63  ;;  %3365 = vst [vmem:[%s5146_s17 + $0x120] sm:$0xff] %v3301_v28  ;;  %v3307_v59 = vsel %vm3179_vm4, %v3115_v39, %v3243_v23  ;;  %v3308_v48 = vsel %vm3180_vm5, %v3116_v32, %v3244_v30 }
 0x56e   : > { %3366 = vst [vmem:[%s5146_s17 + $0x128] sm:$0xff] %v3302_v19  ;;  %v3309_v6 = vsel %vm3181_vm6, %v3117_v50, %v3245_v43  ;;  %v3310_v8 = vsel %vm3182_vm7, %v3118_v15, %v3246_v44  ;;  %3367 = vst [vmem:[%s5146_s17 + $0x130] sm:$0xff] %v3303_v13  ;;  %v3311_v3 = vsel %vm3183_vm8, %v5386_v52, %v3247_v45 }
 0x56f   : > { %3368 = vst [vmem:[%s5146_s17 + $0x138] sm:$0xff] %v3304_v57  ;;  %3369 = vst [vmem:[%s5146_s17 + $0x140] sm:$0xff] %v3305_v33  ;;  %v3312_v36 = vsel %vm3184_vm9, %v5388_v29, %v3248_v41 }
 0x570   : > { %3370 = vst [vmem:[%s5146_s17 + $0x148] sm:$0xff] %v3306_v37  ;;  %3371 = vst [vmem:[%s5146_s17 + $0x150] sm:$0xff] %v3307_v59 }
 0x571   : > { %3372 = vst [vmem:[%s5146_s17 + $0x158] sm:$0xff] %v3308_v48  ;;  %3373 = vst [vmem:[%s5146_s17 + $0x160] sm:$0xff] %v3309_v6 }
 0x572   : > { %3374 = vst [vmem:[%s5146_s17 + $0x168] sm:$0xff] %v3310_v8  ;;  %3375 = vst [vmem:[%s5146_s17 + $0x170] sm:$0xff] %v3311_v3 }
 0x573   : > { %3376 = vst [vmem:[%s5146_s17 + $0x178] sm:$0xff] %v3312_v36 }
 0x574   : > { %3596 = shalt.err (!%p3593_p3)
}
 0x575   : > { %s3597_s4 = scalar_lea.hbm %s5417_s26, 8192  ;;  %s3601_s7 = scalar_lea.hbm %s5489_s3, 16384 }
 0x576   : > { %p3598_p4 = scmp.ne.s32.totalorder %s5417_s26, %s3597_s4  ;;  %p3602_p9 = scmp.lt.u32.totalorder %s5417_s26, %s5489_s3 }
 0x577   : > { %p3603_p10 = scmp.lt.u32.totalorder %s3601_s7, %s3597_s4  ;;  %p3605_p12 = scmp.lt.u32.totalorder %s3597_s4, %s5417_s26 }
 0x578   : > { %p3599_p7 = pnand %p3598_p4, %p3725_p5 }
 0x579   : > { %p3604_p11 = por %p3603_p10, %p3602_p9 }
 0x57a   : > { %p3600_p8 = pneg %p3599_p7 }
 0x57b   : > { %p3606_p13 = por %p3605_p12, %p3604_p11 }
 0x57d   : > { %p3607_p0 = pnand %p3606_p13, %p3600_p8 }
 0x57f   : > { %3610 = shalt.err (!%p3607_p0)
}
 0x580   : > { %s3665_s10 = smov 128   ;;  %s3666_s11 = smov 8  }
 0x581   : > { %3497 = dma.vmem_to_hbm [thread:$0]  (%p3725_p5), %s5421_s20, 8192, %s5417_s26, %s5445_s16, %s3665_s10, %s3665_s10, %s3666_s11  }
 0x582 PF: > { %p3503_p1 = scmp.ge.s32.totalorder %s3645_s15, 2  ;;  %s3422_s17 = sand.u32 1, %s3633_s12  }
 0x583   : > { %s3423_s19 = scalar_lea.sflag [#allocation3], %s3422_s17 }
 0x584   : > { %p3500_p2 = pnand %p3503_p1, %p3729_p6 }
 0x586   : > { %3628 = dma.done.wait (!%p3500_p2), %s3423_s19, 8192  }
 0x587   : > { %3630 = vsyncadd (!%p3500_p2), %s3423_s19, 4294959104  ;;  %p13_p3 = scmp.ge.s32.totalorder %s3712_s18, 4   ;;  %s5946_s12 = smov %s3637_s13 }
 0x588   : > { %s5947_s13 = smov %s3641_s14  ;;  %s5948_s14 = smov %s3723_s21 }
 0x589   : > { %s5949_s15 = smov %s3712_s18  ;;  %15 = sbr.rel (!%p13_p3) target bundleno = 3 (0x3), region = 70 }
 0x590   :  { %3428 = vsyncpa [#allocation3], 1 }
 0x591   :  { %3430 = vsyncpa [#allocation3 + $0x1], 1 }

</bundles_post_ra>
